<compile_context>
chip_gen: v7x
topology: tpu7x:2x2x1
jax: 0.10.0
libtpu: 0.0.40
codegen_flags: <defaults>
</compile_context>

<pallas_src>
import numpy as np
import jax
import jax.numpy as jnp
from jax import lax
from jax.experimental import pallas as pl
from jax.experimental.pallas import tpu as pltpu

# ---------------- small synthetic HuBERT-ECG config ----------------
B = 2                   # batch
T_RAW = 64              # raw signal length (samples)
CONV_DIM = (16, 16)     # feature-extractor conv channels
CONV_KERNEL = (8, 4)
CONV_STRIDE = (4, 2)
HIDDEN = 32             # hidden_size
NUM_LAYERS = 2          # num_hidden_layers
NUM_HEADS = 4           # num_attention_heads
HEAD_DIM = HIDDEN // NUM_HEADS
INTERMEDIATE = 64       # intermediate_size
POS_CONV_KERNEL = 3     # odd -> HubertSamePadLayer removes nothing
NUM_LABELS = 5
CLS_HIDDEN = 16         # classifier_hidden_size (Linear -> tanh -> dropout -> Linear)
LN_EPS = 1e-5

# derived sizes
RPB = T_RAW // (2 * CONV_STRIDE[0])                      # 8-sample raw rows per batch = 8
R16 = B * RPB                                            # stacked conv-stage rows = 16
L0 = (T_RAW - CONV_KERNEL[0]) // CONV_STRIDE[0] + 1      # 15 frames after conv0
SEQ = (L0 - CONV_KERNEL[1]) // CONV_STRIDE[1] + 1        # 6 frames after conv1
BS = B * SEQ                                             # stacked transformer rows = 12
PS_STRIDE = -(-BS // 8) * 8                              # 8-aligned per-head stride in softmax scratch = 16

# the in-kernel even/odd conv decomposition assumes this config:
assert CONV_KERNEL[0] == 2 * CONV_STRIDE[0] and CONV_STRIDE[1] == 2
assert T_RAW % (2 * CONV_STRIDE[0]) == 0
assert L0 == 2 * RPB - 1 and SEQ <= RPB - 1
assert HIDDEN % NUM_HEADS == 0

SLAB_LANES = 128


def _pad8(r):
    return -(-r // 8) * 8


# ---------------- single weight-slab layout (shared by pack_params and the kernel) ----------------
def _build_layout():
    layout = {}
    row = 0

    def add(name, r, c, pad=True):
        nonlocal row
        assert c <= SLAB_LANES
        layout[name] = (row, r, c)
        row += _pad8(r) if pad else r

    # matmul weights (8-row aligned)
    add("conv0_w", CONV_KERNEL[0], CONV_DIM[0])                  # (8, 16)  per-tap rows
    add("conv1_w", CONV_KERNEL[1] * CONV_DIM[0], CONV_DIM[1])    # (64, 16) taps stacked
    add("fp_w", CONV_DIM[1], HIDDEN)
    add("pos_w", POS_CONV_KERNEL * HIDDEN, HIDDEN)               # (96, 32) taps stacked
    for li in range(NUM_LAYERS):
        add(f"qkv_w_{li}", HIDDEN, 3 * HIDDEN)
        add(f"o_w_{li}", HIDDEN, HIDDEN)
        add(f"ffn_w1_{li}", HIDDEN, INTERMEDIATE)
        add(f"ffn_w2_{li}", INTERMEDIATE, HIDDEN)
    add("cls_w1", HIDDEN, CLS_HIDDEN)
    add("cls_w2", CLS_HIDDEN, NUM_LABELS)
    # constant shift / selection / mask / pooling matrices (8-row aligned)
    add("shift_up16", R16, R16)      # row r -> r+1 within a batch (0 at batch boundary)
    add("sel12", BS, R16)            # selects the SEQ valid conv1 output rows per batch
    add("avg_e", R16, R16)           # GroupNorm segment-mean over even conv0 frames (/L0)
    add("avg_o", R16, R16)           # GroupNorm segment-mean over valid odd conv0 frames (/L0)
    add("shift_dn12", BS, BS)        # row t -> t-1 within a batch (zero pad)
    add("shift_up12", BS, BS)        # row t -> t+1 within a batch (zero pad)
    add("attn_mask", BS, BS)         # block-diagonal 0 / -1e30
    add("pool", B, BS)               # per-batch mean-pool (1/SEQ entries)
    # 1-row vectors (biases / LN scales)
    vecs = [("gn_g", CONV_DIM[0]), ("gn_b", CONV_DIM[0]),
            ("fp_ln_g", CONV_DIM[1]), ("fp_ln_b", CONV_DIM[1]),
            ("fp_b", HIDDEN), ("pos_b", HIDDEN),
            ("enc_ln_g", HIDDEN), ("enc_ln_b", HIDDEN)]
    for li in range(NUM_LAYERS):
        vecs += [(f"qkv_b_{li}", 3 * HIDDEN), (f"o_b_{li}", HIDDEN),
                 (f"attn_ln_g_{li}", HIDDEN), (f"attn_ln_b_{li}", HIDDEN),
                 (f"ffn_b1_{li}", INTERMEDIATE), (f"ffn_b2_{li}", HIDDEN),
                 (f"final_ln_g_{li}", HIDDEN), (f"final_ln_b_{li}", HIDDEN)]
    vecs += [("cls_b1", CLS_HIDDEN), ("cls_b2", NUM_LABELS)]
    for name, c in vecs:
        add(name, 1, c, pad=False)
    return layout, _pad8(row)


LAYOUT, SLAB_ROWS = _build_layout()


def _host_constants():
    """Constant selection / shift / mask matrices, packed into the slab (no in-kernel build)."""
    c = {}
    su16 = np.zeros((R16, R16), np.float32)
    for r in range(R16):
        if r % RPB != RPB - 1:
            su16[r, r + 1] = 1.0
    c["shift_up16"] = su16

    sel = np.zeros((BS, R16), np.float32)
    for b in range(B):
        for t in range(SEQ):
            sel[b * SEQ + t, b * RPB + t] = 1.0
    c["sel12"] = sel

    avg_e = np.zeros((R16, R16), np.float32)
    avg_o = np.zeros((R16, R16), np.float32)
    for b in range(B):
        for r in range(RPB):
            for j in range(RPB):
                avg_e[b * RPB + r, b * RPB + j] = 1.0 / L0
                if j < RPB - 1:                       # last odd conv0 frame per batch is invalid
                    avg_o[b * RPB + r, b * RPB + j] = 1.0 / L0
    c["avg_e"], c["avg_o"] = avg_e, avg_o

    sd = np.zeros((BS, BS), np.float32)
    su = np.zeros((BS, BS), np.float32)
    for b in range(B):
        for t in range(SEQ):
            if t > 0:
                sd[b * SEQ + t, b * SEQ + t - 1] = 1.0
            if t < SEQ - 1:
                su[b * SEQ + t, b * SEQ + t + 1] = 1.0
    c["shift_dn12"], c["shift_up12"] = sd, su

    mask = np.full((BS, BS), -1e30, np.float32)
    for b in range(B):
        mask[b * SEQ:(b + 1) * SEQ, b * SEQ:(b + 1) * SEQ] = 0.0
    c["attn_mask"] = mask

    pool = np.zeros((B, BS), np.float32)
    for b in range(B):
        pool[b, b * SEQ:(b + 1) * SEQ] = 1.0 / SEQ
    c["pool"] = pool
    return c


# ---------------- in-kernel helpers (trace-time inlined) ----------------
def _gelu(x):
    # TODO(synk): exact erf GELU would match PyTorch bit-closer; tanh approx lowers everywhere.
    return jax.nn.gelu(x, approximate=True)


def _layer_norm(x, g, b):
    mu = jnp.mean(x, axis=-1, keepdims=True)
    var = jnp.mean(jnp.square(x - mu), axis=-1, keepdims=True)
    return (x - mu) * lax.rsqrt(var + LN_EPS) * g + b


def _dot(a, b):
    return jnp.dot(a, b, preferred_element_type=jnp.float32)


# ---------------- the single fused kernel ----------------
def _hubert_fused_kernel(x_ref, w_ref, out_ref, ps_ref):
    def W(name):
        r0, nr, nc = LAYOUT[name]
        return w_ref[r0:r0 + nr, 0:nc]

    # padding rows of the batched-softmax scratch stay benign zeros
    ps_ref[...] = jnp.zeros_like(ps_ref)

    xs = x_ref[...]                                       # (16, 8): row b*8+j = raw samples [8j, 8j+8) of batch b
    w0 = W("conv0_w")                                     # (8, 16)
    shift_up16 = W("shift_up16")

    # ---- conv0: Conv1d(1->16, K=8, stride=4, bias=False); even/odd frame decomposition, batch-stacked ----
    c0e = _dot(xs, w0)                                    # (16, 16) even conv0 frames
    xs_next = _dot(shift_up16, xs)                        # row r -> xs[r+1] (0 at batch end)
    c0o = _dot(xs[:, 4:8], w0[0:4, :]) + _dot(xs_next[:, 0:4], w0[4:8, :])   # (16, 16) odd frames (last row/batch unused)

    # ---- GroupNorm(num_groups == num_channels) over the L0=15 frames of each batch + GELU ----
    avg_e, avg_o = W("avg_e"), W("avg_o")
    row_mean = _dot(avg_e, c0e) + _dot(avg_o, c0o)        # per-batch channel mean broadcast to rows
    row_msq = _dot(avg_e, c0e * c0e) + _dot(avg_o, c0o * c0o)
    row_inv = lax.rsqrt(row_msq - row_mean * row_mean + LN_EPS)
    gn_scale = row_inv * W("gn_g")
    gn_bias = W("gn_b")
    c0e = _gelu((c0e - row_mean) * gn_scale + gn_bias)
    c0o = _gelu((c0o - row_mean) * gn_scale + gn_bias)

    # ---- conv1: Conv1d(16->16, K=4, stride=2, bias=False) + GELU; 4 tap matmuls + row selection ----
    w1 = W("conv1_w")                                     # (64, 16): rows [k*16:(k+1)*16] = tap k
    c0e_n = _dot(shift_up16, c0e)
    c0o_n = _dot(shift_up16, c0o)
    g = (_dot(c0e, w1[0:16, :]) + _dot(c0o, w1[16:32, :])
         + _dot(c0e_n, w1[32:48, :]) + _dot(c0o_n, w1[48:64, :]))            # (16, 16)
    feat = _gelu(_dot(W("sel12"), g))                                        # (12, 16) = (B*SEQ, 16)

    # ---- feature projection: LayerNorm + Linear(16 -> 32) (+ dropout = id) ----
    feat = _layer_norm(feat, W("fp_ln_g"), W("fp_ln_b"))
    hs = _dot(feat, W("fp_w")) + W("fp_b")                                   # (12, 32)

    # ---- positional conv embedding (K=3, pad=1, groups=1, bias) + GELU, residual, LayerNorm ----
    posw = W("pos_w")                                                        # (96, 32) taps stacked
    pos = (W("pos_b")
           + _dot(_dot(W("shift_dn12"), hs), posw[0:HIDDEN, :])
           + _dot(hs, posw[HIDDEN:2 * HIDDEN, :])
           + _dot(_dot(W("shift_up12"), hs), posw[2 * HIDDEN:3 * HIDDEN, :]))
    hs = hs + _gelu(pos)
    hs = _layer_norm(hs, W("enc_ln_g"), W("enc_ln_b"))

    # ---- transformer encoder layers (post-LN), batch stacked along sublanes ----
    attn_mask = W("attn_mask")                                               # (12, 12) block-diagonal 0/-1e30
    for li in range(NUM_LAYERS):
        qkv = _dot(hs, W(f"qkv_w_{li}")) + W(f"qkv_b_{li}")                  # (12, 96); Q pre-scaled at pack time
        q = qkv[:, 0:HIDDEN]
        k = qkv[:, HIDDEN:2 * HIDDEN]
        v = qkv[:, 2 * HIDDEN:3 * HIDDEN]

        # stage all head score tiles at 8-row-aligned offsets, then one batched softmax chain
        for h in range(NUM_HEADS):
            lo, hi = h * HEAD_DIM, (h + 1) * HEAD_DIM
            s = lax.dot_general(q[:, lo:hi], k[:, lo:hi], (((1,), (1,)), ((), ())),
                                preferred_element_type=jnp.float32)          # (12, 12)
            ps_ref[h * PS_STRIDE:h * PS_STRIDE + BS, :] = s + attn_mask
        s_all = ps_ref[...]                                                  # (64, 12)
        e = jnp.exp(s_all - jnp.max(s_all, axis=-1, keepdims=True))
        p_all = e * pl.reciprocal(jnp.sum(e, axis=-1, keepdims=True), approx=True)

        o_w = W(f"o_w_{li}")
        attn = W(f"o_b_{li}")                                                # (1, 32), broadcasts on accumulate
        for h in range(NUM_HEADS):
            lo, hi = h * HEAD_DIM, (h + 1) * HEAD_DIM
            ctx = _dot(p_all[h * PS_STRIDE:h * PS_STRIDE + BS, :], v[:, lo:hi])   # (12, dh)
            attn = attn + _dot(ctx, o_w[lo:hi, :])
        hs = _layer_norm(hs + attn, W(f"attn_ln_g_{li}"), W(f"attn_ln_b_{li}"))

        ff = _gelu(_dot(hs, W(f"ffn_w1_{li}")) + W(f"ffn_b1_{li}"))
        ff = _dot(ff, W(f"ffn_w2_{li}")) + W(f"ffn_b2_{li}")
        hs = _layer_norm(hs + ff, W(f"final_ln_g_{li}"), W(f"final_ln_b_{li}"))

    # ---- per-batch mean pool (segment-mean matmul) + classifier MLP; single (B, NUM_LABELS) store ----
    pooled = _dot(W("pool"), hs)                                             # (B, 32)
    hcls = jnp.tanh(_dot(pooled, W("cls_w1")) + W("cls_b1"))
    out_ref[...] = _dot(hcls, W("cls_w2")) + W("cls_b2")


# ---------------- pallas_call wrapper ----------------
def hubert_classifier_forward(slab, x):
    # free one-time input relayout: (B, T) -> (B*T//8, 8) batch-stacked 8-sample rows
    xs = x.reshape(R16, 2 * CONV_STRIDE[0])
    # TODO(synk): at real HuBERT sizes, make the layer index a grid axis ("arbitrary") with
    # per-layer weight BlockSpecs streamed HBM->VMEM, and shard batch/seq ("parallel") for v7x's
    # dual TensorCores; cast matmul operands to bf16 on v6e/v7x.
    return pl.pallas_call(
        _hubert_fused_kernel,
        out_shape=jax.ShapeDtypeStruct((B, NUM_LABELS), jnp.float32),
        grid=(1,),
        in_specs=[pl.BlockSpec(xs.shape, lambda i: (0, 0)),
                  pl.BlockSpec((SLAB_ROWS, SLAB_LANES), lambda i: (0, 0))],
        out_specs=pl.BlockSpec((B, NUM_LABELS), lambda i: (0, 0)),
        scratch_shapes=[pltpu.VMEM((NUM_HEADS * PS_STRIDE, BS), jnp.float32)],
        compiler_params=pltpu.CompilerParams(dimension_semantics=("arbitrary",)),
    )(xs, slab)


# ---------------- deterministic parameter init (PyTorch-module structure) ----------------
def init_params(key):
    ks = iter(jax.random.split(key, 128))

    def nrm(shape, scale=0.02):
        return (scale * jax.random.normal(next(ks), shape)).astype(jnp.float32)

    p = {}
    # HuBERT feature extractor (feat_extract_norm="group", conv_bias=False)
    p["conv0_w"] = nrm((CONV_DIM[0], 1, CONV_KERNEL[0]))
    p["gn_g"] = jnp.ones((1, CONV_DIM[0]), jnp.float32)
    p["gn_b"] = jnp.zeros((1, CONV_DIM[0]), jnp.float32)
    p["conv1_w"] = nrm((CONV_DIM[1], CONV_DIM[0], CONV_KERNEL[1]))
    # feature projection
    p["fp_ln_g"] = jnp.ones((1, CONV_DIM[1]), jnp.float32)
    p["fp_ln_b"] = jnp.zeros((1, CONV_DIM[1]), jnp.float32)
    p["fp_w"] = nrm((CONV_DIM[1], HIDDEN))
    p["fp_b"] = jnp.zeros((1, HIDDEN), jnp.float32)
    # positional conv embedding (effective weight after weight_norm, bias=True)
    p["pos_w"] = nrm((HIDDEN, HIDDEN, POS_CONV_KERNEL))
    p["pos_b"] = jnp.zeros((1, HIDDEN), jnp.float32)
    # encoder LayerNorm (applied after adding positional embeddings)
    p["enc_ln_g"] = jnp.ones((1, HIDDEN), jnp.float32)
    p["enc_ln_b"] = jnp.zeros((1, HIDDEN), jnp.float32)
    # transformer layers (weights stored as PyTorch weight.T = (in, out))
    layers = []
    for _ in range(NUM_LAYERS):
        layers.append({
            "q_w": nrm((HIDDEN, HIDDEN)), "q_b": jnp.zeros((1, HIDDEN), jnp.float32),
            "k_w": nrm((HIDDEN, HIDDEN)), "k_b": jnp.zeros((1, HIDDEN), jnp.float32),
            "v_w": nrm((HIDDEN, HIDDEN)), "v_b": jnp.zeros((1, HIDDEN), jnp.float32),
            "o_w": nrm((HIDDEN, HIDDEN)), "o_b": jnp.zeros((1, HIDDEN), jnp.float32),
            "attn_ln_g": jnp.ones((1, HIDDEN), jnp.float32),
            "attn_ln_b": jnp.zeros((1, HIDDEN), jnp.float32),
            "ffn_w1": nrm((HIDDEN, INTERMEDIATE)), "ffn_b1": jnp.zeros((1, INTERMEDIATE), jnp.float32),
            "ffn_w2": nrm((INTERMEDIATE, HIDDEN)), "ffn_b2": jnp.zeros((1, HIDDEN), jnp.float32),
            "final_ln_g": jnp.ones((1, HIDDEN), jnp.float32),
            "final_ln_b": jnp.zeros((1, HIDDEN), jnp.float32),
        })
    p["layers"] = layers
    # classifier head: Linear(H, CLS_HIDDEN) -> tanh -> dropout(id) -> Linear(CLS_HIDDEN, NUM_LABELS)
    p["cls_w1"] = nrm((HIDDEN, CLS_HIDDEN))
    p["cls_b1"] = jnp.zeros((1, CLS_HIDDEN), jnp.float32)
    p["cls_w2"] = nrm((CLS_HIDDEN, NUM_LABELS))
    p["cls_b2"] = jnp.zeros((1, NUM_LABELS), jnp.float32)
    return p


# ---------------- one-time host-side packing into the single lane-dense slab ----------------
def pack_params(p):
    slab = np.zeros((SLAB_ROWS, SLAB_LANES), np.float32)

    def put(name, arr):
        arr = np.asarray(arr, dtype=np.float32)
        r0, nr, nc = LAYOUT[name]
        assert arr.shape == (nr, nc), (name, arr.shape, (nr, nc))
        slab[r0:r0 + nr, 0:nc] = arr

    # PyTorch Conv1d (C_out, C_in, K) -> per-tap (C_in, C_out) stacked along rows
    put("conv0_w", np.transpose(np.asarray(p["conv0_w"]), (2, 1, 0)).reshape(CONV_KERNEL[0], CONV_DIM[0]))
    put("conv1_w", np.transpose(np.asarray(p["conv1_w"]), (2, 1, 0)).reshape(CONV_KERNEL[1] * CONV_DIM[0], CONV_DIM[1]))
    put("fp_w", p["fp_w"])
    put("pos_w", np.transpose(np.asarray(p["pos_w"]), (2, 1, 0)).reshape(POS_CONV_KERNEL * HIDDEN, HIDDEN))

    scale = 1.0 / float(HEAD_DIM) ** 0.5      # folded into Q at pack time (zero runtime cost)
    for li, lp in enumerate(p["layers"]):
        put(f"qkv_w_{li}", np.concatenate([np.asarray(lp["q_w"]) * scale,
                                           np.asarray(lp["k_w"]), np.asarray(lp["v_w"])], axis=1))
        put(f"qkv_b_{li}", np.concatenate([np.asarray(lp["q_b"]) * scale,
                                           np.asarray(lp["k_b"]), np.asarray(lp["v_b"])], axis=1))
        put(f"o_w_{li}", lp["o_w"]); put(f"o_b_{li}", lp["o_b"])
        put(f"attn_ln_g_{li}", lp["attn_ln_g"]); put(f"attn_ln_b_{li}", lp["attn_ln_b"])
        put(f"ffn_w1_{li}", lp["ffn_w1"]); put(f"ffn_b1_{li}", lp["ffn_b1"])
        put(f"ffn_w2_{li}", lp["ffn_w2"]); put(f"ffn_b2_{li}", lp["ffn_b2"])
        put(f"final_ln_g_{li}", lp["final_ln_g"]); put(f"final_ln_b_{li}", lp["final_ln_b"])

    put("cls_w1", p["cls_w1"]); put("cls_b1", p["cls_b1"])
    put("cls_w2", p["cls_w2"]); put("cls_b2", p["cls_b2"])
    for name in ["gn_g", "gn_b", "fp_ln_g", "fp_ln_b", "fp_b", "pos_b", "enc_ln_g", "enc_ln_b"]:
        put(name, p[name])
    for name, arr in _host_constants().items():
        put(name, arr)
    return jnp.asarray(slab)


if __name__ == "__main__":
    key = jax.random.PRNGKey(0)
    pkey, xkey = jax.random.split(key)
    params = init_params(pkey)
    slab = pack_params(params)
    x = jax.random.normal(xkey, (B, T_RAW), dtype=jnp.float32)  # raw ECG signal (B, T)

    fwd = jax.jit(hubert_classifier_forward)
    logits = fwd(slab, x)
    jax.block_until_ready(logits)
    assert logits.shape == (B, NUM_LABELS) and logits.dtype == jnp.float32
    assert bool(jnp.all(jnp.isfinite(logits)))
    print("KERNEL_OK")
</pallas_src>

<mosaic_0001>
module attributes {stable_mosaic.version = 11 : i64} {
  func.func @_hubert_fused_kernel(%arg0: i32, %arg1: memref<16x8xf32, #tpu.memory_space<vmem>>, %arg2: memref<704x128xf32, #tpu.memory_space<vmem>>, %arg3: memref<2x5xf32, #tpu.memory_space<vmem>>, %arg4: memref<64x12xf32, #tpu.memory_space<vmem>>) attributes {dimension_semantics = [#tpu.dimension_semantics<arbitrary>], iteration_bounds = array<i64: 1>, scalar_prefetch = 0 : i64, scratch_operands = 1 : i64, tpu.core_type = #tpu.core_type<tc>, window_params = [{pipeline_mode = #tpu.pipeline_mode<synchronous>, transform_indices = @transform_0, window_bounds = array<i64: 16, 8>}, {pipeline_mode = #tpu.pipeline_mode<synchronous>, transform_indices = @transform_1, window_bounds = array<i64: 704, 128>}, {pipeline_mode = #tpu.pipeline_mode<synchronous>, transform_indices = @transform_2, window_bounds = array<i64: 2, 5>}]} {
    %cst = arith.constant 0.000000e+00 : f32
    %0 = vector.broadcast %cst : f32 to vector<64x12xf32>
    %c0 = arith.constant 0 : index
    %c0_0 = arith.constant 0 : index
    %1 = vector.load %arg4[%c0, %c0_0] : memref<64x12xf32, #tpu.memory_space<vmem>>, vector<64x12xf32>
    tpu.vector_store %arg4[%c0, %c0_0], %0 {strides = array<i32>} : memref<64x12xf32, #tpu.memory_space<vmem>>, vector<64x12xf32>,
    %c0_1 = arith.constant 0 : index
    %c0_2 = arith.constant 0 : index
    %2 = vector.load %arg1[%c0_1, %c0_2] : memref<16x8xf32, #tpu.memory_space<vmem>>, vector<16x8xf32>
    %c0_3 = arith.constant 0 : index
    %c0_4 = arith.constant 0 : index
    %3 = vector.load %arg2[%c0_3, %c0_4] : memref<704x128xf32, #tpu.memory_space<vmem>>, vector<8x16xf32>
    %c552 = arith.constant 552 : index
    %c0_5 = arith.constant 0 : index
    %4 = vector.load %arg2[%c552, %c0_5] : memref<704x128xf32, #tpu.memory_space<vmem>>, vector<16x16xf32>
    %cst_6 = arith.constant dense<0.000000e+00> : vector<16x16xf32>
    %5 = tpu.matmul %2, %3, %cst_6 {dimension_numbers = #tpu.dot_dimension_numbers<[1], [0], [0], [1], [0, 0, 1, 1], [], []>} : vector<16x8xf32>, vector<8x16xf32>, vector<16x16xf32> -> vector<16x16xf32>
    %cst_7 = arith.constant dense<0.000000e+00> : vector<16x8xf32>
    %6 = tpu.matmul %4, %2, %cst_7 {dimension_numbers = #tpu.dot_dimension_numbers<[1], [0], [0], [1], [0, 0, 1, 1], [], []>} : vector<16x16xf32>, vector<16x8xf32>, vector<16x8xf32> -> vector<16x8xf32>
    %7 = vector.extract_strided_slice %2 {offsets = [0, 4], sizes = [16, 4], strides = [1, 1]} : vector<16x8xf32> to vector<16x4xf32>
    %8 = vector.extract_strided_slice %3 {offsets = [0, 0], sizes = [4, 16], strides = [1, 1]} : vector<8x16xf32> to vector<4x16xf32>
    %cst_8 = arith.constant dense<0.000000e+00> : vector<16x16xf32>
    %9 = tpu.matmul %7, %8, %cst_8 {dimension_numbers = #tpu.dot_dimension_numbers<[1], [0], [0], [1], [0, 0, 1, 1], [], []>} : vector<16x4xf32>, vector<4x16xf32>, vector<16x16xf32> -> vector<16x16xf32>
    %10 = vector.extract_strided_slice %6 {offsets = [0, 0], sizes = [16, 4], strides = [1, 1]} : vector<16x8xf32> to vector<16x4xf32>
    %11 = vector.extract_strided_slice %3 {offsets = [4, 0], sizes = [4, 16], strides = [1, 1]} : vector<8x16xf32> to vector<4x16xf32>
    %cst_9 = arith.constant dense<0.000000e+00> : vector<16x16xf32>
    %12 = tpu.matmul %10, %11, %cst_9 {dimension_numbers = #tpu.dot_dimension_numbers<[1], [0], [0], [1], [0, 0, 1, 1], [], []>} : vector<16x4xf32>, vector<4x16xf32>, vector<16x16xf32> -> vector<16x16xf32>
    %13 = arith.addf %9, %12 : vector<16x16xf32>
    %c584 = arith.constant 584 : index
    %c0_10 = arith.constant 0 : index
    %14 = vector.load %arg2[%c584, %c0_10] : memref<704x128xf32, #tpu.memory_space<vmem>>, vector<16x16xf32>
    %c600 = arith.constant 600 : index
    %c0_11 = arith.constant 0 : index
    %15 = vector.load %arg2[%c600, %c0_11] : memref<704x128xf32, #tpu.memory_space<vmem>>, vector<16x16xf32>
    %cst_12 = arith.constant dense<0.000000e+00> : vector<16x16xf32>
    %16 = tpu.matmul %14, %5, %cst_12 {dimension_numbers = #tpu.dot_dimension_numbers<[1], [0], [0], [1], [0, 0, 1, 1], [], []>} : vector<16x16xf32>, vector<16x16xf32>, vector<16x16xf32> -> vector<16x16xf32>
    %cst_13 = arith.constant dense<0.000000e+00> : vector<16x16xf32>
    %17 = tpu.matmul %15, %13, %cst_13 {dimension_numbers = #tpu.dot_dimension_numbers<[1], [0], [0], [1], [0, 0, 1, 1], [], []>} : vector<16x16xf32>, vector<16x16xf32>, vector<16x16xf32> -> vector<16x16xf32>
    %18 = arith.addf %16, %17 : vector<16x16xf32>
    %19 = arith.mulf %5, %5 : vector<16x16xf32>
    %cst_14 = arith.constant dense<0.000000e+00> : vector<16x16xf32>
    %20 = tpu.matmul %14, %19, %cst_14 {dimension_numbers = #tpu.dot_dimension_numbers<[1], [0], [0], [1], [0, 0, 1, 1], [], []>} : vector<16x16xf32>, vector<16x16xf32>, vector<16x16xf32> -> vector<16x16xf32>
    %21 = arith.mulf %13, %13 : vector<16x16xf32>
    %cst_15 = arith.constant dense<0.000000e+00> : vector<16x16xf32>
    %22 = tpu.matmul %15, %21, %cst_15 {dimension_numbers = #tpu.dot_dimension_numbers<[1], [0], [0], [1], [0, 0, 1, 1], [], []>} : vector<16x16xf32>, vector<16x16xf32>, vector<16x16xf32> -> vector<16x16xf32>
    %23 = arith.addf %20, %22 : vector<16x16xf32>
    %24 = arith.mulf %18, %18 : vector<16x16xf32>
    %25 = arith.subf %23, %24 : vector<16x16xf32>
    %cst_16 = arith.constant 9.99999974E-6 : f32
    %26 = vector.broadcast %cst_16 : f32 to vector<16x16xf32>
    %27 = arith.addf %25, %26 : vector<16x16xf32>
    %28 = math.rsqrt %27 : vector<16x16xf32>
    %c672 = arith.constant 672 : index
    %c0_17 = arith.constant 0 : index
    %29 = vector.load %arg2[%c672, %c0_17] : memref<704x128xf32, #tpu.memory_space<vmem>>, vector<1x16xf32>
    %30 = vector.broadcast %29 : vector<1x16xf32> to vector<16x16xf32>
    %31 = arith.mulf %28, %30 : vector<16x16xf32>
    %c673 = arith.constant 673 : index
    %c0_18 = arith.constant 0 : index
    %32 = vector.load %arg2[%c673, %c0_18] : memref<704x128xf32, #tpu.memory_space<vmem>>, vector<1x16xf32>
    %33 = arith.subf %5, %18 : vector<16x16xf32>
    %34 = arith.mulf %33, %31 : vector<16x16xf32>
    %35 = vector.broadcast %32 : vector<1x16xf32> to vector<16x16xf32>
    %36 = arith.addf %34, %35 : vector<16x16xf32>
    %37 = arith.mulf %36, %36 : vector<16x16xf32>
    %38 = arith.mulf %36, %37 : vector<16x16xf32>
    %cst_19 = arith.constant 4.471500e-02 : f32
    %39 = vector.broadcast %cst_19 : f32 to vector<16x16xf32>
    %40 = arith.mulf %39, %38 : vector<16x16xf32>
    %41 = arith.addf %36, %40 : vector<16x16xf32>
    %cst_20 = arith.constant 0.797884583 : f32
    %42 = vector.broadcast %cst_20 : f32 to vector<16x16xf32>
    %43 = arith.mulf %42, %41 : vector<16x16xf32>
    %44 = math.tanh %43 : vector<16x16xf32>
    %cst_21 = arith.constant 1.000000e+00 : f32
    %45 = vector.broadcast %cst_21 : f32 to vector<16x16xf32>
    %46 = arith.addf %45, %44 : vector<16x16xf32>
    %cst_22 = arith.constant 5.000000e-01 : f32
    %47 = vector.broadcast %cst_22 : f32 to vector<16x16xf32>
    %48 = arith.mulf %47, %46 : vector<16x16xf32>
    %49 = arith.mulf %36, %48 : vector<16x16xf32>
    %50 = arith.subf %13, %18 : vector<16x16xf32>
    %51 = arith.mulf %50, %31 : vector<16x16xf32>
    %52 = vector.broadcast %32 : vector<1x16xf32> to vector<16x16xf32>
    %53 = arith.addf %51, %52 : vector<16x16xf32>
    %54 = arith.mulf %53, %53 : vector<16x16xf32>
    %55 = arith.mulf %53, %54 : vector<16x16xf32>
    %cst_23 = arith.constant 4.471500e-02 : f32
    %56 = vector.broadcast %cst_23 : f32 to vector<16x16xf32>
    %57 = arith.mulf %56, %55 : vector<16x16xf32>
    %58 = arith.addf %53, %57 : vector<16x16xf32>
    %cst_24 = arith.constant 0.797884583 : f32
    %59 = vector.broadcast %cst_24 : f32 to vector<16x16xf32>
    %60 = arith.mulf %59, %58 : vector<16x16xf32>
    %61 = math.tanh %60 : vector<16x16xf32>
    %cst_25 = arith.constant 1.000000e+00 : f32
    %62 = vector.broadcast %cst_25 : f32 to vector<16x16xf32>
    %63 = arith.addf %62, %61 : vector<16x16xf32>
    %cst_26 = arith.constant 5.000000e-01 : f32
    %64 = vector.broadcast %cst_26 : f32 to vector<16x16xf32>
    %65 = arith.mulf %64, %63 : vector<16x16xf32>
    %66 = arith.mulf %53, %65 : vector<16x16xf32>
    %c8 = arith.constant 8 : index
    %c0_27 = arith.constant 0 : index
    %67 = vector.load %arg2[%c8, %c0_27] : memref<704x128xf32, #tpu.memory_space<vmem>>, vector<64x16xf32>
    %cst_28 = arith.constant dense<0.000000e+00> : vector<16x16xf32>
    %68 = tpu.matmul %4, %49, %cst_28 {dimension_numbers = #tpu.dot_dimension_numbers<[1], [0], [0], [1], [0, 0, 1, 1], [], []>} : vector<16x16xf32>, vector<16x16xf32>, vector<16x16xf32> -> vector<16x16xf32>
    %cst_29 = arith.constant dense<0.000000e+00> : vector<16x16xf32>
    %69 = tpu.matmul %4, %66, %cst_29 {dimension_numbers = #tpu.dot_dimension_numbers<[1], [0], [0], [1], [0, 0, 1, 1], [], []>} : vector<16x16xf32>, vector<16x16xf32>, vector<16x16xf32> -> vector<16x16xf32>
    %70 = vector.extract_strided_slice %67 {offsets = [0, 0], sizes = [16, 16], strides = [1, 1]} : vector<64x16xf32> to vector<16x16xf32>
    %cst_30 = arith.constant dense<0.000000e+00> : vector<16x16xf32>
    %71 = tpu.matmul %49, %70, %cst_30 {dimension_numbers = #tpu.dot_dimension_numbers<[1], [0], [0], [1], [0, 0, 1, 1], [], []>} : vector<16x16xf32>, vector<16x16xf32>, vector<16x16xf32> -> vector<16x16xf32>
    %72 = vector.extract_strided_slice %67 {offsets = [16, 0], sizes = [16, 16], strides = [1, 1]} : vector<64x16xf32> to vector<16x16xf32>
    %cst_31 = arith.constant dense<0.000000e+00> : vector<16x16xf32>
    %73 = tpu.matmul %66, %72, %cst_31 {dimension_numbers = #tpu.dot_dimension_numbers<[1], [0], [0], [1], [0, 0, 1, 1], [], []>} : vector<16x16xf32>, vector<16x16xf32>, vector<16x16xf32> -> vector<16x16xf32>
    %74 = arith.addf %71, %73 : vector<16x16xf32>
    %75 = vector.extract_strided_slice %67 {offsets = [32, 0], sizes = [16, 16], strides = [1, 1]} : vector<64x16xf32> to vector<16x16xf32>
    %cst_32 = arith.constant dense<0.000000e+00> : vector<16x16xf32>
    %76 = tpu.matmul %68, %75, %cst_32 {dimension_numbers = #tpu.dot_dimension_numbers<[1], [0], [0], [1], [0, 0, 1, 1], [], []>} : vector<16x16xf32>, vector<16x16xf32>, vector<16x16xf32> -> vector<16x16xf32>
    %77 = arith.addf %74, %76 : vector<16x16xf32>
    %78 = vector.extract_strided_slice %67 {offsets = [48, 0], sizes = [16, 16], strides = [1, 1]} : vector<64x16xf32> to vector<16x16xf32>
    %cst_33 = arith.constant dense<0.000000e+00> : vector<16x16xf32>
    %79 = tpu.matmul %69, %78, %cst_33 {dimension_numbers = #tpu.dot_dimension_numbers<[1], [0], [0], [1], [0, 0, 1, 1], [], []>} : vector<16x16xf32>, vector<16x16xf32>, vector<16x16xf32> -> vector<16x16xf32>
    %80 = arith.addf %77, %79 : vector<16x16xf32>
    %c568 = arith.constant 568 : index
    %c0_34 = arith.constant 0 : index
    %81 = vector.load %arg2[%c568, %c0_34] : memref<704x128xf32, #tpu.memory_space<vmem>>, vector<12x16xf32>
    %cst_35 = arith.constant dense<0.000000e+00> : vector<12x16xf32>
    %82 = tpu.matmul %81, %80, %cst_35 {dimension_numbers = #tpu.dot_dimension_numbers<[1], [0], [0], [1], [0, 0, 1, 1], [], []>} : vector<12x16xf32>, vector<16x16xf32>, vector<12x16xf32> -> vector<12x16xf32>
    %83 = arith.mulf %82, %82 : vector<12x16xf32>
    %84 = arith.mulf %82, %83 : vector<12x16xf32>
    %cst_36 = arith.constant 4.471500e-02 : f32
    %85 = vector.broadcast %cst_36 : f32 to vector<12x16xf32>
    %86 = arith.mulf %85, %84 : vector<12x16xf32>
    %87 = arith.addf %82, %86 : vector<12x16xf32>
    %cst_37 = arith.constant 0.797884583 : f32
    %88 = vector.broadcast %cst_37 : f32 to vector<12x16xf32>
    %89 = arith.mulf %88, %87 : vector<12x16xf32>
    %90 = math.tanh %89 : vector<12x16xf32>
    %cst_38 = arith.constant 1.000000e+00 : f32
    %91 = vector.broadcast %cst_38 : f32 to vector<12x16xf32>
    %92 = arith.addf %91, %90 : vector<12x16xf32>
    %cst_39 = arith.constant 5.000000e-01 : f32
    %93 = vector.broadcast %cst_39 : f32 to vector<12x16xf32>
    %94 = arith.mulf %93, %92 : vector<12x16xf32>
    %95 = arith.mulf %82, %94 : vector<12x16xf32>
    %c674 = arith.constant 674 : index
    %c0_40 = arith.constant 0 : index
    %96 = vector.load %arg2[%c674, %c0_40] : memref<704x128xf32, #tpu.memory_space<vmem>>, vector<1x16xf32>
    %c675 = arith.constant 675 : index
    %c0_41 = arith.constant 0 : index
    %97 = vector.load %arg2[%c675, %c0_41] : memref<704x128xf32, #tpu.memory_space<vmem>>, vector<1x16xf32>
    %cst_42 = arith.constant dense<0.000000e+00> : vector<12xf32>
    %98 = vector.multi_reduction <add>, %95, %cst_42 [1] : vector<12x16xf32> to vector<12xf32>
    %99 = vector.shape_cast %98 : vector<12xf32> to vector<12x1xf32>
    %cst_43 = arith.constant 1.600000e+01 : f32
    %100 = vector.broadcast %cst_43 : f32 to vector<12x1xf32>
    %101 = arith.divf %99, %100 : vector<12x1xf32>
    %102 = vector.broadcast %101 : vector<12x1xf32> to vector<12x16xf32>
    %103 = arith.subf %95, %102 : vector<12x16xf32>
    %104 = arith.mulf %103, %103 : vector<12x16xf32>
    %cst_44 = arith.constant dense<0.000000e+00> : vector<12xf32>
    %105 = vector.multi_reduction <add>, %104, %cst_44 [1] : vector<12x16xf32> to vector<12xf32>
    %106 = vector.shape_cast %105 : vector<12xf32> to vector<12x1xf32>
    %cst_45 = arith.constant 1.600000e+01 : f32
    %107 = vector.broadcast %cst_45 : f32 to vector<12x1xf32>
    %108 = arith.divf %106, %107 : vector<12x1xf32>
    %109 = vector.broadcast %101 : vector<12x1xf32> to vector<12x16xf32>
    %110 = arith.subf %95, %109 : vector<12x16xf32>
    %cst_46 = arith.constant 9.99999974E-6 : f32
    %111 = vector.broadcast %cst_46 : f32 to vector<12x1xf32>
    %112 = arith.addf %108, %111 : vector<12x1xf32>
    %113 = math.rsqrt %112 : vector<12x1xf32>
    %114 = vector.broadcast %113 : vector<12x1xf32> to vector<12x16xf32>
    %115 = arith.mulf %110, %114 : vector<12x16xf32>
    %116 = vector.broadcast %96 : vector<1x16xf32> to vector<12x16xf32>
    %117 = arith.mulf %115, %116 : vector<12x16xf32>
    %118 = vector.broadcast %97 : vector<1x16xf32> to vector<12x16xf32>
    %119 = arith.addf %117, %118 : vector<12x16xf32>
    %c72 = arith.constant 72 : index
    %c0_47 = arith.constant 0 : index
    %120 = vector.load %arg2[%c72, %c0_47] : memref<704x128xf32, #tpu.memory_space<vmem>>, vector<16x32xf32>
    %cst_48 = arith.constant dense<0.000000e+00> : vector<12x32xf32>
    %121 = tpu.matmul %119, %120, %cst_48 {dimension_numbers = #tpu.dot_dimension_numbers<[1], [0], [0], [1], [0, 0, 1, 1], [], []>} : vector<12x16xf32>, vector<16x32xf32>, vector<12x32xf32> -> vector<12x32xf32>
    %c676 = arith.constant 676 : index
    %c0_49 = arith.constant 0 : index
    %122 = vector.load %arg2[%c676, %c0_49] : memref<704x128xf32, #tpu.memory_space<vmem>>, vector<1x32xf32>
    %123 = vector.broadcast %122 : vector<1x32xf32> to vector<12x32xf32>
    %124 = arith.addf %121, %123 : vector<12x32xf32>
    %c88 = arith.constant 88 : index
    %c0_50 = arith.constant 0 : index
    %125 = vector.load %arg2[%c88, %c0_50] : memref<704x128xf32, #tpu.memory_space<vmem>>, vector<96x32xf32>
    %c677 = arith.constant 677 : index
    %c0_51 = arith.constant 0 : index
    %126 = vector.load %arg2[%c677, %c0_51] : memref<704x128xf32, #tpu.memory_space<vmem>>, vector<1x32xf32>
    %c616 = arith.constant 616 : index
    %c0_52 = arith.constant 0 : index
    %127 = vector.load %arg2[%c616, %c0_52] : memref<704x128xf32, #tpu.memory_space<vmem>>, vector<12x12xf32>
    %cst_53 = arith.constant dense<0.000000e+00> : vector<12x32xf32>
    %128 = tpu.matmul %127, %124, %cst_53 {dimension_numbers = #tpu.dot_dimension_numbers<[1], [0], [0], [1], [0, 0, 1, 1], [], []>} : vector<12x12xf32>, vector<12x32xf32>, vector<12x32xf32> -> vector<12x32xf32>
    %129 = vector.extract_strided_slice %125 {offsets = [0, 0], sizes = [32, 32], strides = [1, 1]} : vector<96x32xf32> to vector<32x32xf32>
    %cst_54 = arith.constant dense<0.000000e+00> : vector<12x32xf32>
    %130 = tpu.matmul %128, %129, %cst_54 {dimension_numbers = #tpu.dot_dimension_numbers<[1], [0], [0], [1], [0, 0, 1, 1], [], []>} : vector<12x32xf32>, vector<32x32xf32>, vector<12x32xf32> -> vector<12x32xf32>
    %131 = vector.broadcast %126 : vector<1x32xf32> to vector<12x32xf32>
    %132 = arith.addf %131, %130 : vector<12x32xf32>
    %133 = vector.extract_strided_slice %125 {offsets = [32, 0], sizes = [32, 32], strides = [1, 1]} : vector<96x32xf32> to vector<32x32xf32>
    %cst_55 = arith.constant dense<0.000000e+00> : vector<12x32xf32>
    %134 = tpu.matmul %124, %133, %cst_55 {dimension_numbers = #tpu.dot_dimension_numbers<[1], [0], [0], [1], [0, 0, 1, 1], [], []>} : vector<12x32xf32>, vector<32x32xf32>, vector<12x32xf32> -> vector<12x32xf32>
    %135 = arith.addf %132, %134 : vector<12x32xf32>
    %c632 = arith.constant 632 : index
    %c0_56 = arith.constant 0 : index
    %136 = vector.load %arg2[%c632, %c0_56] : memref<704x128xf32, #tpu.memory_space<vmem>>, vector<12x12xf32>
    %cst_57 = arith.constant dense<0.000000e+00> : vector<12x32xf32>
    %137 = tpu.matmul %136, %124, %cst_57 {dimension_numbers = #tpu.dot_dimension_numbers<[1], [0], [0], [1], [0, 0, 1, 1], [], []>} : vector<12x12xf32>, vector<12x32xf32>, vector<12x32xf32> -> vector<12x32xf32>
    %138 = vector.extract_strided_slice %125 {offsets = [64, 0], sizes = [32, 32], strides = [1, 1]} : vector<96x32xf32> to vector<32x32xf32>
    %cst_58 = arith.constant dense<0.000000e+00> : vector<12x32xf32>
    %139 = tpu.matmul %137, %138, %cst_58 {dimension_numbers = #tpu.dot_dimension_numbers<[1], [0], [0], [1], [0, 0, 1, 1], [], []>} : vector<12x32xf32>, vector<32x32xf32>, vector<12x32xf32> -> vector<12x32xf32>
    %140 = arith.addf %135, %139 : vector<12x32xf32>
    %141 = arith.mulf %140, %140 : vector<12x32xf32>
    %142 = arith.mulf %140, %141 : vector<12x32xf32>
    %cst_59 = arith.constant 4.471500e-02 : f32
    %143 = vector.broadcast %cst_59 : f32 to vector<12x32xf32>
    %144 = arith.mulf %143, %142 : vector<12x32xf32>
    %145 = arith.addf %140, %144 : vector<12x32xf32>
    %cst_60 = arith.constant 0.797884583 : f32
    %146 = vector.broadcast %cst_60 : f32 to vector<12x32xf32>
    %147 = arith.mulf %146, %145 : vector<12x32xf32>
    %148 = math.tanh %147 : vector<12x32xf32>
    %cst_61 = arith.constant 1.000000e+00 : f32
    %149 = vector.broadcast %cst_61 : f32 to vector<12x32xf32>
    %150 = arith.addf %149, %148 : vector<12x32xf32>
    %cst_62 = arith.constant 5.000000e-01 : f32
    %151 = vector.broadcast %cst_62 : f32 to vector<12x32xf32>
    %152 = arith.mulf %151, %150 : vector<12x32xf32>
    %153 = arith.mulf %140, %152 : vector<12x32xf32>
    %154 = arith.addf %124, %153 : vector<12x32xf32>
    %c678 = arith.constant 678 : index
    %c0_63 = arith.constant 0 : index
    %155 = vector.load %arg2[%c678, %c0_63] : memref<704x128xf32, #tpu.memory_space<vmem>>, vector<1x32xf32>
    %c679 = arith.constant 679 : index
    %c0_64 = arith.constant 0 : index
    %156 = vector.load %arg2[%c679, %c0_64] : memref<704x128xf32, #tpu.memory_space<vmem>>, vector<1x32xf32>
    %cst_65 = arith.constant dense<0.000000e+00> : vector<12xf32>
    %157 = vector.multi_reduction <add>, %154, %cst_65 [1] : vector<12x32xf32> to vector<12xf32>
    %158 = vector.shape_cast %157 : vector<12xf32> to vector<12x1xf32>
    %cst_66 = arith.constant 3.200000e+01 : f32
    %159 = vector.broadcast %cst_66 : f32 to vector<12x1xf32>
    %160 = arith.divf %158, %159 : vector<12x1xf32>
    %161 = vector.broadcast %160 : vector<12x1xf32> to vector<12x32xf32>
    %162 = arith.subf %154, %161 : vector<12x32xf32>
    %163 = arith.mulf %162, %162 : vector<12x32xf32>
    %cst_67 = arith.constant dense<0.000000e+00> : vector<12xf32>
    %164 = vector.multi_reduction <add>, %163, %cst_67 [1] : vector<12x32xf32> to vector<12xf32>
    %165 = vector.shape_cast %164 : vector<12xf32> to vector<12x1xf32>
    %cst_68 = arith.constant 3.200000e+01 : f32
    %166 = vector.broadcast %cst_68 : f32 to vector<12x1xf32>
    %167 = arith.divf %165, %166 : vector<12x1xf32>
    %168 = vector.broadcast %160 : vector<12x1xf32> to vector<12x32xf32>
    %169 = arith.subf %154, %168 : vector<12x32xf32>
    %cst_69 = arith.constant 9.99999974E-6 : f32
    %170 = vector.broadcast %cst_69 : f32 to vector<12x1xf32>
    %171 = arith.addf %167, %170 : vector<12x1xf32>
    %172 = math.rsqrt %171 : vector<12x1xf32>
    %173 = vector.broadcast %172 : vector<12x1xf32> to vector<12x32xf32>
    %174 = arith.mulf %169, %173 : vector<12x32xf32>
    %175 = vector.broadcast %155 : vector<1x32xf32> to vector<12x32xf32>
    %176 = arith.mulf %174, %175 : vector<12x32xf32>
    %177 = vector.broadcast %156 : vector<1x32xf32> to vector<12x32xf32>
    %178 = arith.addf %176, %177 : vector<12x32xf32>
    %c648 = arith.constant 648 : index
    %c0_70 = arith.constant 0 : index
    %179 = vector.load %arg2[%c648, %c0_70] : memref<704x128xf32, #tpu.memory_space<vmem>>, vector<12x12xf32>
    %c184 = arith.constant 184 : index
    %c0_71 = arith.constant 0 : index
    %180 = vector.load %arg2[%c184, %c0_71] : memref<704x128xf32, #tpu.memory_space<vmem>>, vector<32x96xf32>
    %cst_72 = arith.constant dense<0.000000e+00> : vector<12x96xf32>
    %181 = tpu.matmul %178, %180, %cst_72 {dimension_numbers = #tpu.dot_dimension_numbers<[1], [0], [0], [1], [0, 0, 1, 1], [], []>} : vector<12x32xf32>, vector<32x96xf32>, vector<12x96xf32> -> vector<12x96xf32>
    %c680 = arith.constant 680 : index
    %c0_73 = arith.constant 0 : index
    %182 = vector.load %arg2[%c680, %c0_73] : memref<704x128xf32, #tpu.memory_space<vmem>>, vector<1x96xf32>
    %183 = vector.broadcast %182 : vector<1x96xf32> to vector<12x96xf32>
    %184 = arith.addf %181, %183 : vector<12x96xf32>
    %185 = vector.extract_strided_slice %184 {offsets = [0, 0], sizes = [12, 32], strides = [1, 1]} : vector<12x96xf32> to vector<12x32xf32>
    %186 = vector.extract_strided_slice %184 {offsets = [0, 32], sizes = [12, 32], strides = [1, 1]} : vector<12x96xf32> to vector<12x32xf32>
    %187 = vector.extract_strided_slice %184 {offsets = [0, 64], sizes = [12, 32], strides = [1, 1]} : vector<12x96xf32> to vector<12x32xf32>
    %188 = vector.extract_strided_slice %185 {offsets = [0, 0], sizes = [12, 8], strides = [1, 1]} : vector<12x32xf32> to vector<12x8xf32>
    %189 = vector.extract_strided_slice %186 {offsets = [0, 0], sizes = [12, 8], strides = [1, 1]} : vector<12x32xf32> to vector<12x8xf32>
    %cst_74 = arith.constant dense<0.000000e+00> : vector<12x12xf32>
    %190 = tpu.matmul %188, %189, %cst_74 {dimension_numbers = #tpu.dot_dimension_numbers<[1], [1], [0], [0], [0, 0, 1, 0], [], []>} : vector<12x8xf32>, vector<12x8xf32>, vector<12x12xf32> -> vector<12x12xf32>
    %191 = arith.addf %190, %179 : vector<12x12xf32>
    %c0_75 = arith.constant 0 : index
    %c0_76 = arith.constant 0 : index
    %192 = vector.load %arg4[%c0_75, %c0_76] : memref<64x12xf32, #tpu.memory_space<vmem>>, vector<12x12xf32>
    tpu.vector_store %arg4[%c0_75, %c0_76], %191 {strides = array<i32>} : memref<64x12xf32, #tpu.memory_space<vmem>>, vector<12x12xf32>,
    %193 = vector.extract_strided_slice %185 {offsets = [0, 8], sizes = [12, 8], strides = [1, 1]} : vector<12x32xf32> to vector<12x8xf32>
    %194 = vector.extract_strided_slice %186 {offsets = [0, 8], sizes = [12, 8], strides = [1, 1]} : vector<12x32xf32> to vector<12x8xf32>
    %cst_77 = arith.constant dense<0.000000e+00> : vector<12x12xf32>
    %195 = tpu.matmul %193, %194, %cst_77 {dimension_numbers = #tpu.dot_dimension_numbers<[1], [1], [0], [0], [0, 0, 1, 0], [], []>} : vector<12x8xf32>, vector<12x8xf32>, vector<12x12xf32> -> vector<12x12xf32>
    %196 = arith.addf %195, %179 : vector<12x12xf32>
    %c16 = arith.constant 16 : index
    %c0_78 = arith.constant 0 : index
    %197 = vector.load %arg4[%c16, %c0_78] : memref<64x12xf32, #tpu.memory_space<vmem>>, vector<12x12xf32>
    tpu.vector_store %arg4[%c16, %c0_78], %196 {strides = array<i32>} : memref<64x12xf32, #tpu.memory_space<vmem>>, vector<12x12xf32>,
    %198 = vector.extract_strided_slice %185 {offsets = [0, 16], sizes = [12, 8], strides = [1, 1]} : vector<12x32xf32> to vector<12x8xf32>
    %199 = vector.extract_strided_slice %186 {offsets = [0, 16], sizes = [12, 8], strides = [1, 1]} : vector<12x32xf32> to vector<12x8xf32>
    %cst_79 = arith.constant dense<0.000000e+00> : vector<12x12xf32>
    %200 = tpu.matmul %198, %199, %cst_79 {dimension_numbers = #tpu.dot_dimension_numbers<[1], [1], [0], [0], [0, 0, 1, 0], [], []>} : vector<12x8xf32>, vector<12x8xf32>, vector<12x12xf32> -> vector<12x12xf32>
    %201 = arith.addf %200, %179 : vector<12x12xf32>
    %c32 = arith.constant 32 : index
    %c0_80 = arith.constant 0 : index
    %202 = vector.load %arg4[%c32, %c0_80] : memref<64x12xf32, #tpu.memory_space<vmem>>, vector<12x12xf32>
    tpu.vector_store %arg4[%c32, %c0_80], %201 {strides = array<i32>} : memref<64x12xf32, #tpu.memory_space<vmem>>, vector<12x12xf32>,
    %203 = vector.extract_strided_slice %185 {offsets = [0, 24], sizes = [12, 8], strides = [1, 1]} : vector<12x32xf32> to vector<12x8xf32>
    %204 = vector.extract_strided_slice %186 {offsets = [0, 24], sizes = [12, 8], strides = [1, 1]} : vector<12x32xf32> to vector<12x8xf32>
    %cst_81 = arith.constant dense<0.000000e+00> : vector<12x12xf32>
    %205 = tpu.matmul %203, %204, %cst_81 {dimension_numbers = #tpu.dot_dimension_numbers<[1], [1], [0], [0], [0, 0, 1, 0], [], []>} : vector<12x8xf32>, vector<12x8xf32>, vector<12x12xf32> -> vector<12x12xf32>
    %206 = arith.addf %205, %179 : vector<12x12xf32>
    %c48 = arith.constant 48 : index
    %c0_82 = arith.constant 0 : index
    %207 = vector.load %arg4[%c48, %c0_82] : memref<64x12xf32, #tpu.memory_space<vmem>>, vector<12x12xf32>
    tpu.vector_store %arg4[%c48, %c0_82], %206 {strides = array<i32>} : memref<64x12xf32, #tpu.memory_space<vmem>>, vector<12x12xf32>,
    %c0_83 = arith.constant 0 : index
    %c0_84 = arith.constant 0 : index
    %208 = vector.load %arg4[%c0_83, %c0_84] : memref<64x12xf32, #tpu.memory_space<vmem>>, vector<64x12xf32>
    %cst_85 = arith.constant dense<0xFF800000> : vector<64xf32>
    %209 = vector.multi_reduction <maximumf>, %208, %cst_85 [1] : vector<64x12xf32> to vector<64xf32>
    %210 = vector.shape_cast %209 : vector<64xf32> to vector<64x1xf32>
    %211 = vector.broadcast %210 : vector<64x1xf32> to vector<64x12xf32>
    %212 = arith.subf %208, %211 : vector<64x12xf32>
    %213 = math.exp %212 : vector<64x12xf32>
    %cst_86 = arith.constant dense<0.000000e+00> : vector<64xf32>
    %214 = vector.multi_reduction <add>, %213, %cst_86 [1] : vector<64x12xf32> to vector<64xf32>
    %215 = vector.shape_cast %214 : vector<64xf32> to vector<64x1xf32>
    %216 = tpu.reciprocal %215 {approx = true} : vector<64x1xf32> -> vector<64x1xf32>
    %217 = vector.broadcast %216 : vector<64x1xf32> to vector<64x12xf32>
    %218 = arith.mulf %213, %217 : vector<64x12xf32>
    %c216 = arith.constant 216 : index
    %c0_87 = arith.constant 0 : index
    %219 = vector.load %arg2[%c216, %c0_87] : memref<704x128xf32, #tpu.memory_space<vmem>>, vector<32x32xf32>
    %c681 = arith.constant 681 : index
    %c0_88 = arith.constant 0 : index
    %220 = vector.load %arg2[%c681, %c0_88] : memref<704x128xf32, #tpu.memory_space<vmem>>, vector<1x32xf32>
    %221 = vector.extract_strided_slice %218 {offsets = [0, 0], sizes = [12, 12], strides = [1, 1]} : vector<64x12xf32> to vector<12x12xf32>
    %222 = vector.extract_strided_slice %187 {offsets = [0, 0], sizes = [12, 8], strides = [1, 1]} : vector<12x32xf32> to vector<12x8xf32>
    %cst_89 = arith.constant dense<0.000000e+00> : vector<12x8xf32>
    %223 = tpu.matmul %221, %222, %cst_89 {dimension_numbers = #tpu.dot_dimension_numbers<[1], [0], [0], [1], [0, 0, 1, 1], [], []>} : vector<12x12xf32>, vector<12x8xf32>, vector<12x8xf32> -> vector<12x8xf32>
    %224 = vector.extract_strided_slice %219 {offsets = [0, 0], sizes = [8, 32], strides = [1, 1]} : vector<32x32xf32> to vector<8x32xf32>
    %cst_90 = arith.constant dense<0.000000e+00> : vector<12x32xf32>
    %225 = tpu.matmul %223, %224, %cst_90 {dimension_numbers = #tpu.dot_dimension_numbers<[1], [0], [0], [1], [0, 0, 1, 1], [], []>} : vector<12x8xf32>, vector<8x32xf32>, vector<12x32xf32> -> vector<12x32xf32>
    %226 = vector.broadcast %220 : vector<1x32xf32> to vector<12x32xf32>
    %227 = arith.addf %226, %225 : vector<12x32xf32>
    %228 = vector.extract_strided_slice %218 {offsets = [16, 0], sizes = [12, 12], strides = [1, 1]} : vector<64x12xf32> to vector<12x12xf32>
    %229 = vector.extract_strided_slice %187 {offsets = [0, 8], sizes = [12, 8], strides = [1, 1]} : vector<12x32xf32> to vector<12x8xf32>
    %cst_91 = arith.constant dense<0.000000e+00> : vector<12x8xf32>
    %230 = tpu.matmul %228, %229, %cst_91 {dimension_numbers = #tpu.dot_dimension_numbers<[1], [0], [0], [1], [0, 0, 1, 1], [], []>} : vector<12x12xf32>, vector<12x8xf32>, vector<12x8xf32> -> vector<12x8xf32>
    %231 = vector.extract_strided_slice %219 {offsets = [8, 0], sizes = [8, 32], strides = [1, 1]} : vector<32x32xf32> to vector<8x32xf32>
    %cst_92 = arith.constant dense<0.000000e+00> : vector<12x32xf32>
    %232 = tpu.matmul %230, %231, %cst_92 {dimension_numbers = #tpu.dot_dimension_numbers<[1], [0], [0], [1], [0, 0, 1, 1], [], []>} : vector<12x8xf32>, vector<8x32xf32>, vector<12x32xf32> -> vector<12x32xf32>
    %233 = arith.addf %227, %232 : vector<12x32xf32>
    %234 = vector.extract_strided_slice %218 {offsets = [32, 0], sizes = [12, 12], strides = [1, 1]} : vector<64x12xf32> to vector<12x12xf32>
    %235 = vector.extract_strided_slice %187 {offsets = [0, 16], sizes = [12, 8], strides = [1, 1]} : vector<12x32xf32> to vector<12x8xf32>
    %cst_93 = arith.constant dense<0.000000e+00> : vector<12x8xf32>
    %236 = tpu.matmul %234, %235, %cst_93 {dimension_numbers = #tpu.dot_dimension_numbers<[1], [0], [0], [1], [0, 0, 1, 1], [], []>} : vector<12x12xf32>, vector<12x8xf32>, vector<12x8xf32> -> vector<12x8xf32>
    %237 = vector.extract_strided_slice %219 {offsets = [16, 0], sizes = [8, 32], strides = [1, 1]} : vector<32x32xf32> to vector<8x32xf32>
    %cst_94 = arith.constant dense<0.000000e+00> : vector<12x32xf32>
    %238 = tpu.matmul %236, %237, %cst_94 {dimension_numbers = #tpu.dot_dimension_numbers<[1], [0], [0], [1], [0, 0, 1, 1], [], []>} : vector<12x8xf32>, vector<8x32xf32>, vector<12x32xf32> -> vector<12x32xf32>
    %239 = arith.addf %233, %238 : vector<12x32xf32>
    %240 = vector.extract_strided_slice %218 {offsets = [48, 0], sizes = [12, 12], strides = [1, 1]} : vector<64x12xf32> to vector<12x12xf32>
    %241 = vector.extract_strided_slice %187 {offsets = [0, 24], sizes = [12, 8], strides = [1, 1]} : vector<12x32xf32> to vector<12x8xf32>
    %cst_95 = arith.constant dense<0.000000e+00> : vector<12x8xf32>
    %242 = tpu.matmul %240, %241, %cst_95 {dimension_numbers = #tpu.dot_dimension_numbers<[1], [0], [0], [1], [0, 0, 1, 1], [], []>} : vector<12x12xf32>, vector<12x8xf32>, vector<12x8xf32> -> vector<12x8xf32>
    %243 = vector.extract_strided_slice %219 {offsets = [24, 0], sizes = [8, 32], strides = [1, 1]} : vector<32x32xf32> to vector<8x32xf32>
    %cst_96 = arith.constant dense<0.000000e+00> : vector<12x32xf32>
    %244 = tpu.matmul %242, %243, %cst_96 {dimension_numbers = #tpu.dot_dimension_numbers<[1], [0], [0], [1], [0, 0, 1, 1], [], []>} : vector<12x8xf32>, vector<8x32xf32>, vector<12x32xf32> -> vector<12x32xf32>
    %245 = arith.addf %239, %244 : vector<12x32xf32>
    %246 = arith.addf %178, %245 : vector<12x32xf32>
    %c682 = arith.constant 682 : index
    %c0_97 = arith.constant 0 : index
    %247 = vector.load %arg2[%c682, %c0_97] : memref<704x128xf32, #tpu.memory_space<vmem>>, vector<1x32xf32>
    %c683 = arith.constant 683 : index
    %c0_98 = arith.constant 0 : index
    %248 = vector.load %arg2[%c683, %c0_98] : memref<704x128xf32, #tpu.memory_space<vmem>>, vector<1x32xf32>
    %cst_99 = arith.constant dense<0.000000e+00> : vector<12xf32>
    %249 = vector.multi_reduction <add>, %246, %cst_99 [1] : vector<12x32xf32> to vector<12xf32>
    %250 = vector.shape_cast %249 : vector<12xf32> to vector<12x1xf32>
    %cst_100 = arith.constant 3.200000e+01 : f32
    %251 = vector.broadcast %cst_100 : f32 to vector<12x1xf32>
    %252 = arith.divf %250, %251 : vector<12x1xf32>
    %253 = vector.broadcast %252 : vector<12x1xf32> to vector<12x32xf32>
    %254 = arith.subf %246, %253 : vector<12x32xf32>
    %255 = arith.mulf %254, %254 : vector<12x32xf32>
    %cst_101 = arith.constant dense<0.000000e+00> : vector<12xf32>
    %256 = vector.multi_reduction <add>, %255, %cst_101 [1] : vector<12x32xf32> to vector<12xf32>
    %257 = vector.shape_cast %256 : vector<12xf32> to vector<12x1xf32>
    %cst_102 = arith.constant 3.200000e+01 : f32
    %258 = vector.broadcast %cst_102 : f32 to vector<12x1xf32>
    %259 = arith.divf %257, %258 : vector<12x1xf32>
    %260 = vector.broadcast %252 : vector<12x1xf32> to vector<12x32xf32>
    %261 = arith.subf %246, %260 : vector<12x32xf32>
    %cst_103 = arith.constant 9.99999974E-6 : f32
    %262 = vector.broadcast %cst_103 : f32 to vector<12x1xf32>
    %263 = arith.addf %259, %262 : vector<12x1xf32>
    %264 = math.rsqrt %263 : vector<12x1xf32>
    %265 = vector.broadcast %264 : vector<12x1xf32> to vector<12x32xf32>
    %266 = arith.mulf %261, %265 : vector<12x32xf32>
    %267 = vector.broadcast %247 : vector<1x32xf32> to vector<12x32xf32>
    %268 = arith.mulf %266, %267 : vector<12x32xf32>
    %269 = vector.broadcast %248 : vector<1x32xf32> to vector<12x32xf32>
    %270 = arith.addf %268, %269 : vector<12x32xf32>
    %c248 = arith.constant 248 : index
    %c0_104 = arith.constant 0 : index
    %271 = vector.load %arg2[%c248, %c0_104] : memref<704x128xf32, #tpu.memory_space<vmem>>, vector<32x64xf32>
    %cst_105 = arith.constant dense<0.000000e+00> : vector<12x64xf32>
    %272 = tpu.matmul %270, %271, %cst_105 {dimension_numbers = #tpu.dot_dimension_numbers<[1], [0], [0], [1], [0, 0, 1, 1], [], []>} : vector<12x32xf32>, vector<32x64xf32>, vector<12x64xf32> -> vector<12x64xf32>
    %c684 = arith.constant 684 : index
    %c0_106 = arith.constant 0 : index
    %273 = vector.load %arg2[%c684, %c0_106] : memref<704x128xf32, #tpu.memory_space<vmem>>, vector<1x64xf32>
    %274 = vector.broadcast %273 : vector<1x64xf32> to vector<12x64xf32>
    %275 = arith.addf %272, %274 : vector<12x64xf32>
    %276 = arith.mulf %275, %275 : vector<12x64xf32>
    %277 = arith.mulf %275, %276 : vector<12x64xf32>
    %cst_107 = arith.constant 4.471500e-02 : f32
    %278 = vector.broadcast %cst_107 : f32 to vector<12x64xf32>
    %279 = arith.mulf %278, %277 : vector<12x64xf32>
    %280 = arith.addf %275, %279 : vector<12x64xf32>
    %cst_108 = arith.constant 0.797884583 : f32
    %281 = vector.broadcast %cst_108 : f32 to vector<12x64xf32>
    %282 = arith.mulf %281, %280 : vector<12x64xf32>
    %283 = math.tanh %282 : vector<12x64xf32>
    %cst_109 = arith.constant 1.000000e+00 : f32
    %284 = vector.broadcast %cst_109 : f32 to vector<12x64xf32>
    %285 = arith.addf %284, %283 : vector<12x64xf32>
    %cst_110 = arith.constant 5.000000e-01 : f32
    %286 = vector.broadcast %cst_110 : f32 to vector<12x64xf32>
    %287 = arith.mulf %286, %285 : vector<12x64xf32>
    %288 = arith.mulf %275, %287 : vector<12x64xf32>
    %c280 = arith.constant 280 : index
    %c0_111 = arith.constant 0 : index
    %289 = vector.load %arg2[%c280, %c0_111] : memref<704x128xf32, #tpu.memory_space<vmem>>, vector<64x32xf32>
    %cst_112 = arith.constant dense<0.000000e+00> : vector<12x32xf32>
    %290 = tpu.matmul %288, %289, %cst_112 {dimension_numbers = #tpu.dot_dimension_numbers<[1], [0], [0], [1], [0, 0, 1, 1], [], []>} : vector<12x64xf32>, vector<64x32xf32>, vector<12x32xf32> -> vector<12x32xf32>
    %c685 = arith.constant 685 : index
    %c0_113 = arith.constant 0 : index
    %291 = vector.load %arg2[%c685, %c0_113] : memref<704x128xf32, #tpu.memory_space<vmem>>, vector<1x32xf32>
    %292 = vector.broadcast %291 : vector<1x32xf32> to vector<12x32xf32>
    %293 = arith.addf %290, %292 : vector<12x32xf32>
    %294 = arith.addf %270, %293 : vector<12x32xf32>
    %c686 = arith.constant 686 : index
    %c0_114 = arith.constant 0 : index
    %295 = vector.load %arg2[%c686, %c0_114] : memref<704x128xf32, #tpu.memory_space<vmem>>, vector<1x32xf32>
    %c687 = arith.constant 687 : index
    %c0_115 = arith.constant 0 : index
    %296 = vector.load %arg2[%c687, %c0_115] : memref<704x128xf32, #tpu.memory_space<vmem>>, vector<1x32xf32>
    %cst_116 = arith.constant dense<0.000000e+00> : vector<12xf32>
    %297 = vector.multi_reduction <add>, %294, %cst_116 [1] : vector<12x32xf32> to vector<12xf32>
    %298 = vector.shape_cast %297 : vector<12xf32> to vector<12x1xf32>
    %cst_117 = arith.constant 3.200000e+01 : f32
    %299 = vector.broadcast %cst_117 : f32 to vector<12x1xf32>
    %300 = arith.divf %298, %299 : vector<12x1xf32>
    %301 = vector.broadcast %300 : vector<12x1xf32> to vector<12x32xf32>
    %302 = arith.subf %294, %301 : vector<12x32xf32>
    %303 = arith.mulf %302, %302 : vector<12x32xf32>
    %cst_118 = arith.constant dense<0.000000e+00> : vector<12xf32>
    %304 = vector.multi_reduction <add>, %303, %cst_118 [1] : vector<12x32xf32> to vector<12xf32>
    %305 = vector.shape_cast %304 : vector<12xf32> to vector<12x1xf32>
    %cst_119 = arith.constant 3.200000e+01 : f32
    %306 = vector.broadcast %cst_119 : f32 to vector<12x1xf32>
    %307 = arith.divf %305, %306 : vector<12x1xf32>
    %308 = vector.broadcast %300 : vector<12x1xf32> to vector<12x32xf32>
    %309 = arith.subf %294, %308 : vector<12x32xf32>
    %cst_120 = arith.constant 9.99999974E-6 : f32
    %310 = vector.broadcast %cst_120 : f32 to vector<12x1xf32>
    %311 = arith.addf %307, %310 : vector<12x1xf32>
    %312 = math.rsqrt %311 : vector<12x1xf32>
    %313 = vector.broadcast %312 : vector<12x1xf32> to vector<12x32xf32>
    %314 = arith.mulf %309, %313 : vector<12x32xf32>
    %315 = vector.broadcast %295 : vector<1x32xf32> to vector<12x32xf32>
    %316 = arith.mulf %314, %315 : vector<12x32xf32>
    %317 = vector.broadcast %296 : vector<1x32xf32> to vector<12x32xf32>
    %318 = arith.addf %316, %317 : vector<12x32xf32>
    %c344 = arith.constant 344 : index
    %c0_121 = arith.constant 0 : index
    %319 = vector.load %arg2[%c344, %c0_121] : memref<704x128xf32, #tpu.memory_space<vmem>>, vector<32x96xf32>
    %cst_122 = arith.constant dense<0.000000e+00> : vector<12x96xf32>
    %320 = tpu.matmul %318, %319, %cst_122 {dimension_numbers = #tpu.dot_dimension_numbers<[1], [0], [0], [1], [0, 0, 1, 1], [], []>} : vector<12x32xf32>, vector<32x96xf32>, vector<12x96xf32> -> vector<12x96xf32>
    %c688 = arith.constant 688 : index
    %c0_123 = arith.constant 0 : index
    %321 = vector.load %arg2[%c688, %c0_123] : memref<704x128xf32, #tpu.memory_space<vmem>>, vector<1x96xf32>
    %322 = vector.broadcast %321 : vector<1x96xf32> to vector<12x96xf32>
    %323 = arith.addf %320, %322 : vector<12x96xf32>
    %324 = vector.extract_strided_slice %323 {offsets = [0, 0], sizes = [12, 32], strides = [1, 1]} : vector<12x96xf32> to vector<12x32xf32>
    %325 = vector.extract_strided_slice %323 {offsets = [0, 32], sizes = [12, 32], strides = [1, 1]} : vector<12x96xf32> to vector<12x32xf32>
    %326 = vector.extract_strided_slice %323 {offsets = [0, 64], sizes = [12, 32], strides = [1, 1]} : vector<12x96xf32> to vector<12x32xf32>
    %327 = vector.extract_strided_slice %324 {offsets = [0, 0], sizes = [12, 8], strides = [1, 1]} : vector<12x32xf32> to vector<12x8xf32>
    %328 = vector.extract_strided_slice %325 {offsets = [0, 0], sizes = [12, 8], strides = [1, 1]} : vector<12x32xf32> to vector<12x8xf32>
    %cst_124 = arith.constant dense<0.000000e+00> : vector<12x12xf32>
    %329 = tpu.matmul %327, %328, %cst_124 {dimension_numbers = #tpu.dot_dimension_numbers<[1], [1], [0], [0], [0, 0, 1, 0], [], []>} : vector<12x8xf32>, vector<12x8xf32>, vector<12x12xf32> -> vector<12x12xf32>
    %330 = arith.addf %329, %179 : vector<12x12xf32>
    %c0_125 = arith.constant 0 : index
    %c0_126 = arith.constant 0 : index
    %331 = vector.load %arg4[%c0_125, %c0_126] : memref<64x12xf32, #tpu.memory_space<vmem>>, vector<12x12xf32>
    tpu.vector_store %arg4[%c0_125, %c0_126], %330 {strides = array<i32>} : memref<64x12xf32, #tpu.memory_space<vmem>>, vector<12x12xf32>,
    %332 = vector.extract_strided_slice %324 {offsets = [0, 8], sizes = [12, 8], strides = [1, 1]} : vector<12x32xf32> to vector<12x8xf32>
    %333 = vector.extract_strided_slice %325 {offsets = [0, 8], sizes = [12, 8], strides = [1, 1]} : vector<12x32xf32> to vector<12x8xf32>
    %cst_127 = arith.constant dense<0.000000e+00> : vector<12x12xf32>
    %334 = tpu.matmul %332, %333, %cst_127 {dimension_numbers = #tpu.dot_dimension_numbers<[1], [1], [0], [0], [0, 0, 1, 0], [], []>} : vector<12x8xf32>, vector<12x8xf32>, vector<12x12xf32> -> vector<12x12xf32>
    %335 = arith.addf %334, %179 : vector<12x12xf32>
    %c16_128 = arith.constant 16 : index
    %c0_129 = arith.constant 0 : index
    %336 = vector.load %arg4[%c16_128, %c0_129] : memref<64x12xf32, #tpu.memory_space<vmem>>, vector<12x12xf32>
    tpu.vector_store %arg4[%c16_128, %c0_129], %335 {strides = array<i32>} : memref<64x12xf32, #tpu.memory_space<vmem>>, vector<12x12xf32>,
    %337 = vector.extract_strided_slice %324 {offsets = [0, 16], sizes = [12, 8], strides = [1, 1]} : vector<12x32xf32> to vector<12x8xf32>
    %338 = vector.extract_strided_slice %325 {offsets = [0, 16], sizes = [12, 8], strides = [1, 1]} : vector<12x32xf32> to vector<12x8xf32>
    %cst_130 = arith.constant dense<0.000000e+00> : vector<12x12xf32>
    %339 = tpu.matmul %337, %338, %cst_130 {dimension_numbers = #tpu.dot_dimension_numbers<[1], [1], [0], [0], [0, 0, 1, 0], [], []>} : vector<12x8xf32>, vector<12x8xf32>, vector<12x12xf32> -> vector<12x12xf32>
    %340 = arith.addf %339, %179 : vector<12x12xf32>
    %c32_131 = arith.constant 32 : index
    %c0_132 = arith.constant 0 : index
    %341 = vector.load %arg4[%c32_131, %c0_132] : memref<64x12xf32, #tpu.memory_space<vmem>>, vector<12x12xf32>
    tpu.vector_store %arg4[%c32_131, %c0_132], %340 {strides = array<i32>} : memref<64x12xf32, #tpu.memory_space<vmem>>, vector<12x12xf32>,
    %342 = vector.extract_strided_slice %324 {offsets = [0, 24], sizes = [12, 8], strides = [1, 1]} : vector<12x32xf32> to vector<12x8xf32>
    %343 = vector.extract_strided_slice %325 {offsets = [0, 24], sizes = [12, 8], strides = [1, 1]} : vector<12x32xf32> to vector<12x8xf32>
    %cst_133 = arith.constant dense<0.000000e+00> : vector<12x12xf32>
    %344 = tpu.matmul %342, %343, %cst_133 {dimension_numbers = #tpu.dot_dimension_numbers<[1], [1], [0], [0], [0, 0, 1, 0], [], []>} : vector<12x8xf32>, vector<12x8xf32>, vector<12x12xf32> -> vector<12x12xf32>
    %345 = arith.addf %344, %179 : vector<12x12xf32>
    %c48_134 = arith.constant 48 : index
    %c0_135 = arith.constant 0 : index
    %346 = vector.load %arg4[%c48_134, %c0_135] : memref<64x12xf32, #tpu.memory_space<vmem>>, vector<12x12xf32>
    tpu.vector_store %arg4[%c48_134, %c0_135], %345 {strides = array<i32>} : memref<64x12xf32, #tpu.memory_space<vmem>>, vector<12x12xf32>,
    %c0_136 = arith.constant 0 : index
    %c0_137 = arith.constant 0 : index
    %347 = vector.load %arg4[%c0_136, %c0_137] : memref<64x12xf32, #tpu.memory_space<vmem>>, vector<64x12xf32>
    %cst_138 = arith.constant dense<0xFF800000> : vector<64xf32>
    %348 = vector.multi_reduction <maximumf>, %347, %cst_138 [1] : vector<64x12xf32> to vector<64xf32>
    %349 = vector.shape_cast %348 : vector<64xf32> to vector<64x1xf32>
    %350 = vector.broadcast %349 : vector<64x1xf32> to vector<64x12xf32>
    %351 = arith.subf %347, %350 : vector<64x12xf32>
    %352 = math.exp %351 : vector<64x12xf32>
    %cst_139 = arith.constant dense<0.000000e+00> : vector<64xf32>
    %353 = vector.multi_reduction <add>, %352, %cst_139 [1] : vector<64x12xf32> to vector<64xf32>
    %354 = vector.shape_cast %353 : vector<64xf32> to vector<64x1xf32>
    %355 = tpu.reciprocal %354 {approx = true} : vector<64x1xf32> -> vector<64x1xf32>
    %356 = vector.broadcast %355 : vector<64x1xf32> to vector<64x12xf32>
    %357 = arith.mulf %352, %356 : vector<64x12xf32>
    %c376 = arith.constant 376 : index
    %c0_140 = arith.constant 0 : index
    %358 = vector.load %arg2[%c376, %c0_140] : memref<704x128xf32, #tpu.memory_space<vmem>>, vector<32x32xf32>
    %c689 = arith.constant 689 : index
    %c0_141 = arith.constant 0 : index
    %359 = vector.load %arg2[%c689, %c0_141] : memref<704x128xf32, #tpu.memory_space<vmem>>, vector<1x32xf32>
    %360 = vector.extract_strided_slice %357 {offsets = [0, 0], sizes = [12, 12], strides = [1, 1]} : vector<64x12xf32> to vector<12x12xf32>
    %361 = vector.extract_strided_slice %326 {offsets = [0, 0], sizes = [12, 8], strides = [1, 1]} : vector<12x32xf32> to vector<12x8xf32>
    %cst_142 = arith.constant dense<0.000000e+00> : vector<12x8xf32>
    %362 = tpu.matmul %360, %361, %cst_142 {dimension_numbers = #tpu.dot_dimension_numbers<[1], [0], [0], [1], [0, 0, 1, 1], [], []>} : vector<12x12xf32>, vector<12x8xf32>, vector<12x8xf32> -> vector<12x8xf32>
    %363 = vector.extract_strided_slice %358 {offsets = [0, 0], sizes = [8, 32], strides = [1, 1]} : vector<32x32xf32> to vector<8x32xf32>
    %cst_143 = arith.constant dense<0.000000e+00> : vector<12x32xf32>
    %364 = tpu.matmul %362, %363, %cst_143 {dimension_numbers = #tpu.dot_dimension_numbers<[1], [0], [0], [1], [0, 0, 1, 1], [], []>} : vector<12x8xf32>, vector<8x32xf32>, vector<12x32xf32> -> vector<12x32xf32>
    %365 = vector.broadcast %359 : vector<1x32xf32> to vector<12x32xf32>
    %366 = arith.addf %365, %364 : vector<12x32xf32>
    %367 = vector.extract_strided_slice %357 {offsets = [16, 0], sizes = [12, 12], strides = [1, 1]} : vector<64x12xf32> to vector<12x12xf32>
    %368 = vector.extract_strided_slice %326 {offsets = [0, 8], sizes = [12, 8], strides = [1, 1]} : vector<12x32xf32> to vector<12x8xf32>
    %cst_144 = arith.constant dense<0.000000e+00> : vector<12x8xf32>
    %369 = tpu.matmul %367, %368, %cst_144 {dimension_numbers = #tpu.dot_dimension_numbers<[1], [0], [0], [1], [0, 0, 1, 1], [], []>} : vector<12x12xf32>, vector<12x8xf32>, vector<12x8xf32> -> vector<12x8xf32>
    %370 = vector.extract_strided_slice %358 {offsets = [8, 0], sizes = [8, 32], strides = [1, 1]} : vector<32x32xf32> to vector<8x32xf32>
    %cst_145 = arith.constant dense<0.000000e+00> : vector<12x32xf32>
    %371 = tpu.matmul %369, %370, %cst_145 {dimension_numbers = #tpu.dot_dimension_numbers<[1], [0], [0], [1], [0, 0, 1, 1], [], []>} : vector<12x8xf32>, vector<8x32xf32>, vector<12x32xf32> -> vector<12x32xf32>
    %372 = arith.addf %366, %371 : vector<12x32xf32>
    %373 = vector.extract_strided_slice %357 {offsets = [32, 0], sizes = [12, 12], strides = [1, 1]} : vector<64x12xf32> to vector<12x12xf32>
    %374 = vector.extract_strided_slice %326 {offsets = [0, 16], sizes = [12, 8], strides = [1, 1]} : vector<12x32xf32> to vector<12x8xf32>
    %cst_146 = arith.constant dense<0.000000e+00> : vector<12x8xf32>
    %375 = tpu.matmul %373, %374, %cst_146 {dimension_numbers = #tpu.dot_dimension_numbers<[1], [0], [0], [1], [0, 0, 1, 1], [], []>} : vector<12x12xf32>, vector<12x8xf32>, vector<12x8xf32> -> vector<12x8xf32>
    %376 = vector.extract_strided_slice %358 {offsets = [16, 0], sizes = [8, 32], strides = [1, 1]} : vector<32x32xf32> to vector<8x32xf32>
    %cst_147 = arith.constant dense<0.000000e+00> : vector<12x32xf32>
    %377 = tpu.matmul %375, %376, %cst_147 {dimension_numbers = #tpu.dot_dimension_numbers<[1], [0], [0], [1], [0, 0, 1, 1], [], []>} : vector<12x8xf32>, vector<8x32xf32>, vector<12x32xf32> -> vector<12x32xf32>
    %378 = arith.addf %372, %377 : vector<12x32xf32>
    %379 = vector.extract_strided_slice %357 {offsets = [48, 0], sizes = [12, 12], strides = [1, 1]} : vector<64x12xf32> to vector<12x12xf32>
    %380 = vector.extract_strided_slice %326 {offsets = [0, 24], sizes = [12, 8], strides = [1, 1]} : vector<12x32xf32> to vector<12x8xf32>
    %cst_148 = arith.constant dense<0.000000e+00> : vector<12x8xf32>
    %381 = tpu.matmul %379, %380, %cst_148 {dimension_numbers = #tpu.dot_dimension_numbers<[1], [0], [0], [1], [0, 0, 1, 1], [], []>} : vector<12x12xf32>, vector<12x8xf32>, vector<12x8xf32> -> vector<12x8xf32>
    %382 = vector.extract_strided_slice %358 {offsets = [24, 0], sizes = [8, 32], strides = [1, 1]} : vector<32x32xf32> to vector<8x32xf32>
    %cst_149 = arith.constant dense<0.000000e+00> : vector<12x32xf32>
    %383 = tpu.matmul %381, %382, %cst_149 {dimension_numbers = #tpu.dot_dimension_numbers<[1], [0], [0], [1], [0, 0, 1, 1], [], []>} : vector<12x8xf32>, vector<8x32xf32>, vector<12x32xf32> -> vector<12x32xf32>
    %384 = arith.addf %378, %383 : vector<12x32xf32>
    %385 = arith.addf %318, %384 : vector<12x32xf32>
    %c690 = arith.constant 690 : index
    %c0_150 = arith.constant 0 : index
    %386 = vector.load %arg2[%c690, %c0_150] : memref<704x128xf32, #tpu.memory_space<vmem>>, vector<1x32xf32>
    %c691 = arith.constant 691 : index
    %c0_151 = arith.constant 0 : index
    %387 = vector.load %arg2[%c691, %c0_151] : memref<704x128xf32, #tpu.memory_space<vmem>>, vector<1x32xf32>
    %cst_152 = arith.constant dense<0.000000e+00> : vector<12xf32>
    %388 = vector.multi_reduction <add>, %385, %cst_152 [1] : vector<12x32xf32> to vector<12xf32>
    %389 = vector.shape_cast %388 : vector<12xf32> to vector<12x1xf32>
    %cst_153 = arith.constant 3.200000e+01 : f32
    %390 = vector.broadcast %cst_153 : f32 to vector<12x1xf32>
    %391 = arith.divf %389, %390 : vector<12x1xf32>
    %392 = vector.broadcast %391 : vector<12x1xf32> to vector<12x32xf32>
    %393 = arith.subf %385, %392 : vector<12x32xf32>
    %394 = arith.mulf %393, %393 : vector<12x32xf32>
    %cst_154 = arith.constant dense<0.000000e+00> : vector<12xf32>
    %395 = vector.multi_reduction <add>, %394, %cst_154 [1] : vector<12x32xf32> to vector<12xf32>
    %396 = vector.shape_cast %395 : vector<12xf32> to vector<12x1xf32>
    %cst_155 = arith.constant 3.200000e+01 : f32
    %397 = vector.broadcast %cst_155 : f32 to vector<12x1xf32>
    %398 = arith.divf %396, %397 : vector<12x1xf32>
    %399 = vector.broadcast %391 : vector<12x1xf32> to vector<12x32xf32>
    %400 = arith.subf %385, %399 : vector<12x32xf32>
    %cst_156 = arith.constant 9.99999974E-6 : f32
    %401 = vector.broadcast %cst_156 : f32 to vector<12x1xf32>
    %402 = arith.addf %398, %401 : vector<12x1xf32>
    %403 = math.rsqrt %402 : vector<12x1xf32>
    %404 = vector.broadcast %403 : vector<12x1xf32> to vector<12x32xf32>
    %405 = arith.mulf %400, %404 : vector<12x32xf32>
    %406 = vector.broadcast %386 : vector<1x32xf32> to vector<12x32xf32>
    %407 = arith.mulf %405, %406 : vector<12x32xf32>
    %408 = vector.broadcast %387 : vector<1x32xf32> to vector<12x32xf32>
    %409 = arith.addf %407, %408 : vector<12x32xf32>
    %c408 = arith.constant 408 : index
    %c0_157 = arith.constant 0 : index
    %410 = vector.load %arg2[%c408, %c0_157] : memref<704x128xf32, #tpu.memory_space<vmem>>, vector<32x64xf32>
    %cst_158 = arith.constant dense<0.000000e+00> : vector<12x64xf32>
    %411 = tpu.matmul %409, %410, %cst_158 {dimension_numbers = #tpu.dot_dimension_numbers<[1], [0], [0], [1], [0, 0, 1, 1], [], []>} : vector<12x32xf32>, vector<32x64xf32>, vector<12x64xf32> -> vector<12x64xf32>
    %c692 = arith.constant 692 : index
    %c0_159 = arith.constant 0 : index
    %412 = vector.load %arg2[%c692, %c0_159] : memref<704x128xf32, #tpu.memory_space<vmem>>, vector<1x64xf32>
    %413 = vector.broadcast %412 : vector<1x64xf32> to vector<12x64xf32>
    %414 = arith.addf %411, %413 : vector<12x64xf32>
    %415 = arith.mulf %414, %414 : vector<12x64xf32>
    %416 = arith.mulf %414, %415 : vector<12x64xf32>
    %cst_160 = arith.constant 4.471500e-02 : f32
    %417 = vector.broadcast %cst_160 : f32 to vector<12x64xf32>
    %418 = arith.mulf %417, %416 : vector<12x64xf32>
    %419 = arith.addf %414, %418 : vector<12x64xf32>
    %cst_161 = arith.constant 0.797884583 : f32
    %420 = vector.broadcast %cst_161 : f32 to vector<12x64xf32>
    %421 = arith.mulf %420, %419 : vector<12x64xf32>
    %422 = math.tanh %421 : vector<12x64xf32>
    %cst_162 = arith.constant 1.000000e+00 : f32
    %423 = vector.broadcast %cst_162 : f32 to vector<12x64xf32>
    %424 = arith.addf %423, %422 : vector<12x64xf32>
    %cst_163 = arith.constant 5.000000e-01 : f32
    %425 = vector.broadcast %cst_163 : f32 to vector<12x64xf32>
    %426 = arith.mulf %425, %424 : vector<12x64xf32>
    %427 = arith.mulf %414, %426 : vector<12x64xf32>
    %c440 = arith.constant 440 : index
    %c0_164 = arith.constant 0 : index
    %428 = vector.load %arg2[%c440, %c0_164] : memref<704x128xf32, #tpu.memory_space<vmem>>, vector<64x32xf32>
    %cst_165 = arith.constant dense<0.000000e+00> : vector<12x32xf32>
    %429 = tpu.matmul %427, %428, %cst_165 {dimension_numbers = #tpu.dot_dimension_numbers<[1], [0], [0], [1], [0, 0, 1, 1], [], []>} : vector<12x64xf32>, vector<64x32xf32>, vector<12x32xf32> -> vector<12x32xf32>
    %c693 = arith.constant 693 : index
    %c0_166 = arith.constant 0 : index
    %430 = vector.load %arg2[%c693, %c0_166] : memref<704x128xf32, #tpu.memory_space<vmem>>, vector<1x32xf32>
    %431 = vector.broadcast %430 : vector<1x32xf32> to vector<12x32xf32>
    %432 = arith.addf %429, %431 : vector<12x32xf32>
    %433 = arith.addf %409, %432 : vector<12x32xf32>
    %c694 = arith.constant 694 : index
    %c0_167 = arith.constant 0 : index
    %434 = vector.load %arg2[%c694, %c0_167] : memref<704x128xf32, #tpu.memory_space<vmem>>, vector<1x32xf32>
    %c695 = arith.constant 695 : index
    %c0_168 = arith.constant 0 : index
    %435 = vector.load %arg2[%c695, %c0_168] : memref<704x128xf32, #tpu.memory_space<vmem>>, vector<1x32xf32>
    %cst_169 = arith.constant dense<0.000000e+00> : vector<12xf32>
    %436 = vector.multi_reduction <add>, %433, %cst_169 [1] : vector<12x32xf32> to vector<12xf32>
    %437 = vector.shape_cast %436 : vector<12xf32> to vector<12x1xf32>
    %cst_170 = arith.constant 3.200000e+01 : f32
    %438 = vector.broadcast %cst_170 : f32 to vector<12x1xf32>
    %439 = arith.divf %437, %438 : vector<12x1xf32>
    %440 = vector.broadcast %439 : vector<12x1xf32> to vector<12x32xf32>
    %441 = arith.subf %433, %440 : vector<12x32xf32>
    %442 = arith.mulf %441, %441 : vector<12x32xf32>
    %cst_171 = arith.constant dense<0.000000e+00> : vector<12xf32>
    %443 = vector.multi_reduction <add>, %442, %cst_171 [1] : vector<12x32xf32> to vector<12xf32>
    %444 = vector.shape_cast %443 : vector<12xf32> to vector<12x1xf32>
    %cst_172 = arith.constant 3.200000e+01 : f32
    %445 = vector.broadcast %cst_172 : f32 to vector<12x1xf32>
    %446 = arith.divf %444, %445 : vector<12x1xf32>
    %447 = vector.broadcast %439 : vector<12x1xf32> to vector<12x32xf32>
    %448 = arith.subf %433, %447 : vector<12x32xf32>
    %cst_173 = arith.constant 9.99999974E-6 : f32
    %449 = vector.broadcast %cst_173 : f32 to vector<12x1xf32>
    %450 = arith.addf %446, %449 : vector<12x1xf32>
    %451 = math.rsqrt %450 : vector<12x1xf32>
    %452 = vector.broadcast %451 : vector<12x1xf32> to vector<12x32xf32>
    %453 = arith.mulf %448, %452 : vector<12x32xf32>
    %454 = vector.broadcast %434 : vector<1x32xf32> to vector<12x32xf32>
    %455 = arith.mulf %453, %454 : vector<12x32xf32>
    %456 = vector.broadcast %435 : vector<1x32xf32> to vector<12x32xf32>
    %457 = arith.addf %455, %456 : vector<12x32xf32>
    %c664 = arith.constant 664 : index
    %c0_174 = arith.constant 0 : index
    %458 = vector.load %arg2[%c664, %c0_174] : memref<704x128xf32, #tpu.memory_space<vmem>>, vector<2x12xf32>
    %cst_175 = arith.constant dense<0.000000e+00> : vector<2x32xf32>
    %459 = tpu.matmul %458, %457, %cst_175 {dimension_numbers = #tpu.dot_dimension_numbers<[1], [0], [0], [1], [0, 0, 1, 1], [], []>} : vector<2x12xf32>, vector<12x32xf32>, vector<2x32xf32> -> vector<2x32xf32>
    %c504 = arith.constant 504 : index
    %c0_176 = arith.constant 0 : index
    %460 = vector.load %arg2[%c504, %c0_176] : memref<704x128xf32, #tpu.memory_space<vmem>>, vector<32x16xf32>
    %cst_177 = arith.constant dense<0.000000e+00> : vector<2x16xf32>
    %461 = tpu.matmul %459, %460, %cst_177 {dimension_numbers = #tpu.dot_dimension_numbers<[1], [0], [0], [1], [0, 0, 1, 1], [], []>} : vector<2x32xf32>, vector<32x16xf32>, vector<2x16xf32> -> vector<2x16xf32>
    %c696 = arith.constant 696 : index
    %c0_178 = arith.constant 0 : index
    %462 = vector.load %arg2[%c696, %c0_178] : memref<704x128xf32, #tpu.memory_space<vmem>>, vector<1x16xf32>
    %463 = vector.broadcast %462 : vector<1x16xf32> to vector<2x16xf32>
    %464 = arith.addf %461, %463 : vector<2x16xf32>
    %465 = math.tanh %464 : vector<2x16xf32>
    %c536 = arith.constant 536 : index
    %c0_179 = arith.constant 0 : index
    %466 = vector.load %arg2[%c536, %c0_179] : memref<704x128xf32, #tpu.memory_space<vmem>>, vector<16x5xf32>
    %cst_180 = arith.constant dense<0.000000e+00> : vector<2x5xf32>
    %467 = tpu.matmul %465, %466, %cst_180 {dimension_numbers = #tpu.dot_dimension_numbers<[1], [0], [0], [1], [0, 0, 1, 1], [], []>} : vector<2x16xf32>, vector<16x5xf32>, vector<2x5xf32> -> vector<2x5xf32>
    %c697 = arith.constant 697 : index
    %c0_181 = arith.constant 0 : index
    %468 = vector.load %arg2[%c697, %c0_181] : memref<704x128xf32, #tpu.memory_space<vmem>>, vector<1x5xf32>
    %469 = vector.broadcast %468 : vector<1x5xf32> to vector<2x5xf32>
    %470 = arith.addf %467, %469 : vector<2x5xf32>
    %c0_182 = arith.constant 0 : index
    %c0_183 = arith.constant 0 : index
    %471 = vector.load %arg3[%c0_182, %c0_183] : memref<2x5xf32, #tpu.memory_space<vmem>>, vector<2x5xf32>
    tpu.vector_store %arg3[%c0_182, %c0_183], %470 {strides = array<i32>} : memref<2x5xf32, #tpu.memory_space<vmem>>, vector<2x5xf32>,
    return
  }
  func.func @transform_0(%arg0: i32) -> (i32, i32) {
    %c0_i32 = arith.constant 0 : i32
    %c0_i32_0 = arith.constant 0 : i32
    %c0_i32_1 = arith.constant 0 : i32
    return %c0_i32, %c0_i32_0 : i32, i32
  }
  func.func @transform_1(%arg0: i32) -> (i32, i32) {
    %c0_i32 = arith.constant 0 : i32
    %c0_i32_0 = arith.constant 0 : i32
    %c0_i32_1 = arith.constant 0 : i32
    return %c0_i32, %c0_i32_0 : i32, i32
  }
  func.func @transform_2(%arg0: i32) -> (i32, i32) {
    %c0_i32 = arith.constant 0 : i32
    %c0_i32_0 = arith.constant 0 : i32
    %c0_i32_1 = arith.constant 0 : i32
    return %c0_i32, %c0_i32_0 : i32, i32
  }
}

</mosaic_0001>

<bundles_post_ra>
// kernel: hubert_classifier_forward.1
= control target key start
LH: loop header
LB: loop body
LE: loop exit
PB: predicated region body
PF: predicated region fallthrough
CT: control target
= control target key end

     0   :  { %7 = vsyncpa [#allocation4], 0  ;;  %s7155_s0 = inlined_call_operand.vmem [shape: f32[16,8], index: 0, kind: input, shape index: {}]   ;;  %s7156_s1 = inlined_call_operand.hbm [shape: f32[704,128], index: 1, kind: input, shape index: {}]   ;;  %s7157_s2 = inlined_call_operand.hbm [shape: f32[2,5], index: 2, kind: output, shape index: {}]  }
   0x1   :  { %8 = vsyncpa [#allocation5], 0  ;;  %s6672_s9 = smov [#allocation3]   ;;  %s6624_s13 = scalar_lea.hbm %s7156_s1, 11264 }
   0x2   :  { %s16_s10 = sshll.u32 %s6672_s9, 4  ;;  %p6625_p0 = scmp.ne.s32.totalorder %s7156_s1, %s6624_s13  ;;  %s17_s10 = int_to_ptr.vmem [resolvable:$true] %s16_s10 }
   0x3   :  { %p6628_p1 = scmp.lt.u32.totalorder %s6624_s13, %s7156_s1 }
   0x5   :  { %p6630_p2 = pnand %p6628_p1, %p6625_p0 }
   0x7   :  { %6633 = shalt.err (!%p6630_p2)
}
   0x8   :  { %s6634_s18 = scalar_lea.vmem %s17_s10, 11264  ;;  %p6639_p4 = scmp.lt.s32.totalorder %s17_s10, %s17_s10 }
   0x9   :  { %p6635_p3 = scmp.ne.s32.totalorder %s17_s10, %s6634_s18  ;;  %p6640_p5 = scmp.lt.s32.totalorder %s6634_s18, %s6634_s18 }
   0xb   :  { %p6641_p6 = por %p6640_p5, %p6639_p4 }
   0xd   :  { %p6642_p7 = pnand %p6641_p6, %p6635_p3 }
   0xf   :  { %6645 = shalt.err (!%p6642_p7)
}
  0x10   :  { %s6673_s19 = smov 128   ;;  %s6674_s20 = smov 8  }
  0x11   :  { %22 = dma.hbm_to_vmem [thread:$0]  %s7156_s1, 11264, %s17_s10, [#allocation4], %s6673_s19, %s6673_s19, %s6674_s20  }
  0x12   :  { %6668 = dma.done.wait [#allocation4], 11264  }
  0x13   :  { %6669 = vsyncadd [#allocation4], 4294956032  ;;  %vm122_vm0 = vcmask 130048   ;;  %vm40_vm1 = vcmask 64512   ;;  %v35_v0 = vld [vmem:[%s7155_s0] sm:$0xff]  ;;  %v36_v1 = vld [vmem:[%s7155_s0 + $0x8] sm:$0xff] }
  0x14   :  { %v6725_v2 = vld [vmem:[#allocation3 + $0x228] sm:$0xff]  ;;  %v6111_v3 = vpack.c.bf16 %v36_v1, %v35_v0  ;;  %s6675_s27 = smov 124   ;;  %v37_v4 = vld [vmem:[#allocation3] sm:$0xff]  ;;  %5701 = vmatprep.mubr.msk.f32.mxu0 %vm40_vm1, %v35_v0  ;;  %vm213_vm2 = vcmask 1043456   ;;  %v6730_v6 = vld [vmem:[#allocation3 + $0x230] sm:$0xff]  ;;  %vm206_vm3 = vcmask 31744  }
  0x15   :  { %5708 = vmatprep.mubr.msk.f32.mxu1 %vm122_vm0, %v6725_v2  ;;  %291 = vrot.lane.b32.xlu0 %v35_v0, %s6675_s27  ;;  %v205_v5 = vrot.slane %v37_v4, 4  ;;  %v378_v17 = vld [vmem:[#allocation3 + $0x258] sm:$0xff]  ;;  %v379_v24 = vld [vmem:[#allocation3 + $0x260] sm:$0xff]  ;;  %v376_v25 = vld [vmem:[#allocation3 + $0x248] sm:$0xff]  ;;  %vm1356_vm4 = vcmask 125952   ;;  %vm26_vm5 = vcmask 97280  }
  0x16   :  { %5699 = vmatprep.subr.mxu0 %v37_v4  ;;  %6112 = vmatprep.subr.bf16.mxu1 %v6111_v3  ;;  %v377_v26 = vld [vmem:[#allocation3 + $0x250] sm:$0xff]  ;;  %v766_v27 = vld [vmem:[#allocation3 + $0x18] sm:$0xff]  ;;  %v767_v28 = vld [vmem:[#allocation3 + $0x20] sm:$0xff]  ;;  %vm6676_vm6 = vmmov 1   ;;  %vm1580_vm8 = vcmask 261120   ;;  %vm1941_vm9 = vcmask 257024  }
  0x17   :  { %5700 = vmatpush3.msra.mxu0 %v37_v4  ;;  %6114 = vmatpush3.bf16.msra.mxu1 %v6111_v3  ;;  %v6139_v29 = vpack.c.bf16 %v767_v28, %v766_v27  ;;  %v764_v30 = vld [vmem:[#allocation3 + $0x8] sm:$0xff]  ;;  %v765_v31 = vld [vmem:[#allocation3 + $0x10] sm:$0xff]  ;;  %v5327_v47 = vld [vmem:[#allocation3 + $0x2a0] ss:$0 sm:$0xff]  ;;  %s6677_s0 = smov 88   ;;  %s6678_s1 = smov 96  }
  0x18   :  { %5702 = vmatmul.mubr.msk.f32.vlgmr.msra.gmra.mrb[0].mxu0 %vm40_vm1, %v36_v1  ;;  %5711 = vmatprep.subr.msk.mxu0 %vm213_vm2, %v205_v5  ;;  %v6759_v32 = vpack.c.bf16 %v765_v31, %v764_v30  ;;  %v5328_v51 = vld [vmem:[#allocation3 + $0x2a1] ss:$0 sm:$0xff]  ;;  %v769_v30 = vld [vmem:[#allocation3 + $0x30] sm:$0xff]  ;;  %vm6792_vm7 = vmpackc.low %vm213_vm2, %vm6676_vm6  ;;  %s6679_s28 = smov 112   ;;  %s6680_s29 = smov 80   ;;  %vm2160_vm11 = vcmask 93184  }
  0x19   :  { %293 = vrot.lane.b32.xlu0 %v36_v1, %s6675_s27  ;;  %5712 = vmatpush3.msk.msra.mxu0 %vm213_vm2, %v205_v5  ;;  %s6681_s30 = smov 104   ;;  %s6682_s3 = smov 120   ;;  %vm6865_vm10 = vmpackc.low %vm40_vm1, %vm40_vm1  ;;  %vm3393_vm12 = vcmask 523264   ;;  %vm6690_vm13 = vmmov 0   ;;  %vm5292_vm14 = vcmask 33792  }
  0x1a   :  { %5709 = vmatmul.mubr.msk.f32.vlgmr.msra.gmra.mrb[0].mxu1 %vm122_vm0, %v6730_v6  ;;  %5716 = vmatprep.subr.msk.mxu0 %vm213_vm2, %v37_v4  ;;  %s6683_s4 = smov 72   ;;  %s6685_s5 = smov 64  }
  0x1b   :  { %5725 = vmatprep.mubr.msk.f32.mxu1 %vm122_vm0, %v378_v17  ;;  %s6686_s6 = smov 48   ;;  %s6687_s7 = smov 40  }
  0x1c   :  { %s6688_s8 = smov 56   ;;  %s6691_s9 = smov [#allocation6]  }
  0x1d   :  { %s5300_s10 = sshll.u32 %s6691_s9, 4  ;;  %s5301_s10 = int_to_ptr.vmem [resolvable:$true] %s5300_s10 }
  0x1e   :  { %s6646_s11 = scalar_lea.vmem %s5301_s10, 32  ;;  %p6651_p9 = scmp.lt.s32.totalorder %s5301_s10, %s5301_s10 }
  0x1f   :  { %p6647_p8 = scmp.ne.s32.totalorder %s5301_s10, %s6646_s11  ;;  %p6652_p10 = scmp.lt.s32.totalorder %s6646_s11, %s6646_s11 }
  0x21   :  { %p6653_p11 = por %p6652_p10, %p6651_p9 }
  0x23   :  { %p6654_p12 = pnand %p6653_p11, %p6647_p8 }
  0x87   :  { %v292_v12 = vpop.permute.xlu0 %291 }
  0x8b   :  { %v294_v13 = vpop.permute.xlu0 %293 }
  0xeb   :  { %v6738_v7 = vpop.f32.mrb[0].mxu0 }
  0xec   :  { %v6740_v8 = vpop.f32.mrb[1].mxu0  ;;  %v543_v14 = vmul.f32 %v6738_v7, %v6738_v7 }
  0xed   :  { %v6119_v9 = vpack.c.bf16 %v6738_v7, %v6740_v8  ;;  %v5710_v10 = vpop.f32.mrb[0].mxu1  ;;  %v542_v15 = vmul.f32 %v6740_v8, %v6740_v8 }
  0xee   :  { %v195_v11 = vpop.f32.mrb[1].mxu1 }
  0xef   :  { %5713 = vmatprep.mubr.msk.f32.mxu0 %vm206_vm3, %v195_v11  ;;  %v6127_v16 = vpack.c.bf16 %v543_v14, %v542_v15 }
  0xf0   :  { %5714 = vmatmul.mubr.msk.f32.vlgmr.msra.gmra.mrb[2].mxu0 %vm206_vm3, %v5710_v10 }
  0xf1   :  { %5717 = vmatpush3.msk.msra.mxu0 %vm213_vm2, %v37_v4  ;;  %5718 = vmatprep.mubr.msk.f32.mxu0 %vm206_vm3, %v292_v12 }
  0xf8   :  { %5719 = vmatmul.mubr.msk.f32.vlgmr.msra.gmra.mrb[2].mxu0 %vm206_vm3, %v294_v13 }
  0xf9   :  { %5739 = vmatprep.mubr.msk.f32.mxu0 %vm122_vm0, %v378_v17 }
 0x1cb   :  { %v5720_v18 = vpop.f32.mrb[2].mxu0 }
 0x1cc   :  { %v545_v19 = vmul.f32 %v5720_v18, %v5720_v18  ;;  %v367_v20 = vpop.f32.mrb[3].mxu0 }
 0x1cd   :  { %v6115_v21 = vpack.c.bf16 %v5720_v18, %v367_v20  ;;  %v544_v22 = vmul.f32 %v367_v20, %v367_v20 }
 0x1cf   :  { %6116 = vmatprep.subr.bf16.mxu1 %v6115_v21  ;;  %v6123_v23 = vpack.c.bf16 %v545_v19, %v544_v22 }
 0x1d0   :  { %6118 = vmatpush3.bf16.msra.mxu1 %v6115_v21 }
 0x1d1   :  { %6120 = vmatprep.subr.bf16.mxu1 %v6119_v9  ;;  %6124 = vmatprep.subr.bf16.mxu0 %v6123_v23 }
 0x1d2   :  { %6126 = vmatpush3.bf16.msra.mxu0 %v6123_v23 }
 0x1d3   :  { %5726 = vmatmul.mubr.msk.f32.vlgmr.msra.gmra.mrb[2].mxu1 %vm122_vm0, %v379_v24  ;;  %6128 = vmatprep.subr.bf16.mxu0 %v6127_v16 }
 0x1d4   :  { %6122 = vmatpush3.bf16.msra.mxu1 %v6119_v9  ;;  %5732 = vmatprep.mubr.msk.f32.mxu1 %vm122_vm0, %v376_v25 }
 0x1d5   :  { %5740 = vmatmul.mubr.msk.f32.vlgmr.msra.gmra.mrb[4].mxu0 %vm122_vm0, %v379_v24 }
 0x1d6   :  { %6130 = vmatpush3.bf16.msra.mxu0 %v6127_v16  ;;  %5746 = vmatprep.mubr.msk.f32.mxu0 %vm122_vm0, %v376_v25 }
 0x1d7   :  { %6140 = vmatprep.subr.bf16.mxu0 %v6139_v29 }
 0x1db   :  { %5733 = vmatmul.mubr.msk.f32.vlgmr.msra.gmra.mrb[2].mxu1 %vm122_vm0, %v377_v26 }
 0x1dc   :  { %5753 = vmatprep.mubr.msk.f32.mxu1 %vm122_vm0, %v6725_v2 }
 0x1dd   :  { %5747 = vmatmul.mubr.msk.f32.vlgmr.msra.gmra.mrb[4].mxu0 %vm122_vm0, %v377_v26 }
 0x1de   :  { %6142 = vmatpush3.bf16.msra.mxu0 %v6139_v29  ;;  %v768_v29 = vld [vmem:[#allocation3 + $0x28] sm:$0xff] }
 0x1df   :  { %6144 = vmatprep.subr.bf16.mxu0 %v6759_v32 }
 0x2ae   :  { %v5734_v33 = vpop.f32.mrb[2].mxu1 }
 0x2af   :  { %v713_v34 = vsub.f32 %v6738_v7, %v5734_v33  ;;  %v741_v35 = vsub.f32 %v5720_v18, %v5734_v33  ;;  %v533_v36 = vpop.f32.mrb[3].mxu1  ;;  %v697_v37 = vmul.f32 %v5734_v33, %v5734_v33 }
 0x2b0   :  { %v712_v38 = vsub.f32 %v6740_v8, %v533_v36  ;;  %v740_v39 = vsub.f32 %v367_v20, %v533_v36  ;;  %v5748_v40 = vpop.f32.mrb[4].mxu0  ;;  %v696_v41 = vmul.f32 %v533_v36, %v533_v36 }
 0x2b1   :  { %v699_v42 = vsub.f32 %v5748_v40, %v697_v37  ;;  %v687_v43 = vpop.f32.mrb[5].mxu0  ;;  %v6147_v37 = vpack.c.bf16 %v769_v30, %v768_v29  ;;  %v5343_v30 = vld [vmem:[#allocation3 + $0x2a2] ss:$0 sm:$0xff] }
 0x2b2   :  { %v698_v44 = vsub.f32 %v687_v43, %v696_v41  ;;  %v770_v41 = vld [vmem:[#allocation3 + $0x38] sm:$0xff] }
 0x2b3   :  { %v701_v45 = vadd.f32 1e-05, %v699_v42  ;;  %v771_v42 = vld [vmem:[#allocation3 + $0x40] sm:$0xff] }
 0x2b4   :  { %v700_v46 = vadd.f32 1e-05, %v698_v44 }
 0x2b5   :  { %6506 = vrsqrt.f32 %v701_v45 }
 0x2b6   :  { %6508 = vrsqrt.f32 %v700_v46 }
 0x2bf   :  { %v6507_v48 = vpop.eup %6506 }
 0x2c0   :  { %v6509_v49 = vpop.eup %6508  ;;  %v710_v50 = vmul.f32 %v6507_v48, %v5327_v47 }
 0x2c1   :  { %v709_v52 = vmul.f32 %v6509_v49, %v5327_v47  ;;  %v1251_v49 = vld [vmem:[#allocation3 + $0x240] sm:$0xf] }
 0x2c2   :  { %v715_v53 = vmul.f32 %v713_v34, %v710_v50  ;;  %v743_v54 = vmul.f32 %v741_v35, %v710_v50 }
 0x2c3   :  { %v714_v55 = vmul.f32 %v712_v38, %v709_v52  ;;  %v742_v56 = vmul.f32 %v740_v39, %v709_v52 }
 0x2c4   :  { %v745_v57 = vadd.f32 %v5328_v51, %v743_v54  ;;  %v721_v58 = vadd.f32 %v5328_v51, %v715_v53 }
 0x2c5   :  { %v744_v59 = vadd.f32 %v5328_v51, %v742_v56  ;;  %v720_v60 = vadd.f32 %v5328_v51, %v714_v55 }
 0x2c6   :  { %v747_v61 = vmul.f32 %v745_v57, %v745_v57  ;;  %v723_v62 = vmul.f32 %v721_v58, %v721_v58 }
 0x2c7   :  { %v746_v63 = vmul.f32 %v744_v59, %v744_v59  ;;  %v722_v0 = vmul.f32 %v720_v60, %v720_v60 }
 0x2c8   :  { %v749_v1 = vmul.f32 %v747_v61, %v745_v57  ;;  %v725_v3 = vmul.f32 %v723_v62, %v721_v58 }
 0x2c9   :  { %v748_v4 = vmul.f32 %v746_v63, %v744_v59  ;;  %v724_v5 = vmul.f32 %v722_v0, %v720_v60 }
 0x2ca   :  { %v751_v7 = vmul.f32 0.044715, %v749_v1  ;;  %v727_v8 = vmul.f32 0.044715, %v725_v3 }
 0x2cb   :  { %v750_v9 = vmul.f32 0.044715, %v748_v4  ;;  %v726_v10 = vmul.f32 0.044715, %v724_v5 }
 0x2cc   :  { %v753_v11 = vadd.f32 %v751_v7, %v745_v57  ;;  %v729_v12 = vadd.f32 %v727_v8, %v721_v58 }
 0x2cd   :  { %v752_v13 = vadd.f32 %v750_v9, %v744_v59  ;;  %v728_v14 = vadd.f32 %v726_v10, %v720_v60 }
 0x2ce   :  { %v755_v15 = vmul.f32 0.7978846, %v753_v11  ;;  %v731_v18 = vmul.f32 0.7978846, %v729_v12 }
 0x2cf   :  { %v754_v16 = vmul.f32 0.7978846, %v752_v13  ;;  %v730_v17 = vmul.f32 0.7978846, %v728_v14 }
 0x2d0   :  { %6510 = vtanh.f32 %v755_v15 }
 0x2d1   :  { %6512 = vtanh.f32 %v754_v16 }
 0x2d2   :  { %6514 = vtanh.f32 %v730_v17 }
 0x2d3   :  { %6516 = vtanh.f32 %v731_v18 }
 0x2da   :  { %v6511_v19 = vpop.eup %6510 }
 0x2db   :  { %v6513_v20 = vpop.eup %6512  ;;  %v759_v21 = vadd.f32 1.0, %v6511_v19 }
 0x2dc   :  { %v6515_v22 = vpop.eup %6514  ;;  %v758_v23 = vadd.f32 1.0, %v6513_v20  ;;  %v1393_v20 = vld [vmem:[#allocation3 + $0x48] sm:$0xff] }
 0x2dd   :  { %v6517_v24 = vpop.eup %6516  ;;  %v761_v25 = vmul.f32 0.5, %v759_v21  ;;  %v734_v26 = vadd.f32 1.0, %v6515_v22  ;;  %v1394_v21 = vld [vmem:[#allocation3 + $0x50] sm:$0xff] }
 0x2de   :  { %v760_v27 = vmul.f32 0.5, %v758_v23  ;;  %v735_v28 = vadd.f32 1.0, %v6517_v24  ;;  %v6159_v22 = vpack.c.bf16 %v1394_v21, %v1393_v20 }
 0x2df   :  { %v763_v31 = vmul.f32 %v761_v25, %v745_v57  ;;  %v736_v33 = vmul.f32 0.5, %v734_v26 }
 0x2e0   :  { %v762_v34 = vmul.f32 %v760_v27, %v744_v59  ;;  %v737_v35 = vmul.f32 0.5, %v735_v28 }
 0x2e1   :  { %v738_v36 = vmul.f32 %v736_v33, %v720_v60  ;;  %v5344_v33 = vld [vmem:[#allocation3 + $0x2a3] ss:$0 sm:$0xff] }
 0x2e2   :  { %5767 = vmatprep.mubr.msk.f32.mxu0 %vm122_vm0, %v762_v34  ;;  %v739_v38 = vmul.f32 %v737_v35, %v721_v58  ;;  %v6135_v39 = vpack.c.bf16 %v763_v31, %v762_v34 }
 0x2e3   :  { %5768 = vmatmul.mubr.msk.f32.vlgmr.msra.gmra.mrb[6].mxu0 %vm122_vm0, %v763_v31 }
 0x2e4   :  { %v6131_v40 = vpack.c.bf16 %v739_v38, %v738_v36  ;;  %5774 = vmatprep.mubr.msk.f32.mxu0 %vm122_vm0, %v738_v36  ;;  %6146 = vmatpush3.bf16.msra.mxu0 %v6759_v32  ;;  %v6151_v32 = vpack.c.bf16 %v771_v42, %v770_v41  ;;  %v1750_v41 = vld [vmem:[#allocation3 + $0x278] sm:$0xff]  ;;  %v5345_v42 = vld [vmem:[#allocation3 + $0x2a4] ss:$0 sm:$0xff] }
 0x2e5   :  { %6148 = vmatprep.subr.bf16.mxu0 %v6147_v37 }
 0x2e6   :  { %6132 = vmatprep.subr.bf16.mxu1 %v6131_v40 }
 0x2e7   :  { %6134 = vmatpush3.bf16.msra.mxu1 %v6131_v40  ;;  %v1494_v40 = vld [vmem:[#allocation3 + $0x268] sm:$0xff] }
 0x2e8   :  { %6136 = vmatprep.subr.bf16.mxu1 %v6135_v39 }
 0x2ea   :  { %5754 = vmatmul.mubr.msk.f32.vlgmr.msra.gmra.mrb[4].mxu1 %vm122_vm0, %v6730_v6 }
 0x2eb   :  { %6138 = vmatpush3.bf16.msra.mxu1 %v6135_v39  ;;  %5775 = vmatmul.mubr.msk.f32.vlgmr.msra.gmra.mrb[6].mxu0 %vm122_vm0, %v739_v38 }
 0x2ec   :  { %5760 = vmatprep.mubr.msk.f32.mxu1 %vm122_vm0, %v6725_v2  ;;  %6150 = vmatpush3.bf16.msra.mxu0 %v6147_v37  ;;  %v1250_v2 = vld [vmem:[#allocation3 + $0x238] sm:$0xff] }
 0x2ed   :  { %6152 = vmatprep.subr.bf16.mxu0 %v6151_v32 }
 0x2ee   :  { %5761 = vmatmul.mubr.msk.f32.vlgmr.msra.gmra.mrb[6].mxu1 %vm122_vm0, %v6730_v6 }
 0x2ef   :  { %5795 = vmatprep.mubr.msk.f32.mxu1 %vm122_vm0, %v1250_v2 }
 0x3bd   :  { %v5755_v43 = vpop.f32.mrb[4].mxu1 }
 0x3be   :  { %v838_v44 = vpop.f32.mrb[5].mxu1 }
 0x3bf   :  { %5781 = vmatprep.mubr.msk.f32.mxu0 %vm122_vm0, %v838_v44 }
 0x3c0   :  { %5782 = vmatmul.mubr.msk.f32.vlgmr.msra.gmra.mrb[6].mxu0 %vm122_vm0, %v5755_v43 }
 0x3c1   :  { %6154 = vmatpush3.bf16.msra.mxu0 %v6151_v32  ;;  %v5762_v45 = vpop.f32.mrb[6].mxu1 }
 0x3c2   :  { %v913_v46 = vpop.f32.mrb[7].mxu1 }
 0x3c3   :  { %5788 = vmatprep.mubr.msk.f32.mxu0 %vm122_vm0, %v913_v46  ;;  %v1482_v46 = vld [vmem:[#allocation3 + $0x60] sm:$0xff] }
 0x3c8   :  { %5789 = vmatmul.mubr.msk.f32.vlgmr.msra.gmra.mrb[6].mxu0 %vm122_vm0, %v5762_v45  ;;  %v1481_v45 = vld [vmem:[#allocation3 + $0x58] sm:$0xff] }
 0x3c9   :  { %5838 = vmatprep.mubr.msk.f32.mxu0 %vm26_vm5, %v1750_v41 }
 0x49b   :  { %v5790_v6 = vpop.f32.mrb[6].mxu0 }
 0x49c   :  { %v1239_v47 = vpop.f32.mrb[7].mxu0 }
 0x49d   :  { %v6155_v48 = vpack.c.bf16 %v5790_v6, %v1239_v47  ;;  %v5212_v6 = vld [vmem:[#allocation3 + $0x218] sm:$0xff] }
 0x49f   :  { %6156 = vmatprep.subr.bf16.mxu1 %v6155_v48 }
 0x4a0   :  { %6158 = vmatpush3.bf16.msra.mxu1 %v6155_v48  ;;  %v6169_v48 = vpack.c.bf16 %v1482_v46, %v1481_v45  ;;  %v1981_v46 = vld [vmem:[#allocation3 + $0xc0] sm:$0xff] }
 0x4a1   :  { %6160 = vmatprep.subr.bf16.mxu1 %v6159_v22 }
 0x4a3   :  { %5796 = vmatmul.mubr.msk.f32.vlgmr.msra.gmra.mrb[8].mxu1 %vm122_vm0, %v1251_v49  ;;  %v1483_v49 = vld [vmem:[#allocation3 + $0x68] sm:$0xff] }
 0x4a4   :  { %6162 = vmatpush3.bf16.msra.mxu1 %v6159_v22 }
 0x576   :  { %v5797_v50 = vpop.f32.mrb[8].mxu1 }
 0x577   :  { %v1334_v51 = vmul.f32 %v5797_v50, %v5797_v50  ;;  %v1324_v52 = vpop.f32.mrb[9].mxu1 }
 0x578   :  { %v1333_v53 = vmul.f32 %v1324_v52, %v1324_v52 }
 0x579   :  { %v1336_v54 = vmul.f32 %v5797_v50, %v1334_v51  ;;  %v1495_v51 = vld [vmem:[#allocation3 + $0x270] sm:$0xf] }
 0x57a   :  { %v1335_v55 = vmul.f32 %v1333_v53, %v1324_v52 }
 0x57b   :  { %v1338_v56 = vmul.f32 0.044715, %v1336_v54  ;;  %v1485_v54 = vld [vmem:[#allocation3 + $0x78] sm:$0xff] }
 0x57c   :  { %v1337_v57 = vmul.f32 0.044715, %v1335_v55  ;;  %v1486_v55 = vld [vmem:[#allocation3 + $0x80] sm:$0xff] }
 0x57d   :  { %v1340_v58 = vadd.f32 %v5797_v50, %v1338_v56  ;;  %v6177_v56 = vpack.c.bf16 %v1486_v55, %v1485_v54 }
 0x57e   :  { %v1339_v59 = vadd.f32 %v1337_v57, %v1324_v52  ;;  %v1487_v57 = vld [vmem:[#allocation3 + $0x88] sm:$0xff] }
 0x57f   :  { %v1342_v60 = vmul.f32 0.7978846, %v1340_v58  ;;  %v1488_v58 = vld [vmem:[#allocation3 + $0x90] sm:$0xff] }
 0x580   :  { %v1341_v61 = vmul.f32 0.7978846, %v1339_v59 }
 0x581   :  { %6518 = vtanh.f32 %v1342_v60 }
 0x582   :  { %6520 = vtanh.f32 %v1341_v61 }
 0x58b   :  { %v6519_v62 = vpop.eup %6518 }
 0x58c   :  { %v6521_v63 = vpop.eup %6520  ;;  %v1346_v0 = vadd.f32 1.0, %v6519_v62  ;;  %v6181_v62 = vpack.c.bf16 %v1488_v58, %v1487_v57  ;;  %v5361_v57 = vld [vmem:[#allocation3 + $0x2a6] ss:$0 sm:$0xff] }
 0x58d   :  { %v1345_v1 = vadd.f32 1.0, %v6521_v63 }
 0x58e   :  { %v1348_v4 = vmul.f32 0.5, %v1346_v0  ;;  %v1489_v0 = vld [vmem:[#allocation3 + $0x98] sm:$0xff] }
 0x58f   :  { %v1347_v3 = vmul.f32 0.5, %v1345_v1  ;;  %v1490_v1 = vld [vmem:[#allocation3 + $0xa0] sm:$0xff] }
 0x590   :  { %v1350_v8 = vmul.f32 %v5797_v50, %v1348_v4  ;;  %v1484_v50 = vld [vmem:[#allocation3 + $0x70] sm:$0xff]  ;;  %v1491_v4 = vld [vmem:[#allocation3 + $0xa8] sm:$0xff] }
 0x591   :  { %v1349_v5 = vmul.f32 %v1347_v3, %v1324_v52  ;;  %v1751_v52 = vld [vmem:[#allocation3 + $0x280] sm:$0xf]  ;;  %v6173_v53 = vpack.c.bf16 %v1484_v50, %v1483_v49  ;;  %v6191_v3 = vpack.c.bf16 %v1490_v1, %v1489_v0 }
 0x592   :  { %v1357_v9 = vsel %vm1356_vm4, %v1350_v8, 0.0 }
 0x593   :  { %v1353_v7 = vsel %vm122_vm0, %v1349_v5, 0.0 }
 0x594   :  { %1354 = vadd.xlane.f32.xlu1 %v1353_v7 }
 0x598   :  { %1358 = vadd.xlane.f32.xlu1 %v1357_v9 }
 0x621   :  { %v1355_v10 = vpop.xlane.xlu1 %1354 }
 0x622   :  { %v1361_v11 = vmul.f32 0.0625, %v1355_v10 }
 0x624   :  { %v1363_v12 = vsub.f32 %v1349_v5, %v1361_v11  ;;  %v1492_v5 = vld [vmem:[#allocation3 + $0xb0] sm:$0xff] }
 0x625   :  { %v1359_v13 = vpop.xlane.xlu1 %1358  ;;  %v6195_v7 = vpack.c.bf16 %v1492_v5, %v1491_v4 }
 0x626   :  { %v1362_v14 = vmul.f32 0.0625, %v1359_v13  ;;  %v1365_v15 = vmul.f32 %v1363_v12, %v1363_v12 }
 0x628   :  { %v1364_v16 = vsub.f32 %v1350_v8, %v1362_v14  ;;  %v1367_v17 = vsel %vm122_vm0, %v1365_v15, 0.0  ;;  %v5353_v8 = vld [vmem:[#allocation3 + $0x2a5] ss:$0 sm:$0xff] }
 0x629   :  { %1368 = vadd.xlane.f32.xlu0 %v1367_v17 }
 0x62a   :  { %v1366_v18 = vmul.f32 %v1364_v16, %v1364_v16 }
 0x62c   :  { %v1370_v19 = vsel %vm1356_vm4, %v1366_v18, 0.0 }
 0x62d   :  { %1371 = vadd.xlane.f32.xlu1 %v1370_v19 }
 0x6b6   :  { %v1369_v23 = vpop.xlane.xlu0 %1368 }
 0x6b7   :  { %v1373_v24 = vmul.f32 0.0625, %v1369_v23 }
 0x6b9   :  { %v1375_v25 = vadd.f32 1e-05, %v1373_v24 }
 0x6ba   :  { %v1372_v26 = vpop.xlane.xlu1 %1371 }
 0x6bb   :  { %6522 = vrsqrt.f32 %v1375_v25  ;;  %v1374_v27 = vmul.f32 0.0625, %v1372_v26 }
 0x6bd   :  { %v1376_v28 = vadd.f32 1e-05, %v1374_v27 }
 0x6bf   :  { %6524 = vrsqrt.f32 %v1376_v28 }
 0x6c5   :  { %v6523_v29 = vpop.eup %6522 }
 0x6c6   :  { %v1379_v31 = vmul.f32 %v6523_v29, %v1363_v12 }
 0x6c8   :  { %v1385_v34 = vmul.f32 %v5343_v30, %v1379_v31 }
 0x6c9   :  { %v6525_v35 = vpop.eup %6524 }
 0x6ca   :  { %v1380_v36 = vmul.f32 %v6525_v35, %v1364_v16  ;;  %v1391_v37 = vadd.f32 %v5344_v33, %v1385_v34 }
 0x6cc   :  { %v1386_v38 = vmul.f32 %v5343_v30, %v1380_v36  ;;  %5802 = vmatprep.mubr.msk.f32.mxu1 %vm122_vm0, %v1391_v37 }
 0x6ce   :  { %v1392_v39 = vadd.f32 %v5344_v33, %v1386_v38 }
 0x6d0   :  { %5803 = vmatmul.mubr.msk.f32.vlgmr.msra.gmra.mrb[10].mxu1 %vm122_vm0, %v1392_v39 }
 0x6d1   :  { %5809 = vmatprep.mubr.msk.f32.mxu1 %vm26_vm5, %v1494_v40 }
 0x7a3   :  { %v5804_v32 = vpop.f32.mrb[10].mxu1 }
 0x7a4   :  { %v6787_v43 = vadd.f32 %v5804_v32, %v5345_v42  ;;  %v1472_v44 = vpop.f32.mrb[11].mxu1 }
 0x7a5   :  { %v6789_v2 = vadd.f32 %v5345_v42, %v1472_v44 }
 0x7a7   :  { %v6163_v47 = vpack.c.bf16 %v6787_v43, %v6789_v2 }
 0x7a9   :  { %6165 = vmatprep.subr.msk.bf16.mxu1 %vm6792_vm7, %v6163_v47  ;;  %6187 = vmatprep.subr.msk.bf16.mxu0 %vm6792_vm7, %v6163_v47 }
 0x7aa   :  { %6168 = vmatpush3.bf16.msk.msra.mxu1 %vm6792_vm7, %v6163_v47  ;;  %6190 = vmatpush3.bf16.msk.msra.mxu0 %vm6792_vm7, %v6163_v47  ;;  %v1982_v47 = vld [vmem:[#allocation3 + $0xc8] sm:$0xff] }
 0x7ab   :  { %6170 = vmatprep.subr.bf16.mxu1 %v6169_v48 }
 0x7ad   :  { %5810 = vmatmul.mubr.msk.f32.vlgmr.msra.gmra.mrb[12].mxu1 %vm26_vm5, %v1495_v51  ;;  %5839 = vmatmul.mubr.msk.f32.vlgmr.msra.gmra.mrb[8].mxu0 %vm26_vm5, %v1751_v52 }
 0x7ae   :  { %6172 = vmatpush3.bf16.msra.mxu1 %v6169_v48  ;;  %v1983_v48 = vld [vmem:[#allocation3 + $0xd0] sm:$0xff] }
 0x7af   :  { %6174 = vmatprep.subr.bf16.mxu1 %v6173_v53  ;;  %v6203_v49 = vpack.c.bf16 %v1983_v48, %v1982_v47 }
 0x7b2   :  { %6176 = vmatpush3.bf16.msra.mxu1 %v6173_v53 }
 0x7b3   :  { %6178 = vmatprep.subr.bf16.mxu1 %v6177_v56 }
 0x880   :  { %v5811_v59 = vpop.f32.mrb[12].mxu1  ;;  %v5840_v60 = vpop.f32.mrb[8].mxu0 }
 0x881   :  { %v1571_v61 = vpop.f32.mrb[13].mxu1  ;;  %v1824_v63 = vpop.f32.mrb[9].mxu0 }
 0x882   :  { %5820 = vmatprep.mubr.msk.f32.mxu1 %vm1580_vm8, %v1571_v61 }
 0x883   :  { %5821 = vmatmul.mubr.msk.f32.vlgmr.msra.gmra.mrb[14].mxu1 %vm1580_vm8, %v5811_v59  ;;  %v5362_v59 = vld [vmem:[#allocation3 + $0x2a7] ss:$0 sm:$0xff] }
 0x884   :  { %6180 = vmatpush3.bf16.msra.mxu1 %v6177_v56  ;;  %5831 = vmatprep.mubr.msk.f32.mxu1 %vm1580_vm8, %v6789_v2 }
 0x885   :  { %6182 = vmatprep.subr.bf16.mxu1 %v6181_v62 }
 0x888   :  { %6184 = vmatpush3.bf16.msra.mxu1 %v6181_v62 }
 0x889   :  { %6192 = vmatprep.subr.bf16.mxu1 %v6191_v3 }
 0x88b   :  { %5832 = vmatmul.mubr.msk.f32.vlgmr.msra.gmra.mrb[14].mxu1 %vm1580_vm8, %v6787_v43 }
 0x88c   :  { %6194 = vmatpush3.bf16.msra.mxu1 %v6191_v3  ;;  %5849 = vmatprep.mubr.msk.f32.mxu1 %vm1580_vm8, %v1824_v63  ;;  %v5363_v3 = vld [vmem:[#allocation3 + $0x2a8] ss:$0 sm:$0xff] }
 0x88d   :  { %6196 = vmatprep.subr.bf16.mxu1 %v6195_v7 }
 0x890   :  { %6198 = vmatpush3.bf16.msra.mxu1 %v6195_v7 }
 0x893   :  { %5850 = vmatmul.mubr.msk.f32.vlgmr.msra.gmra.mrb[14].mxu1 %vm1580_vm8, %v5840_v60 }
 0x966   :  { %v5851_v9 = vpop.f32.mrb[14].mxu1 }
 0x967   :  { %v6372_v10 = vadd.f32 %v5851_v9, %v5353_v8  ;;  %v1905_v11 = vpop.f32.mrb[15].mxu1 }
 0x968   :  { %v6373_v12 = vadd.f32 %v5353_v8, %v1905_v11 }
 0x969   :  { %v1917_v13 = vmul.f32 %v6372_v10, %v6372_v10 }
 0x96a   :  { %v1916_v14 = vmul.f32 %v6373_v12, %v6373_v12 }
 0x96b   :  { %v1919_v15 = vmul.f32 %v6372_v10, %v1917_v13 }
 0x96c   :  { %v1918_v16 = vmul.f32 %v6373_v12, %v1916_v14 }
 0x96d   :  { %v1921_v17 = vmul.f32 0.044715, %v1919_v15 }
 0x96e   :  { %v1920_v18 = vmul.f32 0.044715, %v1918_v16 }
 0x96f   :  { %v1923_v19 = vadd.f32 %v6372_v10, %v1921_v17 }
 0x970   :  { %v1922_v20 = vadd.f32 %v6373_v12, %v1920_v18 }
 0x971   :  { %v1925_v21 = vmul.f32 0.7978846, %v1923_v19 }
 0x972   :  { %v1924_v22 = vmul.f32 0.7978846, %v1922_v20 }
 0x973   :  { %6526 = vtanh.f32 %v1925_v21 }
 0x974   :  { %6528 = vtanh.f32 %v1924_v22 }
 0x97d   :  { %v6527_v23 = vpop.eup %6526 }
 0x97e   :  { %v6529_v24 = vpop.eup %6528  ;;  %v1929_v25 = vadd.f32 1.0, %v6527_v23 }
 0x97f   :  { %v1928_v26 = vadd.f32 1.0, %v6529_v24 }
 0x980   :  { %v1931_v27 = vmul.f32 0.5, %v1929_v25 }
 0x981   :  { %v1930_v28 = vmul.f32 0.5, %v1928_v26 }
 0x982   :  { %v1933_v30 = vmul.f32 %v6372_v10, %v1931_v27  ;;  %v6684_v10 = vmov 0.0  }
 0x983   :  { %v1932_v29 = vmul.f32 %v6373_v12, %v1930_v28  ;;  %28 = vst.msk [vmem:[#allocation2 + $0x8] sm:$0xff] %vm26_vm5, %v6684_v10  ;;  %27 = vst.msk [vmem:[#allocation2] sm:$0xff] %vm26_vm5, %v6684_v10 }
 0x984   :  { %v1935_v34 = vadd.f32 %v1933_v30, %v6787_v43  ;;  %v1980_v43 = vld [vmem:[#allocation3 + $0xb8] sm:$0xff]  ;;  %29 = vst.msk [vmem:[#allocation2 + $0x10] sm:$0xff] %vm26_vm5, %v6684_v10  ;;  %30 = vst.msk [vmem:[#allocation2 + $0x18] sm:$0xff] %vm26_vm5, %v6684_v10 }
 0x985   :  { %v1934_v31 = vadd.f32 %v1932_v29, %v6789_v2  ;;  %v6199_v2 = vpack.c.bf16 %v1981_v46, %v1980_v43  ;;  %31 = vst.msk [vmem:[#allocation2 + $0x20] sm:$0xff] %vm26_vm5, %v6684_v10  ;;  %32 = vst.msk [vmem:[#allocation2 + $0x28] sm:$0xff] %vm26_vm5, %v6684_v10 }
 0x986   :  { %v1942_v35 = vsel %vm1941_vm9, %v1935_v34, 0.0  ;;  %33 = vst.msk [vmem:[#allocation2 + $0x30] sm:$0xff] %vm26_vm5, %v6684_v10  ;;  %34 = vst.msk [vmem:[#allocation2 + $0x38] sm:$0xff] %vm26_vm5, %v6684_v10 }
 0x987   :  { %v1938_v33 = vsel %vm1580_vm8, %v1934_v31, 0.0  ;;  %6200 = vmatprep.subr.bf16.mxu0 %v6199_v2 }
 0x988   :  { %1939 = vadd.xlane.f32.xlu1 %v1938_v33  ;;  %6202 = vmatpush3.bf16.msra.mxu0 %v6199_v2 }
 0x989   :  { %6204 = vmatprep.subr.bf16.mxu0 %v6203_v49 }
 0x98c   :  { %1943 = vadd.xlane.f32.xlu1 %v1942_v35  ;;  %6206 = vmatpush3.bf16.msra.mxu0 %v6203_v49  ;;  %v6892_v35 = vld [vmem:[#allocation3 + $0x290] sm:$0xf] }
 0xa15   :  { %v1940_v36 = vpop.xlane.xlu1 %1939 }
 0xa16   :  { %v1946_v37 = vmul.f32 0.03125, %v1940_v36  ;;  %v6894_v36 = vld [vmem:[#allocation3 + $0x288] sm:$0xff] }
 0xa18   :  { %v1948_v38 = vsub.f32 %v1934_v31, %v1946_v37 }
 0xa19   :  { %v1944_v39 = vpop.xlane.xlu1 %1943 }
 0xa1a   :  { %v1947_v40 = vmul.f32 0.03125, %v1944_v39  ;;  %v1950_v41 = vmul.f32 %v1948_v38, %v1948_v38 }
 0xa1c   :  { %v1949_v42 = vsub.f32 %v1935_v34, %v1947_v40  ;;  %v1952_v32 = vsel %vm1580_vm8, %v1950_v41, 0.0 }
 0xa1d   :  { %1953 = vadd.xlane.f32.xlu1 %v1952_v32 }
 0xa1e   :  { %v1951_v44 = vmul.f32 %v1949_v42, %v1949_v42 }
 0xa20   :  { %v1955_v45 = vsel %vm1941_vm9, %v1951_v44, 0.0 }
 0xa21   :  { %1956 = vadd.xlane.f32.xlu1 %v1955_v45 }
 0xaaa   :  { %v1954_v50 = vpop.xlane.xlu1 %1953 }
 0xaab   :  { %v1958_v51 = vmul.f32 0.03125, %v1954_v50 }
 0xaad   :  { %v1960_v52 = vadd.f32 1e-05, %v1958_v51 }
 0xaae   :  { %v1957_v53 = vpop.xlane.xlu1 %1956 }
 0xaaf   :  { %6530 = vrsqrt.f32 %v1960_v52  ;;  %v1959_v54 = vmul.f32 0.03125, %v1957_v53 }
 0xab1   :  { %v1961_v55 = vadd.f32 1e-05, %v1959_v54 }
 0xab3   :  { %6532 = vrsqrt.f32 %v1961_v55 }
 0xab9   :  { %v6531_v56 = vpop.eup %6530 }
 0xaba   :  { %v1964_v58 = vmul.f32 %v6531_v56, %v1948_v38 }
 0xabc   :  { %v1970_v60 = vmul.f32 %v5361_v57, %v1964_v58 }
 0xabd   :  { %v6533_v61 = vpop.eup %6532 }
 0xabe   :  { %v1965_v62 = vmul.f32 %v6533_v61, %v1949_v42  ;;  %v6822_v63 = vadd.f32 %v5362_v59, %v1970_v60 }
 0xac0   :  { %v1971_v0 = vmul.f32 %v5361_v57, %v1965_v62  ;;  %5860 = vmatprep.mubr.msk.f32.mxu0 %vm1580_vm8, %v6822_v63 }
 0xac2   :  { %v6826_v1 = vadd.f32 %v5362_v59, %v1971_v0 }
 0xac4   :  { %5861 = vmatmul.mubr.msk.f32.vlgmr.msra.gmra.mrb[10].mxu0 %vm1580_vm8, %v6826_v1 }
 0xb97   :  { %v5862_v4 = vpop.f32.mrb[10].mxu0 }
 0xb98   :  { %v2067_v5 = vadd.f32 %v5862_v4, %v5363_v3  ;;  %v2061_v7 = vpop.f32.mrb[11].mxu0 }
 0xb99   :  { %v2062_v8 = vadd.f32 %v5363_v3, %v2061_v7 }
 0xb9b   :  { %5867 = vmatprep.mubr.msk.f32.mxu0 %vm40_vm1, %v2062_v8  ;;  %v6831_v9 = vpack.i.bf16 %v2067_v5, %v2062_v8 }
 0xb9d   :  { %6432 = vrot.lane.b32.xlu0 %v6831_v9, %s6677_s0  ;;  %6427 = vrot.lane.b32.xlu1 %v6831_v9, %s6678_s1 }
 0xba1   :  { %2255 = vrot.lane.b32.xlu0 %v2062_v8, %s6679_s28  ;;  %6437 = vrot.lane.b32.xlu1 %v6831_v9, %s6680_s29 }
 0xba5   :  { %2348 = vrot.lane.b32.xlu0 %v2062_v8, %s6681_s30  ;;  %2162 = vrot.lane.b32.xlu1 %v2062_v8, %s6682_s3 }
 0xba9   :  { %2164 = vrot.lane.b32.xlu1 %v2067_v5, %s6682_s3 }
 0xbad   :  { %6442 = vrot.lane.b32.xlu1 %v6831_v9, %s6683_s4 }
 0xbb1   :  { %2257 = vrot.lane.b32.xlu1 %v2067_v5, %s6679_s28 }
 0xbb5   :  { %2350 = vrot.lane.b32.xlu1 %v2067_v5, %s6681_s30 }
 0xc0f   :  { %v6433_v11 = vpop.permute.xlu0 %6432  ;;  %v6428_v12 = vpop.permute.xlu1 %6427 }
 0xc10   :  { %v6435_v13 = vunpack.i.h.bf16 %v6433_v11  ;;  %v6434_v14 = vunpack.i.l.bf16 %v6433_v11  ;;  %v6430_v15 = vunpack.i.h.bf16 %v6428_v12  ;;  %v6429_v16 = vunpack.i.l.bf16 %v6428_v12 }
 0xc12   :  { %v6207_v18 = vpack.c.bf16 %v6430_v15, %v6429_v16  ;;  %v6213_v21 = vpack.c.bf16 %v6435_v13, %v6434_v14 }
 0xc13   :  { %v2256_v19 = vpop.permute.xlu0 %2255  ;;  %v6438_v20 = vpop.permute.xlu1 %6437 }
 0xc14   :  { %v6440_v22 = vunpack.i.h.bf16 %v6438_v20  ;;  %v6439_v23 = vunpack.i.l.bf16 %v6438_v20  ;;  %6209 = vmatprep.subr.msk.bf16.mxu0 %vm6865_vm10, %v6207_v18  ;;  %5881 = vmatprep.mubr.msk.f32.mxu1 %vm40_vm1, %v2256_v19 }
 0xc15   :  { %6212 = vmatpush3.bf16.xpose.msk.msra.mxu0 %vm6865_vm10, %v6207_v18 }
 0xc16   :  { %v6219_v24 = vpack.c.bf16 %v6440_v22, %v6439_v23  ;;  %6215 = vmatprep.subr.msk.bf16.mxu0 %vm6865_vm10, %v6213_v21 }
 0xc17   :  { %v2163_v25 = vpop.permute.xlu1 %2162  ;;  %v2349_v33 = vpop.permute.xlu0 %2348 }
 0xc18   :  { %6221 = vmatprep.subr.msk.bf16.mxu1 %vm6865_vm10, %v6219_v24 }
 0xc19   :  { %6224 = vmatpush3.bf16.xpose.msk.msra.mxu1 %vm6865_vm10, %v6219_v24 }
 0xc1b   :  { %v2165_v26 = vpop.permute.xlu1 %2164 }
 0xc1c   :  { %5868 = vmatmul.mubr.msk.f32.vlgmr.msra.gmra.mrb[12].mxu0 %vm40_vm1, %v2067_v5 }
 0xc1d   :  { %6218 = vmatpush3.bf16.xpose.msk.msra.mxu0 %vm6865_vm10, %v6213_v21  ;;  %5874 = vmatprep.mubr.msk.f32.mxu0 %vm40_vm1, %v2163_v25 }
 0xc1f   :  { %v6443_v27 = vpop.permute.xlu1 %6442 }
 0xc20   :  { %v6445_v28 = vunpack.i.h.bf16 %v6443_v27  ;;  %v6444_v29 = vunpack.i.l.bf16 %v6443_v27 }
 0xc22   :  { %v6225_v30 = vpack.c.bf16 %v6445_v28, %v6444_v29 }
 0xc23   :  { %v2258_v31 = vpop.permute.xlu1 %2257 }
 0xc24   :  { %5875 = vmatmul.mubr.msk.f32.vlgmr.msra.gmra.mrb[14].mxu0 %vm40_vm1, %v2165_v26  ;;  %5882 = vmatmul.mubr.msk.f32.vlgmr.msra.gmra.mrb[16].mxu1 %vm40_vm1, %v2258_v31 }
 0xc25   :  { %6227 = vmatprep.subr.msk.bf16.mxu0 %vm6865_vm10, %v6225_v30  ;;  %5888 = vmatprep.mubr.msk.f32.mxu0 %vm40_vm1, %v2349_v33 }
 0xc26   :  { %6230 = vmatpush3.bf16.xpose.msk.msra.mxu0 %vm6865_vm10, %v6225_v30 }
 0xc27   :  { %v2351_v34 = vpop.permute.xlu1 %2350 }
 0xc2d   :  { %5889 = vmatmul.mubr.msk.f32.vlgmr.msra.gmra.mrb[16].mxu0 %vm40_vm1, %v2351_v34 }
 0xcef   :  { %v5869_v37 = vpop.f32.mrb[12].mxu0 }
 0xcf0   :  { %v2156_v38 = vadd.f32 %v5869_v37, %v6892_v35  ;;  %v2150_v39 = vpop.f32.mrb[13].mxu0 }
 0xcf1   :  { %v2151_v40 = vadd.f32 %v2150_v39, %v6894_v36 }
 0xcf2   :  { %2161 = vst.msk [vmem:[#allocation2 + $0x8] sm:$0xf] %vm2160_vm11, %v2156_v38 }
 0xcf3   :  { %2159 = vst.msk [vmem:[#allocation2] sm:$0xff] %vm26_vm5, %v2151_v40 }
 0xcf7   :  { %v5876_v41 = vpop.f32.mrb[14].mxu0  ;;  %v5883_v42 = vpop.f32.mrb[16].mxu1 }
 0xcf8   :  { %v2250_v32 = vadd.f32 %v5876_v41, %v6892_v35  ;;  %v2343_v44 = vadd.f32 %v5883_v42, %v6892_v35  ;;  %v2244_v45 = vpop.f32.mrb[15].mxu0  ;;  %v2337_v43 = vpop.f32.mrb[17].mxu1 }
 0xcf9   :  { %v2245_v46 = vadd.f32 %v2244_v45, %v6894_v36  ;;  %v2338_v2 = vadd.f32 %v2337_v43, %v6894_v36  ;;  %v2442_v47 = vld [vmem:[#allocation2 + $0x8] sm:$0xff] }
 0xcfa   :  { %2254 = vst.msk [vmem:[#allocation2 + $0x18] sm:$0xf] %vm2160_vm11, %v2250_v32  ;;  %2347 = vst.msk [vmem:[#allocation2 + $0x28] sm:$0xf] %vm2160_vm11, %v2343_v44  ;;  %v2452_v48 = vsel %vm26_vm5, %v2442_v47, -inf  ;;  %v2441_v49 = vld [vmem:[#allocation2] sm:$0xff] }
 0xcfb   :  { %2253 = vst.msk [vmem:[#allocation2 + $0x10] sm:$0xff] %vm26_vm5, %v2245_v46  ;;  %2346 = vst.msk [vmem:[#allocation2 + $0x20] sm:$0xff] %vm26_vm5, %v2338_v2  ;;  %2453 = vmax.xlane.f32.xlu1 %v2452_v48  ;;  %v2449_v50 = vsel %vm26_vm5, %v2441_v49, -inf }
 0xcfc   :  { %2450 = vmax.xlane.f32.xlu0 %v2449_v50 }
 0xd00   :  { %v5890_v51 = vpop.f32.mrb[16].mxu0 }
 0xd01   :  { %v2436_v52 = vadd.f32 %v5890_v51, %v6892_v35  ;;  %v2430_v53 = vpop.f32.mrb[17].mxu0  ;;  %v2444_v59 = vld [vmem:[#allocation2 + $0x18] sm:$0xff]  ;;  %v2446_v61 = vld [vmem:[#allocation2 + $0x28] sm:$0xff] }
 0xd02   :  { %v2431_v54 = vadd.f32 %v2430_v53, %v6894_v36  ;;  %v2445_v55 = vld [vmem:[#allocation2 + $0x20] sm:$0xff]  ;;  %v2443_v56 = vld [vmem:[#allocation2 + $0x10] sm:$0xff]  ;;  %v2458_v60 = vsel %vm26_vm5, %v2444_v59, -inf  ;;  %v2464_v0 = vsel %vm26_vm5, %v2446_v61, -inf }
 0xd03   :  { %2440 = vst.msk [vmem:[#allocation2 + $0x38] sm:$0xf] %vm2160_vm11, %v2436_v52  ;;  %v2461_v57 = vsel %vm26_vm5, %v2445_v55, -inf  ;;  %v2455_v58 = vsel %vm26_vm5, %v2443_v56, -inf }
 0xd04   :  { %2439 = vst.msk [vmem:[#allocation2 + $0x30] sm:$0xff] %vm26_vm5, %v2431_v54  ;;  %2462 = vmax.xlane.f32.xlu1 %v2461_v57  ;;  %2456 = vmax.xlane.f32.xlu0 %v2455_v58 }
 0xd08   :  { %2459 = vmax.xlane.f32.xlu0 %v2458_v60 }
 0xd0a   :  { %v2448_v4 = vld [vmem:[#allocation2 + $0x38] sm:$0xff] }
 0xd0b   :  { %v2447_v62 = vld [vmem:[#allocation2 + $0x30] sm:$0xff]  ;;  %v2470_v5 = vsel %vm26_vm5, %v2448_v4, -inf }
 0xd0c   :  { %v2467_v3 = vsel %vm26_vm5, %v2447_v62, -inf  ;;  %2465 = vmax.xlane.f32.xlu0 %v2464_v0 }
 0xd0d   :  { %2468 = vmax.xlane.f32.xlu1 %v2467_v3 }
 0xd10   :  { %2471 = vmax.xlane.f32.xlu0 %v2470_v5 }
 0xd1e   :  { %6447 = vrot.lane.b32.xlu1 %v6831_v9, %s6685_s5 }
 0xd88   :  { %v2454_v7 = vpop.xlane.xlu1 %2453 }
 0xd89   :  { %v2474_v8 = vsub.f32 %v2442_v47, %v2454_v7  ;;  %v2451_v11 = vpop.xlane.xlu0 %2450 }
 0xd8a   :  { %v2473_v12 = vsub.f32 %v2441_v49, %v2451_v11 }
 0xd8b   :  { %v2483_v13 = vmul.f32 1.442695, %v2474_v8 }
 0xd8c   :  { %v2481_v14 = vmul.f32 1.442695, %v2473_v12 }
 0xd8d   :  { %6534 = vpow2.f32 %v2483_v13 }
 0xd8e   :  { %6536 = vpow2.f32 %v2481_v14 }
 0xd91   :  { %v2463_v15 = vpop.xlane.xlu1 %2462  ;;  %v2457_v16 = vpop.xlane.xlu0 %2456 }
 0xd92   :  { %v2477_v18 = vsub.f32 %v2445_v55, %v2463_v15  ;;  %v2475_v19 = vsub.f32 %v2443_v56, %v2457_v16 }
 0xd94   :  { %v2489_v20 = vmul.f32 1.442695, %v2477_v18  ;;  %v2485_v21 = vmul.f32 1.442695, %v2475_v19 }
 0xd95   :  { %v2460_v22 = vpop.xlane.xlu0 %2459 }
 0xd96   :  { %6538 = vpow2.f32 %v2489_v20  ;;  %v2476_v25 = vsub.f32 %v2444_v59, %v2460_v22 }
 0xd97   :  { %v6535_v23 = vpop.eup %6534  ;;  %6540 = vpow2.f32 %v2485_v21 }
 0xd98   :  { %v6537_v24 = vpop.eup %6536  ;;  %v2500_v26 = vsel %vm26_vm5, %v6535_v23, 0.0  ;;  %v2487_v31 = vmul.f32 1.442695, %v2476_v25 }
 0xd99   :  { %2501 = vadd.xlane.f32.xlu0 %v2500_v26  ;;  %v2466_v27 = vpop.xlane.xlu0 %2465  ;;  %v2497_v28 = vsel %vm26_vm5, %v6537_v24, 0.0 }
 0xd9a   :  { %v2469_v29 = vpop.xlane.xlu1 %2468  ;;  %v2478_v30 = vsub.f32 %v2446_v61, %v2466_v27  ;;  %2498 = vadd.xlane.f32.xlu1 %v2497_v28 }
 0xd9b   :  { %v2479_v42 = vsub.f32 %v2447_v62, %v2469_v29 }
 0xd9c   :  { %v2491_v33 = vmul.f32 1.442695, %v2478_v30 }
 0xd9d   :  { %v2472_v34 = vpop.xlane.xlu0 %2471  ;;  %v2493_v46 = vmul.f32 1.442695, %v2479_v42 }
 0xd9e   :  { %6542 = vpow2.f32 %v2491_v33  ;;  %v6448_v37 = vpop.permute.xlu1 %6447  ;;  %v2480_v38 = vsub.f32 %v2448_v4, %v2472_v34  ;;  %v2537_v34 = vld [vmem:[#allocation3 + $0xd8] sm:$0xff] }
 0xd9f   :  { %v6450_v39 = vunpack.i.h.bf16 %v6448_v37  ;;  %v6449_v40 = vunpack.i.l.bf16 %v6448_v37  ;;  %6544 = vpow2.f32 %v2487_v31  ;;  %v2538_v37 = vld [vmem:[#allocation3 + $0xe0] sm:$0xff] }
 0xda0   :  { %v6924_v41 = vpop.eup %6538  ;;  %v2495_v32 = vmul.f32 1.442695, %v2480_v38 }
 0xda1   :  { %v6231_v44 = vpack.c.bf16 %v6450_v39, %v6449_v40  ;;  %v2509_v45 = vsel %vm26_vm5, %v6924_v41, 0.0  ;;  %v6541_v43 = vpop.eup %6540  ;;  %v2539_v40 = vld [vmem:[#allocation3 + $0xe8] sm:$0xff] }
 0xda2   :  { %2510 = vadd.xlane.f32.xlu1 %v2509_v45  ;;  %6546 = vpow2.f32 %v2495_v32  ;;  %v2503_v2 = vsel %vm26_vm5, %v6541_v43, 0.0  ;;  %v2540_v32 = vld [vmem:[#allocation3 + $0xf0] sm:$0xff] }
 0xda3   :  { %6233 = vmatprep.subr.msk.bf16.mxu1 %vm6792_vm7, %v6231_v44  ;;  %6548 = vpow2.f32 %v2493_v46 }
 0xda4   :  { %6236 = vmatpush3.bf16.msk.msra.mxu1 %vm6792_vm7, %v6231_v44 }
 0xda5   :  { %5898 = vmatprep.subr.mxu1 %v2537_v34 }
 0xda6   :  { %2504 = vadd.xlane.f32.xlu1 %v2503_v2  ;;  %v5387_v2 = vld [vmem:[#allocation3 + $0x2a9] ss:$0 sm:$0xff] }
 0xda8   :  { %v6933_v47 = vpop.eup %6542 }
 0xda9   :  { %v2512_v48 = vsel %vm26_vm5, %v6933_v47, 0.0  ;;  %v6545_v49 = vpop.eup %6544 }
 0xdaa   :  { %2513 = vadd.xlane.f32.xlu0 %v2512_v48  ;;  %v2506_v50 = vsel %vm26_vm5, %v6545_v49, 0.0 }
 0xdac   :  { %v6938_v51 = vpop.eup %6546 }
 0xdad   :  { %v2518_v52 = vsel %vm26_vm5, %v6938_v51, 0.0  ;;  %v6549_v53 = vpop.eup %6548 }
 0xdae   :  { %2507 = vadd.xlane.f32.xlu0 %v2506_v50  ;;  %v2515_v54 = vsel %vm26_vm5, %v6549_v53, 0.0 }
 0xdb2   :  { %2519 = vadd.xlane.f32.xlu0 %v2518_v52 }
 0xdb6   :  { %2516 = vadd.xlane.f32.xlu0 %v2515_v54 }
 0xdb7   :  { %6457 = vrot.lane.b32.xlu1 %v6831_v9, %s6686_s6 }
 0xdbb   :  { %6462 = vrot.lane.b32.xlu1 %v6831_v9, %s6687_s7 }
 0xdcc   :  { %6452 = vrot.lane.b32.xlu0 %v6831_v9, %s6688_s8 }
 0xe26   :  { %v2502_v55 = vpop.xlane.xlu0 %2501 }
 0xe27   :  { %6550 = vrcp.f32 %v2502_v55  ;;  %v2499_v56 = vpop.xlane.xlu1 %2498 }
 0xe28   :  { %6552 = vrcp.f32 %v2499_v56 }
 0xe2f   :  { %v2511_v57 = vpop.xlane.xlu1 %2510 }
 0xe31   :  { %v6551_v58 = vpop.eup %6550 }
 0xe32   :  { %v6553_v59 = vpop.eup %6552  ;;  %v2530_v62 = vmul.f32 %v6551_v58, %v6535_v23 }
 0xe33   :  { %v2505_v60 = vpop.xlane.xlu1 %2504  ;;  %v2529_v61 = vmul.f32 %v6553_v59, %v6537_v24 }
 0xe34   :  { %6554 = vrcp.f32 %v2505_v60 }
 0xe35   :  { %5895 = vmatprep.mubr.msk.f32.mxu1 %vm26_vm5, %v2529_v61 }
 0xe36   :  { %5896 = vmatmul.mubr.msk.f32.vlgmr.msra.gmra.mrb[18].mxu1 %vm26_vm5, %v2530_v62 }
 0xe37   :  { %v2514_v0 = vpop.xlane.xlu0 %2513  ;;  %v6458_v7 = vpop.permute.xlu1 %6457  ;;  %5899 = vmatpush3.msra.mxu1 %v2537_v34  ;;  %v3384_v34 = vld [vmem:[#allocation3 + $0x138] sm:$0xff] }
 0xe38   :  { %v6460_v12 = vunpack.i.h.bf16 %v6458_v7  ;;  %v6459_v13 = vunpack.i.l.bf16 %v6458_v7  ;;  %5910 = vmatprep.subr.mxu1 %v2538_v37 }
 0xe3a   :  { %v6243_v21 = vpack.c.bf16 %v6460_v12, %v6459_v13 }
 0xe3b   :  { %v2508_v3 = vpop.xlane.xlu0 %2507  ;;  %v6463_v16 = vpop.permute.xlu1 %6462 }
 0xe3c   :  { %6556 = vrcp.f32 %v2508_v3  ;;  %v6465_v22 = vunpack.i.h.bf16 %v6463_v16  ;;  %v6464_v23 = vunpack.i.l.bf16 %v6463_v16  ;;  %v3273_v3 = vld [vmem:[#allocation3 + $0x100] sm:$0xff] }
 0xe3d   :  { %6558 = vrcp.f32 %v2511_v57 }
 0xe3e   :  { %v6555_v4 = vpop.eup %6554  ;;  %6560 = vrcp.f32 %v2514_v0  ;;  %v6249_v28 = vpack.c.bf16 %v6465_v22, %v6464_v23  ;;  %v5404_v22 = vld [vmem:[#allocation3 + $0x2ab] ss:$0 sm:$0xff] }
 0xe3f   :  { %v2520_v5 = vpop.xlane.xlu0 %2519  ;;  %v2531_v9 = vmul.f32 %v6555_v4, %v6541_v43 }
 0xe41   :  { %5907 = vmatprep.mubr.msk.f32.mxu0 %vm26_vm5, %v2531_v9  ;;  %v3275_v9 = vld [vmem:[#allocation3 + $0x110] sm:$0xff] }
 0xe43   :  { %v2517_v8 = vpop.xlane.xlu0 %2516 }
 0xe44   :  { %6562 = vrcp.f32 %v2517_v8 }
 0xe45   :  { %6564 = vrcp.f32 %v2520_v5  ;;  %v3274_v5 = vld [vmem:[#allocation3 + $0x108] sm:$0xff] }
 0xe46   :  { %v6557_v19 = vpop.eup %6556  ;;  %v6259_v7 = vpack.c.bf16 %v3275_v9, %v3274_v5 }
 0xe47   :  { %v6453_v11 = vpop.permute.xlu0 %6452  ;;  %v6559_v20 = vpop.eup %6558  ;;  %v2532_v24 = vmul.f32 %v6557_v19, %v6545_v49 }
 0xe48   :  { %v6455_v14 = vunpack.i.h.bf16 %v6453_v11  ;;  %v6454_v15 = vunpack.i.l.bf16 %v6453_v11  ;;  %v6561_v25 = vpop.eup %6560  ;;  %v2533_v26 = vmul.f32 %v6559_v20, %v6924_v41 }
 0xe49   :  { %v2534_v29 = vmul.f32 %v6561_v25, %v6933_v47 }
 0xe4a   :  { %v6237_v18 = vpack.c.bf16 %v6455_v14, %v6454_v15 }
 0xe4c   :  { %6239 = vmatprep.subr.msk.bf16.mxu0 %vm6792_vm7, %v6237_v18 }
 0xe4d   :  { %6242 = vmatpush3.bf16.msk.msra.mxu0 %vm6792_vm7, %v6237_v18  ;;  %v5403_v18 = vld [vmem:[#allocation3 + $0x2aa] ss:$0 sm:$0xff] }
 0xe4e   :  { %6245 = vmatprep.subr.msk.bf16.mxu0 %vm6792_vm7, %v6243_v21  ;;  %v6563_v27 = vpop.eup %6562 }
 0xe4f   :  { %v6565_v30 = vpop.eup %6564  ;;  %v2535_v31 = vmul.f32 %v6563_v27, %v6549_v53  ;;  %v3380_v27 = vld [vmem:[#allocation3 + $0x118] sm:$0xff] }
 0xe50   :  { %5908 = vmatmul.mubr.msk.f32.vlgmr.msra.gmra.mrb[18].mxu0 %vm26_vm5, %v2532_v24  ;;  %v2536_v33 = vmul.f32 %v6565_v30, %v6938_v51  ;;  %v3382_v30 = vld [vmem:[#allocation3 + $0x128] sm:$0xff] }
 0xe51   :  { %6248 = vmatpush3.bf16.msk.msra.mxu0 %vm6792_vm7, %v6243_v21  ;;  %5919 = vmatprep.mubr.msk.f32.mxu0 %vm26_vm5, %v2533_v26 }
 0xe52   :  { %6251 = vmatprep.subr.msk.bf16.mxu0 %vm6792_vm7, %v6249_v28 }
 0xe54   :  { %5920 = vmatmul.mubr.msk.f32.vlgmr.msra.gmra.mrb[20].mxu0 %vm26_vm5, %v2534_v29 }
 0xe55   :  { %6254 = vmatpush3.bf16.msk.msra.mxu0 %vm6792_vm7, %v6249_v28  ;;  %5931 = vmatprep.mubr.msk.f32.mxu0 %vm26_vm5, %v2535_v31  ;;  %v3381_v28 = vld [vmem:[#allocation3 + $0x120] sm:$0xff]  ;;  %v3383_v31 = vld [vmem:[#allocation3 + $0x130] sm:$0xff] }
 0xe56   :  { %v6263_v29 = vpack.c.bf16 %v3381_v28, %v3380_v27 }
 0xe58   :  { %5932 = vmatmul.mubr.msk.f32.vlgmr.msra.gmra.mrb[22].mxu0 %vm26_vm5, %v2536_v33  ;;  %v6267_v33 = vpack.c.bf16 %v3383_v31, %v3382_v30 }
 0xf09   :  { %v5897_v38 = vpop.f32.mrb[18].mxu1 }
 0xf0a   :  { %v2621_v39 = vpop.f32.mrb[19].mxu1 }
 0xf0b   :  { %5900 = vmatprep.mubr.msk.f32.mxu1 %vm40_vm1, %v2621_v39  ;;  %v3386_v39 = vld [vmem:[#allocation3 + $0x148] sm:$0xff] }
 0xf0c   :  { %5901 = vmatmul.mubr.msk.f32.vlgmr.msra.gmra.mrb[20].mxu1 %vm40_vm1, %v5897_v38 }
 0xf0d   :  { %5911 = vmatpush3.msra.mxu1 %v2538_v37  ;;  %v3385_v37 = vld [vmem:[#allocation3 + $0x140] sm:$0xff] }
 0xf0e   :  { %5922 = vmatprep.subr.mxu1 %v2539_v40  ;;  %v6271_v38 = vpack.c.bf16 %v3385_v37, %v3384_v34 }
 0xf23   :  { %v5909_v41 = vpop.f32.mrb[18].mxu0 }
 0xf24   :  { %v2796_v42 = vpop.f32.mrb[19].mxu0 }
 0xf25   :  { %5912 = vmatprep.mubr.msk.f32.mxu1 %vm40_vm1, %v2796_v42  ;;  %v5405_v42 = vld [vmem:[#allocation3 + $0x2ac] ss:$0 sm:$0xff] }
 0xf26   :  { %5913 = vmatmul.mubr.msk.f32.vlgmr.msra.gmra.mrb[20].mxu1 %vm40_vm1, %v5909_v41 }
 0xf27   :  { %v5921_v44 = vpop.f32.mrb[20].mxu0  ;;  %5923 = vmatpush3.msra.mxu1 %v2539_v40  ;;  %v3387_v40 = vld [vmem:[#allocation3 + $0x150] sm:$0xff] }
 0xf28   :  { %v2967_v45 = vpop.f32.mrb[21].mxu0  ;;  %5934 = vmatprep.subr.mxu1 %v2540_v32  ;;  %v6275_v41 = vpack.c.bf16 %v3387_v40, %v3386_v39 }
 0xf29   :  { %5924 = vmatprep.mubr.msk.f32.mxu1 %vm40_vm1, %v2967_v45 }
 0xf2b   :  { %v5933_v43 = vpop.f32.mrb[22].mxu0 }
 0xf2c   :  { %v3138_v46 = vpop.f32.mrb[23].mxu0 }
 0xf2e   :  { %5925 = vmatmul.mubr.msk.f32.vlgmr.msra.gmra.mrb[20].mxu1 %vm40_vm1, %v5921_v44 }
 0xf2f   :  { %5935 = vmatpush3.msra.mxu1 %v2540_v32  ;;  %5936 = vmatprep.mubr.msk.f32.mxu1 %vm40_vm1, %v3138_v46 }
 0xf30   :  { %6264 = vmatprep.subr.bf16.mxu1 %v6263_v29 }
 0xf36   :  { %5937 = vmatmul.mubr.msk.f32.vlgmr.msra.gmra.mrb[20].mxu1 %vm40_vm1, %v5933_v43 }
 0xf37   :  { %6266 = vmatpush3.bf16.msra.mxu1 %v6263_v29 }
 0xf38   :  { %6268 = vmatprep.subr.bf16.mxu1 %v6267_v33 }
 0xf3b   :  { %6270 = vmatpush3.bf16.msra.mxu1 %v6267_v33 }
 0xf3c   :  { %6272 = vmatprep.subr.bf16.mxu1 %v6271_v38 }
 0xf3f   :  { %6274 = vmatpush3.bf16.msra.mxu1 %v6271_v38  ;;  %v5411_v38 = vld [vmem:[#allocation3 + $0x2ae] ss:$0 sm:$0xff] }
 0xf40   :  { %6276 = vmatprep.subr.bf16.mxu1 %v6275_v41 }
 0xf43   :  { %6278 = vmatpush3.bf16.msra.mxu1 %v6275_v41 }
0x1009   :  { %v5938_v47 = vpop.f32.mrb[20].mxu1 }
0x100a   :  { %v6374_v48 = vadd.f32 %v5938_v47, %v5387_v2  ;;  %v3219_v49 = vpop.f32.mrb[21].mxu1 }
0x100b   :  { %v6375_v50 = vadd.f32 %v5387_v2, %v3219_v49 }
0x100c   :  { %v3231_v51 = vadd.f32 %v6374_v48, %v6826_v1 }
0x100d   :  { %v3230_v52 = vadd.f32 %v6375_v50, %v6822_v63  ;;  %v3272_v63 = vld [vmem:[#allocation3 + $0xf8] sm:$0xff] }
0x100e   :  { %v3237_v53 = vsel %vm1941_vm9, %v3231_v51, 0.0  ;;  %v6255_v4 = vpack.c.bf16 %v3273_v3, %v3272_v63 }
0x100f   :  { %3238 = vadd.xlane.f32.xlu0 %v3237_v53  ;;  %v3234_v54 = vsel %vm1580_vm8, %v3230_v52, 0.0 }
0x1010   :  { %3235 = vadd.xlane.f32.xlu1 %v3234_v54  ;;  %6256 = vmatprep.subr.bf16.mxu0 %v6255_v4 }
0x1011   :  { %6258 = vmatpush3.bf16.msra.mxu0 %v6255_v4 }
0x1012   :  { %6260 = vmatprep.subr.bf16.mxu0 %v6259_v7 }
0x1015   :  { %6262 = vmatpush3.bf16.msra.mxu0 %v6259_v7 }
0x109c   :  { %v3239_v55 = vpop.xlane.xlu0 %3238 }
0x109d   :  { %v3241_v56 = vmul.f32 0.03125, %v3239_v55  ;;  %v3236_v57 = vpop.xlane.xlu1 %3235 }
0x109e   :  { %v3240_v58 = vmul.f32 0.03125, %v3236_v57 }
0x109f   :  { %v3243_v59 = vsub.f32 %v3231_v51, %v3241_v56 }
0x10a0   :  { %v3242_v60 = vsub.f32 %v3230_v52, %v3240_v58 }
0x10a1   :  { %v3245_v61 = vmul.f32 %v3243_v59, %v3243_v59 }
0x10a2   :  { %v3244_v62 = vmul.f32 %v3242_v60, %v3242_v60 }
0x10a3   :  { %v3249_v0 = vsel %vm1941_vm9, %v3245_v61, 0.0 }
0x10a4   :  { %3250 = vadd.xlane.f32.xlu0 %v3249_v0  ;;  %v3246_v1 = vsel %vm1580_vm8, %v3244_v62, 0.0  ;;  %v5408_v0 = vld [vmem:[#allocation3 + $0x2ad] ss:$0 sm:$0xff] }
0x10a5   :  { %3247 = vadd.xlane.f32.xlu1 %v3246_v1 }
0x1131   :  { %v3251_v8 = vpop.xlane.xlu0 %3250 }
0x1132   :  { %v3253_v11 = vmul.f32 0.03125, %v3251_v8  ;;  %v3248_v12 = vpop.xlane.xlu1 %3247 }
0x1133   :  { %v3252_v13 = vmul.f32 0.03125, %v3248_v12 }
0x1134   :  { %v3255_v14 = vadd.f32 1e-05, %v3253_v11 }
0x1135   :  { %v3254_v15 = vadd.f32 1e-05, %v3252_v13 }
0x1136   :  { %6566 = vrsqrt.f32 %v3255_v14 }
0x1137   :  { %6568 = vrsqrt.f32 %v3254_v15 }
0x1140   :  { %v6567_v16 = vpop.eup %6566 }
0x1141   :  { %v6569_v19 = vpop.eup %6568  ;;  %v3259_v20 = vmul.f32 %v6567_v16, %v3243_v59 }
0x1142   :  { %v3258_v21 = vmul.f32 %v6569_v19, %v3242_v60 }
0x1143   :  { %v3265_v23 = vmul.f32 %v5403_v18, %v3259_v20 }
0x1144   :  { %v3264_v24 = vmul.f32 %v5403_v18, %v3258_v21 }
0x1145   :  { %v3271_v26 = vadd.f32 %v5404_v22, %v3265_v23  ;;  %v3518_v23 = vld [vmem:[#allocation3 + $0x160] sm:$0xff] }
0x1146   :  { %v3270_v25 = vadd.f32 %v5404_v22, %v3264_v24  ;;  %v3517_v22 = vld [vmem:[#allocation3 + $0x158] sm:$0xff] }
0x1147   :  { %v6279_v24 = vpack.c.bf16 %v3518_v23, %v3517_v22 }
0x1148   :  { %5947 = vmatprep.mubr.msk.f32.mxu0 %vm1580_vm8, %v3270_v25 }
0x1149   :  { %5948 = vmatmul.mubr.msk.f32.vlgmr.msra.gmra.mrb[24].mxu0 %vm1580_vm8, %v3271_v26  ;;  %6280 = vmatprep.subr.bf16.mxu0 %v6279_v24 }
0x114a   :  { %6282 = vmatpush3.bf16.msra.mxu0 %v6279_v24 }
0x121c   :  { %v5949_v32 = vpop.f32.mrb[24].mxu0 }
0x121d   :  { %v3359_v44 = vadd.f32 %v5949_v32, %v5405_v42  ;;  %v3353_v45 = vpop.f32.mrb[25].mxu0 }
0x121e   :  { %v3354_v43 = vadd.f32 %v5405_v42, %v3353_v45  ;;  %v5412_v42 = vld [vmem:[#allocation3 + $0x2af] ss:$0 sm:$0xff] }
0x121f   :  { %v3363_v46 = vmul.f32 %v3359_v44, %v3359_v44 }
0x1220   :  { %v3362_v2 = vmul.f32 %v3354_v43, %v3354_v43 }
0x1221   :  { %v3365_v47 = vmul.f32 %v3363_v46, %v3359_v44  ;;  %v5413_v46 = vld [vmem:[#allocation3 + $0x2b0] ss:$0 sm:$0xff] }
0x1222   :  { %v3364_v48 = vmul.f32 %v3362_v2, %v3354_v43 }
0x1223   :  { %v3367_v49 = vmul.f32 0.044715, %v3365_v47 }
0x1224   :  { %v3366_v50 = vmul.f32 0.044715, %v3364_v48 }
0x1225   :  { %v3369_v51 = vadd.f32 %v3367_v49, %v3359_v44 }
0x1226   :  { %v3368_v52 = vadd.f32 %v3366_v50, %v3354_v43 }
0x1227   :  { %v3371_v53 = vmul.f32 0.7978846, %v3369_v51 }
0x1228   :  { %v3370_v54 = vmul.f32 0.7978846, %v3368_v52 }
0x1229   :  { %6570 = vtanh.f32 %v3371_v53 }
0x122a   :  { %6572 = vtanh.f32 %v3370_v54 }
0x1233   :  { %v6571_v55 = vpop.eup %6570 }
0x1234   :  { %v6573_v56 = vpop.eup %6572  ;;  %v3375_v57 = vadd.f32 1.0, %v6571_v55 }
0x1235   :  { %v3374_v58 = vadd.f32 1.0, %v6573_v56 }
0x1236   :  { %v3377_v59 = vmul.f32 0.5, %v3375_v57 }
0x1237   :  { %v3376_v60 = vmul.f32 0.5, %v3374_v58 }
0x1238   :  { %v3379_v62 = vmul.f32 %v3377_v59, %v3359_v44 }
0x1239   :  { %v3378_v61 = vmul.f32 %v3376_v60, %v3354_v43 }
0x123b   :  { %5966 = vmatprep.mubr.msk.f32.mxu1 %vm3393_vm12, %v3378_v61 }
0x123c   :  { %5967 = vmatmul.mubr.msk.f32.vlgmr.msra.gmra.mrb[22].mxu1 %vm3393_vm12, %v3379_v62 }
0x130f   :  { %v5968_v1 = vpop.f32.mrb[22].mxu1 }
0x1310   :  { %v3472_v63 = vadd.f32 %v5968_v1, %v5408_v0  ;;  %v3466_v3 = vpop.f32.mrb[23].mxu1 }
0x1311   :  { %v3467_v4 = vadd.f32 %v5408_v0, %v3466_v3 }
0x1312   :  { %v3476_v5 = vadd.f32 %v3472_v63, %v3271_v26  ;;  %v3520_v26 = vld [vmem:[#allocation3 + $0x170] sm:$0xff] }
0x1313   :  { %v3475_v9 = vadd.f32 %v3467_v4, %v3270_v25  ;;  %v3519_v25 = vld [vmem:[#allocation3 + $0x168] sm:$0xff] }
0x1314   :  { %v3482_v7 = vsel %vm1941_vm9, %v3476_v5, 0.0  ;;  %v6283_v27 = vpack.c.bf16 %v3520_v26, %v3519_v25 }
0x1315   :  { %3483 = vadd.xlane.f32.xlu0 %v3482_v7  ;;  %v3479_v8 = vsel %vm1580_vm8, %v3475_v9, 0.0 }
0x1316   :  { %3480 = vadd.xlane.f32.xlu1 %v3479_v8  ;;  %6284 = vmatprep.subr.bf16.mxu0 %v6283_v27 }
0x1317   :  { %6286 = vmatpush3.bf16.msra.mxu0 %v6283_v27 }
0x13a2   :  { %v3484_v11 = vpop.xlane.xlu0 %3483 }
0x13a3   :  { %v3486_v12 = vmul.f32 0.03125, %v3484_v11  ;;  %v3481_v13 = vpop.xlane.xlu1 %3480 }
0x13a4   :  { %v3485_v14 = vmul.f32 0.03125, %v3481_v13 }
0x13a5   :  { %v3488_v15 = vsub.f32 %v3476_v5, %v3486_v12 }
0x13a6   :  { %v3487_v16 = vsub.f32 %v3475_v9, %v3485_v14 }
0x13a7   :  { %v3490_v18 = vmul.f32 %v3488_v15, %v3488_v15 }
0x13a8   :  { %v3489_v19 = vmul.f32 %v3487_v16, %v3487_v16 }
0x13a9   :  { %v3494_v20 = vsel %vm1941_vm9, %v3490_v18, 0.0 }
0x13aa   :  { %3495 = vadd.xlane.f32.xlu0 %v3494_v20  ;;  %v3491_v21 = vsel %vm1580_vm8, %v3489_v19, 0.0 }
0x13ab   :  { %3492 = vadd.xlane.f32.xlu1 %v3491_v21 }
0x1437   :  { %v3496_v28 = vpop.xlane.xlu0 %3495 }
0x1438   :  { %v3498_v29 = vmul.f32 0.03125, %v3496_v28  ;;  %v3493_v30 = vpop.xlane.xlu1 %3492 }
0x1439   :  { %v3497_v31 = vmul.f32 0.03125, %v3493_v30 }
0x143a   :  { %v3500_v33 = vadd.f32 1e-05, %v3498_v29 }
0x143b   :  { %v3499_v34 = vadd.f32 1e-05, %v3497_v31 }
0x143c   :  { %6574 = vrsqrt.f32 %v3500_v33 }
0x143d   :  { %6576 = vrsqrt.f32 %v3499_v34 }
0x1446   :  { %v6575_v37 = vpop.eup %6574 }
0x1447   :  { %v6577_v39 = vpop.eup %6576  ;;  %v3504_v40 = vmul.f32 %v6575_v37, %v3488_v15 }
0x1448   :  { %v3503_v41 = vmul.f32 %v6577_v39, %v3487_v16 }
0x1449   :  { %v3510_v32 = vmul.f32 %v5411_v38, %v3504_v40 }
0x144a   :  { %v3509_v44 = vmul.f32 %v5411_v38, %v3503_v41 }
0x144b   :  { %v6996_v43 = vadd.f32 %v5412_v42, %v3510_v32 }
0x144c   :  { %v6994_v45 = vadd.f32 %v5412_v42, %v3509_v44 }
0x144e   :  { %5977 = vmatprep.mubr.msk.f32.mxu0 %vm1580_vm8, %v6994_v45 }
0x144f   :  { %5978 = vmatmul.mubr.msk.f32.vlgmr.msra.gmra.mrb[26].mxu0 %vm1580_vm8, %v6996_v43 }
0x1522   :  { %v5979_v2 = vpop.f32.mrb[26].mxu0 }
0x1523   :  { %v3604_v47 = vadd.f32 %v5979_v2, %v5413_v46  ;;  %v3598_v48 = vpop.f32.mrb[27].mxu0 }
0x1524   :  { %v3599_v49 = vadd.f32 %v5413_v46, %v3598_v48 }
0x1526   :  { %5984 = vmatprep.mubr.msk.f32.mxu0 %vm40_vm1, %v3599_v49  ;;  %v7003_v50 = vpack.i.bf16 %v3604_v47, %v3599_v49 }
0x1528   :  { %6472 = vrot.lane.b32.xlu0 %v7003_v50, %s6677_s0  ;;  %6467 = vrot.lane.b32.xlu1 %v7003_v50, %s6678_s1 }
0x152c   :  { %3700 = vrot.lane.b32.xlu0 %v3604_v47, %s6682_s3  ;;  %6477 = vrot.lane.b32.xlu1 %v7003_v50, %s6680_s29 }
0x1530   :  { %3791 = vrot.lane.b32.xlu0 %v3599_v49, %s6679_s28  ;;  %3698 = vrot.lane.b32.xlu1 %v3599_v49, %s6682_s3 }
0x1534   :  { %3884 = vrot.lane.b32.xlu0 %v3599_v49, %s6681_s30  ;;  %6482 = vrot.lane.b32.xlu1 %v7003_v50, %s6683_s4 }
0x1538   :  { %3793 = vrot.lane.b32.xlu1 %v3604_v47, %s6679_s28 }
0x153c   :  { %3886 = vrot.lane.b32.xlu1 %v3604_v47, %s6681_s30 }
0x159a   :  { %v6473_v51 = vpop.permute.xlu0 %6472  ;;  %v6468_v52 = vpop.permute.xlu1 %6467 }
0x159b   :  { %v6475_v53 = vunpack.i.h.bf16 %v6473_v51  ;;  %v6474_v54 = vunpack.i.l.bf16 %v6473_v51  ;;  %v6470_v55 = vunpack.i.h.bf16 %v6468_v52  ;;  %v6469_v56 = vunpack.i.l.bf16 %v6468_v52 }
0x159d   :  { %v6293_v57 = vpack.c.bf16 %v6475_v53, %v6474_v54  ;;  %v6287_v58 = vpack.c.bf16 %v6470_v55, %v6469_v56 }
0x159e   :  { %v3701_v59 = vpop.permute.xlu0 %3700  ;;  %v6478_v60 = vpop.permute.xlu1 %6477 }
0x159f   :  { %v6480_v61 = vunpack.i.h.bf16 %v6478_v60  ;;  %v6479_v62 = vunpack.i.l.bf16 %v6478_v60  ;;  %6289 = vmatprep.subr.msk.bf16.mxu0 %vm6865_vm10, %v6287_v58  ;;  %6295 = vmatprep.subr.msk.bf16.mxu1 %vm6865_vm10, %v6293_v57 }
0x15a0   :  { %6292 = vmatpush3.bf16.xpose.msk.msra.mxu0 %vm6865_vm10, %v6287_v58  ;;  %6298 = vmatpush3.bf16.xpose.msk.msra.mxu1 %vm6865_vm10, %v6293_v57 }
0x15a1   :  { %v6299_v0 = vpack.c.bf16 %v6480_v61, %v6479_v62 }
0x15a2   :  { %v3792_v1 = vpop.permute.xlu0 %3791  ;;  %v3699_v63 = vpop.permute.xlu1 %3698 }
0x15a3   :  { %5991 = vmatprep.mubr.msk.f32.mxu1 %vm40_vm1, %v3699_v63  ;;  %6301 = vmatprep.subr.msk.bf16.mxu0 %vm6865_vm10, %v6299_v0 }
0x15a6   :  { %v3885_v3 = vpop.permute.xlu0 %3884  ;;  %v6483_v4 = vpop.permute.xlu1 %6482 }
0x15a7   :  { %v6485_v5 = vunpack.i.h.bf16 %v6483_v4  ;;  %v6484_v9 = vunpack.i.l.bf16 %v6483_v4  ;;  %5985 = vmatmul.mubr.msk.f32.vlgmr.msra.gmra.mrb[28].mxu0 %vm40_vm1, %v3604_v47  ;;  %5992 = vmatmul.mubr.msk.f32.vlgmr.msra.gmra.mrb[24].mxu1 %vm40_vm1, %v3701_v59 }
0x15a8   :  { %6304 = vmatpush3.bf16.xpose.msk.msra.mxu0 %vm6865_vm10, %v6299_v0  ;;  %5998 = vmatprep.mubr.msk.f32.mxu0 %vm40_vm1, %v3792_v1 }
0x15a9   :  { %v6305_v7 = vpack.c.bf16 %v6485_v5, %v6484_v9  ;;  %6005 = vmatprep.mubr.msk.f32.mxu1 %vm40_vm1, %v3885_v3 }
0x15aa   :  { %v3794_v8 = vpop.permute.xlu1 %3793 }
0x15ab   :  { %6307 = vmatprep.subr.msk.bf16.mxu1 %vm6865_vm10, %v6305_v7 }
0x15ac   :  { %6310 = vmatpush3.bf16.xpose.msk.msra.mxu1 %vm6865_vm10, %v6305_v7 }
0x15ae   :  { %v3887_v11 = vpop.permute.xlu1 %3886 }
0x15af   :  { %5999 = vmatmul.mubr.msk.f32.vlgmr.msra.gmra.mrb[30].mxu0 %vm40_vm1, %v3794_v8 }
0x15b3   :  { %6006 = vmatmul.mubr.msk.f32.vlgmr.msra.gmra.mrb[26].mxu1 %vm40_vm1, %v3887_v11 }
0x167a   :  { %v5986_v12 = vpop.f32.mrb[28].mxu0  ;;  %v5993_v13 = vpop.f32.mrb[24].mxu1 }
0x167b   :  { %v3693_v14 = vadd.f32 %v5986_v12, %v6892_v35  ;;  %v3786_v15 = vadd.f32 %v5993_v13, %v6892_v35  ;;  %v3687_v16 = vpop.f32.mrb[29].mxu0  ;;  %v3780_v18 = vpop.f32.mrb[25].mxu1 }
0x167c   :  { %v3688_v19 = vadd.f32 %v3687_v16, %v6894_v36  ;;  %v3781_v20 = vadd.f32 %v3780_v18, %v6894_v36 }
0x167d   :  { %3697 = vst.msk [vmem:[#allocation2 + $0x8] sm:$0xf] %vm2160_vm11, %v3693_v14  ;;  %3790 = vst.msk [vmem:[#allocation2 + $0x18] sm:$0xf] %vm2160_vm11, %v3786_v15 }
0x167e   :  { %3696 = vst.msk [vmem:[#allocation2] sm:$0xff] %vm26_vm5, %v3688_v19  ;;  %3789 = vst.msk [vmem:[#allocation2 + $0x10] sm:$0xff] %vm26_vm5, %v3781_v20 }
0x1682   :  { %v6000_v17 = vpop.f32.mrb[30].mxu0 }
0x1683   :  { %v3879_v21 = vadd.f32 %v6000_v17, %v6892_v35  ;;  %v3873_v22 = vpop.f32.mrb[31].mxu0 }
0x1684   :  { %v3874_v23 = vadd.f32 %v3873_v22, %v6894_v36  ;;  %v3978_v24 = vld [vmem:[#allocation2 + $0x8] sm:$0xff]  ;;  %v3980_v37 = vld [vmem:[#allocation2 + $0x18] sm:$0xff] }
0x1685   :  { %3883 = vst.msk [vmem:[#allocation2 + $0x28] sm:$0xf] %vm2160_vm11, %v3879_v21  ;;  %v3988_v25 = vsel %vm26_vm5, %v3978_v24, -inf  ;;  %v3977_v26 = vld [vmem:[#allocation2] sm:$0xff]  ;;  %v3979_v31 = vld [vmem:[#allocation2 + $0x10] sm:$0xff]  ;;  %v3994_v40 = vsel %vm26_vm5, %v3980_v37, -inf }
0x1686   :  { %3882 = vst.msk [vmem:[#allocation2 + $0x20] sm:$0xff] %vm26_vm5, %v3874_v23  ;;  %v6007_v27 = vpop.f32.mrb[26].mxu1  ;;  %3989 = vmax.xlane.f32.xlu1 %v3988_v25  ;;  %v3985_v28 = vsel %vm26_vm5, %v3977_v26, -inf  ;;  %v3991_v34 = vsel %vm26_vm5, %v3979_v31, -inf }
0x1687   :  { %v3972_v29 = vadd.f32 %v6007_v27, %v6892_v35  ;;  %v3966_v30 = vpop.f32.mrb[27].mxu1  ;;  %3986 = vmax.xlane.f32.xlu0 %v3985_v28 }
0x1688   :  { %v3967_v33 = vadd.f32 %v3966_v30, %v6894_v36 }
0x1689   :  { %3976 = vst.msk [vmem:[#allocation2 + $0x38] sm:$0xf] %vm2160_vm11, %v3972_v29 }
0x168a   :  { %3975 = vst.msk [vmem:[#allocation2 + $0x30] sm:$0xff] %vm26_vm5, %v3967_v33 }
0x168b   :  { %3992 = vmax.xlane.f32.xlu0 %v3991_v34 }
0x168c   :  { %v3982_v35 = vld [vmem:[#allocation2 + $0x28] sm:$0xff] }
0x168d   :  { %v3981_v38 = vld [vmem:[#allocation2 + $0x20] sm:$0xff]  ;;  %v4000_v36 = vsel %vm26_vm5, %v3982_v35, -inf }
0x168e   :  { %v3997_v39 = vsel %vm26_vm5, %v3981_v38, -inf }
0x168f   :  { %3998 = vmax.xlane.f32.xlu1 %v3997_v39  ;;  %3995 = vmax.xlane.f32.xlu0 %v3994_v40 }
0x1690   :  { %v3984_v32 = vld [vmem:[#allocation2 + $0x38] sm:$0xff] }
0x1691   :  { %v3983_v41 = vld [vmem:[#allocation2 + $0x30] sm:$0xff]  ;;  %v4006_v44 = vsel %vm26_vm5, %v3984_v32, -inf }
0x1692   :  { %v4003_v42 = vsel %vm26_vm5, %v3983_v41, -inf }
0x1693   :  { %4004 = vmax.xlane.f32.xlu1 %v4003_v42  ;;  %4001 = vmax.xlane.f32.xlu0 %v4000_v36 }
0x1697   :  { %4007 = vmax.xlane.f32.xlu0 %v4006_v44 }
0x16a4   :  { %6487 = vrot.lane.b32.xlu1 %v7003_v50, %s6685_s5 }
0x1713   :  { %v3990_v46 = vpop.xlane.xlu1 %3989 }
0x1714   :  { %v4010_v2 = vsub.f32 %v3978_v24, %v3990_v46  ;;  %v3987_v47 = vpop.xlane.xlu0 %3986 }
0x1715   :  { %v4009_v48 = vsub.f32 %v3977_v26, %v3987_v47 }
0x1716   :  { %v4019_v49 = vmul.f32 1.442695, %v4010_v2 }
0x1717   :  { %v4017_v51 = vmul.f32 1.442695, %v4009_v48 }
0x1718   :  { %6578 = vpow2.f32 %v4019_v49  ;;  %v3993_v52 = vpop.xlane.xlu0 %3992 }
0x1719   :  { %6580 = vpow2.f32 %v4017_v51  ;;  %v4011_v53 = vsub.f32 %v3979_v31, %v3993_v52 }
0x171b   :  { %v4021_v54 = vmul.f32 1.442695, %v4011_v53 }
0x171c   :  { %v3999_v55 = vpop.xlane.xlu1 %3998  ;;  %v3996_v56 = vpop.xlane.xlu0 %3995 }
0x171d   :  { %6582 = vpow2.f32 %v4021_v54  ;;  %v4013_v57 = vsub.f32 %v3981_v38, %v3999_v55  ;;  %v4012_v58 = vsub.f32 %v3980_v37, %v3996_v56 }
0x171f   :  { %v4025_v59 = vmul.f32 1.442695, %v4013_v57  ;;  %v4023_v60 = vmul.f32 1.442695, %v4012_v58 }
0x1720   :  { %v4005_v61 = vpop.xlane.xlu1 %4004  ;;  %v4002_v62 = vpop.xlane.xlu0 %4001 }
0x1721   :  { %6584 = vpow2.f32 %v4025_v59  ;;  %v4014_v0 = vsub.f32 %v3982_v35, %v4002_v62  ;;  %v4015_v5 = vsub.f32 %v3983_v41, %v4005_v61 }
0x1722   :  { %v6579_v1 = vpop.eup %6578  ;;  %6586 = vpow2.f32 %v4023_v60 }
0x1723   :  { %v6581_v63 = vpop.eup %6580  ;;  %v4027_v3 = vmul.f32 1.442695, %v4014_v0  ;;  %v4036_v4 = vsel %vm26_vm5, %v6579_v1, 0.0  ;;  %v4029_v18 = vmul.f32 1.442695, %v4015_v5 }
0x1724   :  { %v6488_v9 = vpop.permute.xlu1 %6487  ;;  %4037 = vadd.xlane.f32.xlu0 %v4036_v4  ;;  %v4008_v7 = vpop.xlane.xlu0 %4007  ;;  %v4033_v8 = vsel %vm26_vm5, %v6581_v63, 0.0  ;;  %v4074_v4 = vld [vmem:[#allocation3 + $0x180] sm:$0xff] }
0x1725   :  { %v6490_v11 = vunpack.i.h.bf16 %v6488_v9  ;;  %v6489_v12 = vunpack.i.l.bf16 %v6488_v9  ;;  %v4016_v13 = vsub.f32 %v3984_v32, %v4008_v7  ;;  %4034 = vadd.xlane.f32.xlu1 %v4033_v8  ;;  %6588 = vpow2.f32 %v4027_v3  ;;  %v4073_v3 = vld [vmem:[#allocation3 + $0x178] sm:$0xff]  ;;  %v4075_v7 = vld [vmem:[#allocation3 + $0x188] sm:$0xff] }
0x1726   :  { %6015 = vmatprep.subr.mxu1 %v4073_v3 }
0x1727   :  { %v6583_v14 = vpop.eup %6582  ;;  %v6311_v15 = vpack.c.bf16 %v6490_v11, %v6489_v12  ;;  %v4031_v16 = vmul.f32 1.442695, %v4016_v13  ;;  %6016 = vmatpush3.msra.mxu1 %v4073_v3  ;;  %v4076_v12 = vld [vmem:[#allocation3 + $0x190] sm:$0xff]  ;;  %v4922_v3 = vld [vmem:[#allocation3 + $0x1e8] sm:$0xff] }
0x1728   :  { %v4039_v19 = vsel %vm26_vm5, %v6583_v14, 0.0  ;;  %6027 = vmatprep.subr.mxu1 %v4074_v4 }
0x1729   :  { %6590 = vpow2.f32 %v4031_v16  ;;  %6313 = vmatprep.subr.msk.bf16.mxu0 %vm6792_vm7, %v6311_v15  ;;  %4040 = vadd.xlane.f32.xlu1 %v4039_v19 }
0x172a   :  { %6316 = vmatpush3.bf16.msk.msra.mxu0 %vm6792_vm7, %v6311_v15  ;;  %6592 = vpow2.f32 %v4029_v18  ;;  %v5437_v18 = vld [vmem:[#allocation3 + $0x2b1] ss:$0 sm:$0xff] }
0x172b   :  { %v6585_v20 = vpop.eup %6584 }
0x172c   :  { %v6587_v17 = vpop.eup %6586  ;;  %v4045_v21 = vsel %vm26_vm5, %v6585_v20, 0.0 }
0x172d   :  { %4046 = vadd.xlane.f32.xlu1 %v4045_v21  ;;  %v4042_v22 = vsel %vm26_vm5, %v6587_v17, 0.0 }
0x172e   :  { %4043 = vadd.xlane.f32.xlu0 %v4042_v22 }
0x172f   :  { %v6589_v23 = vpop.eup %6588 }
0x1730   :  { %v4048_v24 = vsel %vm26_vm5, %v6589_v23, 0.0 }
0x1732   :  { %4049 = vadd.xlane.f32.xlu0 %v4048_v24 }
0x1733   :  { %v7078_v25 = vpop.eup %6590 }
0x1734   :  { %v4054_v26 = vsel %vm26_vm5, %v7078_v25, 0.0  ;;  %v6593_v27 = vpop.eup %6592 }
0x1735   :  { %v4051_v28 = vsel %vm26_vm5, %v6593_v27, 0.0 }
0x1736   :  { %4055 = vadd.xlane.f32.xlu0 %v4054_v26 }
0x173a   :  { %4052 = vadd.xlane.f32.xlu0 %v4051_v28 }
0x173e   :  { %6497 = vrot.lane.b32.xlu1 %v7003_v50, %s6686_s6 }
0x1742   :  { %6502 = vrot.lane.b32.xlu1 %v7003_v50, %s6687_s7 }
0x1750   :  { %6492 = vrot.lane.b32.xlu0 %v7003_v50, %s6688_s8 }
0x17b1   :  { %v4038_v29 = vpop.xlane.xlu0 %4037 }
0x17b2   :  { %6594 = vrcp.f32 %v4038_v29  ;;  %v4035_v30 = vpop.xlane.xlu1 %4034 }
0x17b3   :  { %6596 = vrcp.f32 %v4035_v30 }
0x17b6   :  { %v4041_v31 = vpop.xlane.xlu1 %4040 }
0x17b7   :  { %6598 = vrcp.f32 %v4041_v31 }
0x17ba   :  { %v4047_v41 = vpop.xlane.xlu1 %4046 }
0x17bb   :  { %v4044_v33 = vpop.xlane.xlu0 %4043 }
0x17bc   :  { %v6595_v34 = vpop.eup %6594  ;;  %6600 = vrcp.f32 %v4044_v33 }
0x17bd   :  { %v6597_v37 = vpop.eup %6596  ;;  %v4066_v39 = vmul.f32 %v6595_v34, %v6579_v1  ;;  %6602 = vrcp.f32 %v4047_v41 }
0x17be   :  { %v4065_v38 = vmul.f32 %v6597_v37, %v6581_v63  ;;  %v6498_v36 = vpop.permute.xlu1 %6497 }
0x17bf   :  { %v4050_v40 = vpop.xlane.xlu0 %4049  ;;  %v6500_v46 = vunpack.i.h.bf16 %v6498_v36  ;;  %v6499_v2 = vunpack.i.l.bf16 %v6498_v36 }
0x17c0   :  { %6012 = vmatprep.mubr.msk.f32.mxu0 %vm26_vm5, %v4065_v38  ;;  %6604 = vrcp.f32 %v4050_v40  ;;  %v4809_v38 = vld [vmem:[#allocation3 + $0x1a0] sm:$0xff]  ;;  %v4810_v40 = vld [vmem:[#allocation3 + $0x1a8] sm:$0xff] }
0x17c1   :  { %v6599_v35 = vpop.eup %6598  ;;  %6013 = vmatmul.mubr.msk.f32.vlgmr.msra.gmra.mrb[32].mxu0 %vm26_vm5, %v4066_v39  ;;  %v6323_v54 = vpack.c.bf16 %v6500_v46, %v6499_v2 }
0x17c2   :  { %v4067_v42 = vmul.f32 %v6599_v35, %v6583_v14  ;;  %v6503_v49 = vpop.permute.xlu1 %6502  ;;  %v4811_v35 = vld [vmem:[#allocation3 + $0x1b0] sm:$0xff] }
0x17c3   :  { %v4056_v50 = vpop.xlane.xlu0 %4055  ;;  %v6505_v55 = vunpack.i.h.bf16 %v6503_v49  ;;  %v6504_v56 = vunpack.i.l.bf16 %v6503_v49  ;;  %v6339_v41 = vpack.c.bf16 %v4811_v35, %v4810_v40 }
0x17c4   :  { %6024 = vmatprep.mubr.msk.f32.mxu0 %vm26_vm5, %v4067_v42 }
0x17c5   :  { %v6329_v61 = vpack.c.bf16 %v6505_v55, %v6504_v56 }
0x17c6   :  { %v6601_v52 = vpop.eup %6600 }
0x17c7   :  { %v4053_v32 = vpop.xlane.xlu0 %4052  ;;  %v6603_v53 = vpop.eup %6602  ;;  %v4068_v57 = vmul.f32 %v6601_v52, %v6587_v17  ;;  %v5454_v52 = vld [vmem:[#allocation3 + $0x2b3] ss:$0 sm:$0xff] }
0x17c8   :  { %6606 = vrcp.f32 %v4053_v32  ;;  %v4069_v59 = vmul.f32 %v6603_v53, %v6585_v20 }
0x17c9   :  { %6608 = vrcp.f32 %v4056_v50 }
0x17ca   :  { %v6605_v58 = vpop.eup %6604 }
0x17cb   :  { %v6493_v44 = vpop.permute.xlu0 %6492  ;;  %v4070_v62 = vmul.f32 %v6605_v58, %v6589_v23  ;;  %v4917_v58 = vld [vmem:[#allocation3 + $0x1c0] sm:$0xff] }
0x17cc   :  { %v6495_v47 = vunpack.i.h.bf16 %v6493_v44  ;;  %v6494_v48 = vunpack.i.l.bf16 %v6493_v44 }
0x17ce   :  { %v6317_v51 = vpack.c.bf16 %v6495_v47, %v6494_v48  ;;  %v5453_v47 = vld [vmem:[#allocation3 + $0x2b2] ss:$0 sm:$0xff] }
0x17d0   :  { %6319 = vmatprep.subr.msk.bf16.mxu0 %vm6792_vm7, %v6317_v51 }
0x17d1   :  { %6322 = vmatpush3.bf16.msk.msra.mxu0 %vm6792_vm7, %v6317_v51 }
0x17d2   :  { %6325 = vmatprep.subr.msk.bf16.mxu0 %vm6792_vm7, %v6323_v54  ;;  %v6607_v60 = vpop.eup %6606 }
0x17d3   :  { %v6609_v0 = vpop.eup %6608  ;;  %v4071_v1 = vmul.f32 %v6607_v60, %v6593_v27  ;;  %v4918_v60 = vld [vmem:[#allocation3 + $0x1c8] sm:$0xff] }
0x17d4   :  { %6025 = vmatmul.mubr.msk.f32.vlgmr.msra.gmra.mrb[34].mxu0 %vm26_vm5, %v4068_v57  ;;  %v4072_v63 = vmul.f32 %v6609_v0, %v7078_v25  ;;  %v4916_v57 = vld [vmem:[#allocation3 + $0x1b8] sm:$0xff] }
0x17d5   :  { %6328 = vmatpush3.bf16.msk.msra.mxu0 %vm6792_vm7, %v6323_v54  ;;  %6036 = vmatprep.mubr.msk.f32.mxu0 %vm26_vm5, %v4069_v59  ;;  %v6343_v59 = vpack.c.bf16 %v4917_v58, %v4916_v57  ;;  %v4920_v0 = vld [vmem:[#allocation3 + $0x1d8] sm:$0xff]  ;;  %v5461_v57 = vld [vmem:[#allocation3 + $0x2b6] ss:$0 sm:$0xff] }
0x17d6   :  { %6331 = vmatprep.subr.msk.bf16.mxu0 %vm6792_vm7, %v6329_v61 }
0x17d8   :  { %6037 = vmatmul.mubr.msk.f32.vlgmr.msra.gmra.mrb[36].mxu0 %vm26_vm5, %v4070_v62 }
0x17d9   :  { %6334 = vmatpush3.bf16.msk.msra.mxu0 %vm6792_vm7, %v6329_v61  ;;  %6048 = vmatprep.mubr.msk.f32.mxu0 %vm26_vm5, %v4071_v1  ;;  %v4919_v61 = vld [vmem:[#allocation3 + $0x1d0] sm:$0xff]  ;;  %v4921_v1 = vld [vmem:[#allocation3 + $0x1e0] sm:$0xff] }
0x17da   :  { %v6347_v62 = vpack.c.bf16 %v4919_v61, %v4918_v60  ;;  %v5462_v61 = vld [vmem:[#allocation3 + $0x2b7] ss:$0 sm:$0xff] }
0x17dc   :  { %6049 = vmatmul.mubr.msk.f32.vlgmr.msra.gmra.mrb[38].mxu0 %vm26_vm5, %v4072_v63  ;;  %v6351_v63 = vpack.c.bf16 %v4921_v1, %v4920_v0 }
0x1894   :  { %v6014_v5 = vpop.f32.mrb[32].mxu0 }
0x1895   :  { %v4157_v9 = vpop.f32.mrb[33].mxu0 }
0x1896   :  { %6017 = vmatprep.mubr.msk.f32.mxu1 %vm40_vm1, %v4157_v9  ;;  %v5455_v9 = vld [vmem:[#allocation3 + $0x2b4] ss:$0 sm:$0xff] }
0x1897   :  { %6018 = vmatmul.mubr.msk.f32.vlgmr.msra.gmra.mrb[28].mxu1 %vm40_vm1, %v6014_v5 }
0x1898   :  { %6028 = vmatpush3.msra.mxu1 %v4074_v4  ;;  %v4923_v4 = vld [vmem:[#allocation3 + $0x1f0] sm:$0xff] }
0x1899   :  { %6039 = vmatprep.subr.mxu1 %v4075_v7  ;;  %v6355_v5 = vpack.c.bf16 %v4923_v4, %v4922_v3  ;;  %v5129_v3 = vld [vmem:[#allocation3 + $0x1f8] sm:$0xff]  ;;  %v5130_v4 = vld [vmem:[#allocation3 + $0x200] sm:$0xff] }
0x18a7   :  { %v6026_v8 = vpop.f32.mrb[34].mxu0 }
0x18a8   :  { %v4332_v11 = vpop.f32.mrb[35].mxu0 }
0x18a9   :  { %6029 = vmatprep.mubr.msk.f32.mxu1 %vm40_vm1, %v4332_v11 }
0x18aa   :  { %6030 = vmatmul.mubr.msk.f32.vlgmr.msra.gmra.mrb[28].mxu1 %vm40_vm1, %v6026_v8 }
0x18ab   :  { %v6038_v13 = vpop.f32.mrb[36].mxu0  ;;  %6040 = vmatpush3.msra.mxu1 %v4075_v7 }
0x18ac   :  { %v4503_v14 = vpop.f32.mrb[37].mxu0  ;;  %6051 = vmatprep.subr.mxu1 %v4076_v12 }
0x18ad   :  { %6041 = vmatprep.mubr.msk.f32.mxu1 %vm40_vm1, %v4503_v14 }
0x18af   :  { %v6050_v15 = vpop.f32.mrb[38].mxu0 }
0x18b0   :  { %v4674_v16 = vpop.f32.mrb[39].mxu0 }
0x18b2   :  { %6042 = vmatmul.mubr.msk.f32.vlgmr.msra.gmra.mrb[28].mxu1 %vm40_vm1, %v6038_v13 }
0x18b3   :  { %6052 = vmatpush3.msra.mxu1 %v4076_v12  ;;  %6053 = vmatprep.mubr.msk.f32.mxu1 %vm40_vm1, %v4674_v16 }
0x18b4   :  { %6344 = vmatprep.subr.bf16.mxu1 %v6343_v59 }
0x18ba   :  { %6054 = vmatmul.mubr.msk.f32.vlgmr.msra.gmra.mrb[28].mxu1 %vm40_vm1, %v6050_v15 }
0x18bb   :  { %6346 = vmatpush3.bf16.msra.mxu1 %v6343_v59 }
0x18bc   :  { %6348 = vmatprep.subr.bf16.mxu1 %v6347_v62 }
0x18bf   :  { %6350 = vmatpush3.bf16.msra.mxu1 %v6347_v62 }
0x18c0   :  { %6352 = vmatprep.subr.bf16.mxu1 %v6351_v63 }
0x18c3   :  { %6354 = vmatpush3.bf16.msra.mxu1 %v6351_v63 }
0x18c4   :  { %6356 = vmatprep.subr.bf16.mxu1 %v6355_v5 }
0x18c7   :  { %6358 = vmatpush3.bf16.msra.mxu1 %v6355_v5 }
0x198d   :  { %v6055_v19 = vpop.f32.mrb[28].mxu1 }
0x198e   :  { %v6376_v20 = vadd.f32 %v6055_v19, %v5437_v18  ;;  %v4755_v17 = vpop.f32.mrb[29].mxu1 }
0x198f   :  { %v6377_v21 = vadd.f32 %v5437_v18, %v4755_v17 }
0x1990   :  { %v4767_v22 = vadd.f32 %v6376_v20, %v6996_v43 }
0x1991   :  { %v4766_v23 = vadd.f32 %v6377_v21, %v6994_v45  ;;  %v4808_v45 = vld [vmem:[#allocation3 + $0x198] sm:$0xff] }
0x1992   :  { %v4773_v24 = vsel %vm1941_vm9, %v4767_v22, 0.0  ;;  %v6335_v39 = vpack.c.bf16 %v4809_v38, %v4808_v45 }
0x1993   :  { %4774 = vadd.xlane.f32.xlu0 %v4773_v24  ;;  %v4770_v25 = vsel %vm1580_vm8, %v4766_v23, 0.0 }
0x1994   :  { %4771 = vadd.xlane.f32.xlu1 %v4770_v25  ;;  %6336 = vmatprep.subr.bf16.mxu0 %v6335_v39 }
0x1995   :  { %6338 = vmatpush3.bf16.msra.mxu0 %v6335_v39 }
0x1996   :  { %6340 = vmatprep.subr.bf16.mxu0 %v6339_v41 }
0x1999   :  { %6342 = vmatpush3.bf16.msra.mxu0 %v6339_v41 }
0x1a20   :  { %v4775_v26 = vpop.xlane.xlu0 %4774 }
0x1a21   :  { %v4777_v27 = vmul.f32 0.03125, %v4775_v26  ;;  %v4772_v28 = vpop.xlane.xlu1 %4771 }
0x1a22   :  { %v4776_v29 = vmul.f32 0.03125, %v4772_v28 }
0x1a23   :  { %v4779_v30 = vsub.f32 %v4767_v22, %v4777_v27 }
0x1a24   :  { %v4778_v31 = vsub.f32 %v4766_v23, %v4776_v29 }
0x1a25   :  { %v4781_v33 = vmul.f32 %v4779_v30, %v4779_v30 }
0x1a26   :  { %v4780_v34 = vmul.f32 %v4778_v31, %v4778_v31 }
0x1a27   :  { %v4785_v37 = vsel %vm1941_vm9, %v4781_v33, 0.0 }
0x1a28   :  { %4786 = vadd.xlane.f32.xlu0 %v4785_v37  ;;  %v4782_v43 = vsel %vm1580_vm8, %v4780_v34, 0.0 }
0x1a29   :  { %4783 = vadd.xlane.f32.xlu1 %v4782_v43 }
0x1ab5   :  { %v4787_v42 = vpop.xlane.xlu0 %4786 }
0x1ab6   :  { %v4789_v50 = vmul.f32 0.03125, %v4787_v42  ;;  %v4784_v36 = vpop.xlane.xlu1 %4783 }
0x1ab7   :  { %v4788_v32 = vmul.f32 0.03125, %v4784_v36 }
0x1ab8   :  { %v4791_v44 = vadd.f32 1e-05, %v4789_v50 }
0x1ab9   :  { %v4790_v46 = vadd.f32 1e-05, %v4788_v32 }
0x1aba   :  { %6610 = vrsqrt.f32 %v4791_v44 }
0x1abb   :  { %6612 = vrsqrt.f32 %v4790_v46 }
0x1ac4   :  { %v6611_v2 = vpop.eup %6610 }
0x1ac5   :  { %v6613_v48 = vpop.eup %6612  ;;  %v4795_v49 = vmul.f32 %v6611_v2, %v4779_v30 }
0x1ac6   :  { %v4794_v51 = vmul.f32 %v6613_v48, %v4778_v31  ;;  %v5458_v31 = vld [vmem:[#allocation3 + $0x2b5] ss:$0 sm:$0xff]  ;;  %v6689_v48 = vmov 0.0|0.0  }
0x1ac7   :  { %v4801_v53 = vmul.f32 %v5453_v47, %v4795_v49  ;;  %6359 = vmatprep.subr.bf16.mxu0 %v6689_v48  ;;  %6369 = vmatprep.subr.bf16.mxu1 %v6689_v48 }
0x1ac8   :  { %v4800_v54 = vmul.f32 %v5453_v47, %v4794_v51 }
0x1ac9   :  { %v4807_v56 = vadd.f32 %v5454_v52, %v4801_v53 }
0x1aca   :  { %v4806_v55 = vadd.f32 %v5454_v52, %v4800_v54 }
0x1acc   :  { %6064 = vmatprep.mubr.msk.f32.mxu0 %vm1580_vm8, %v4806_v55 }
0x1acd   :  { %6065 = vmatmul.mubr.msk.f32.vlgmr.msra.gmra.mrb[40].mxu0 %vm1580_vm8, %v4807_v56 }
0x1ace   :  { %6090 = vmatprep.mubr.msk.f32.mxu0 %vm6690_vm13, %v6684_v10 }
0x1ba0   :  { %v6066_v7 = vpop.f32.mrb[40].mxu0 }
0x1ba1   :  { %v4895_v8 = vadd.f32 %v6066_v7, %v5455_v9  ;;  %v4889_v11 = vpop.f32.mrb[41].mxu0  ;;  %v6364_v7 = vpack.c.bf16 %v5130_v4, %v5129_v3 }
0x1ba2   :  { %v4890_v12 = vadd.f32 %v5455_v9, %v4889_v11  ;;  %v5052_v9 = vld [vmem:[#allocation3 + $0x298] sm:$0x3]  ;;  %v5132_v11 = vld [vmem:[#allocation3 + $0x210] sm:$0xff] }
0x1ba3   :  { %v4899_v13 = vmul.f32 %v4895_v8, %v4895_v8 }
0x1ba4   :  { %v4898_v14 = vmul.f32 %v4890_v12, %v4890_v12 }
0x1ba5   :  { %v4901_v15 = vmul.f32 %v4899_v13, %v4895_v8 }
0x1ba6   :  { %v4900_v16 = vmul.f32 %v4898_v14, %v4890_v12 }
0x1ba7   :  { %v4903_v18 = vmul.f32 0.044715, %v4901_v15  ;;  %v5213_v15 = vld [vmem:[#allocation3 + $0x220] sm:$0xff] }
0x1ba8   :  { %v4902_v19 = vmul.f32 0.044715, %v4900_v16  ;;  %v6370_v16 = vpack.c.bf16 %v5213_v15, %v5212_v6 }
0x1ba9   :  { %v4905_v20 = vadd.f32 %v4903_v18, %v4895_v8  ;;  %v5465_v18 = vld [vmem:[#allocation3 + $0x2b8] ss:$0 sm:$0xff] }
0x1baa   :  { %v4904_v17 = vadd.f32 %v4902_v19, %v4890_v12 }
0x1bab   :  { %v4907_v21 = vmul.f32 0.7978846, %v4905_v20 }
0x1bac   :  { %v4906_v22 = vmul.f32 0.7978846, %v4904_v17 }
0x1bad   :  { %6614 = vtanh.f32 %v4907_v21 }
0x1bae   :  { %6616 = vtanh.f32 %v4906_v22  ;;  %v5467_v22 = vld [vmem:[#allocation3 + $0x2b9] ss:$0 sm:$0xff] }
0x1bb7   :  { %v6615_v23 = vpop.eup %6614 }
0x1bb8   :  { %v6617_v24 = vpop.eup %6616  ;;  %v4911_v25 = vadd.f32 1.0, %v6615_v23 }
0x1bb9   :  { %v4910_v26 = vadd.f32 1.0, %v6617_v24 }
0x1bba   :  { %v4913_v27 = vmul.f32 0.5, %v4911_v25 }
0x1bbb   :  { %v4912_v28 = vmul.f32 0.5, %v4910_v26 }
0x1bbc   :  { %v4915_v30 = vmul.f32 %v4913_v27, %v4895_v8  ;;  %v5131_v8 = vld [vmem:[#allocation3 + $0x208] sm:$0xff] }
0x1bbd   :  { %v4914_v29 = vmul.f32 %v4912_v28, %v4890_v12  ;;  %v6367_v12 = vpack.c.bf16 %v5132_v11, %v5131_v8 }
0x1bbf   :  { %6083 = vmatprep.mubr.msk.f32.mxu1 %vm3393_vm12, %v4914_v29 }
0x1bc0   :  { %6084 = vmatmul.mubr.msk.f32.vlgmr.msra.gmra.mrb[30].mxu1 %vm3393_vm12, %v4915_v30 }
0x1bc1   :  { %6108 = vmatprep.mubr.msk.f32.mxu1 %vm6690_vm13, %v6684_v10  ;;  %6371 = vmatpush3.bf16.msra.mxu1 %v6370_v16 }
0x1c93   :  { %v6085_v33 = vpop.f32.mrb[30].mxu1 }
0x1c94   :  { %v5007_v34 = vadd.f32 %v6085_v33, %v5458_v31  ;;  %v5001_v37 = vpop.f32.mrb[31].mxu1 }
0x1c95   :  { %v5002_v43 = vadd.f32 %v5458_v31, %v5001_v37 }
0x1c96   :  { %v5011_v45 = vadd.f32 %v5007_v34, %v4807_v56 }
0x1c97   :  { %v5010_v38 = vadd.f32 %v5002_v43, %v4806_v55 }
0x1c98   :  { %v5017_v39 = vsel %vm1941_vm9, %v5011_v45, 0.0 }
0x1c99   :  { %5018 = vadd.xlane.f32.xlu0 %v5017_v39  ;;  %v5014_v40 = vsel %vm1580_vm8, %v5010_v38, 0.0 }
0x1c9a   :  { %5015 = vadd.xlane.f32.xlu1 %v5014_v40 }
0x1d26   :  { %v5019_v35 = vpop.xlane.xlu0 %5018 }
0x1d27   :  { %v5021_v41 = vmul.f32 0.03125, %v5019_v35  ;;  %v5016_v42 = vpop.xlane.xlu1 %5015 }
0x1d28   :  { %v5020_v50 = vmul.f32 0.03125, %v5016_v42 }
0x1d29   :  { %v5023_v36 = vsub.f32 %v5011_v45, %v5021_v41 }
0x1d2a   :  { %v5022_v32 = vsub.f32 %v5010_v38, %v5020_v50 }
0x1d2b   :  { %v5025_v44 = vmul.f32 %v5023_v36, %v5023_v36 }
0x1d2c   :  { %v5024_v46 = vmul.f32 %v5022_v32, %v5022_v32 }
0x1d2d   :  { %v5029_v2 = vsel %vm1941_vm9, %v5025_v44, 0.0 }
0x1d2e   :  { %5030 = vadd.xlane.f32.xlu0 %v5029_v2  ;;  %v5026_v47 = vsel %vm1580_vm8, %v5024_v46, 0.0 }
0x1d2f   :  { %5027 = vadd.xlane.f32.xlu1 %v5026_v47 }
0x1dbb   :  { %v5031_v49 = vpop.xlane.xlu0 %5030 }
0x1dbc   :  { %v5033_v51 = vmul.f32 0.03125, %v5031_v49  ;;  %v5028_v52 = vpop.xlane.xlu1 %5027 }
0x1dbd   :  { %v5032_v53 = vmul.f32 0.03125, %v5028_v52 }
0x1dbe   :  { %v5035_v54 = vadd.f32 1e-05, %v5033_v51 }
0x1dbf   :  { %v5034_v55 = vadd.f32 1e-05, %v5032_v53 }
0x1dc0   :  { %6618 = vrsqrt.f32 %v5035_v54 }
0x1dc1   :  { %6620 = vrsqrt.f32 %v5034_v55 }
0x1dca   :  { %v6619_v56 = vpop.eup %6618 }
0x1dcb   :  { %v6621_v58 = vpop.eup %6620  ;;  %v5039_v59 = vmul.f32 %v6619_v56, %v5023_v36 }
0x1dcc   :  { %v5038_v60 = vmul.f32 %v6621_v58, %v5022_v32 }
0x1dcd   :  { %v5045_v62 = vmul.f32 %v5461_v57, %v5039_v59 }
0x1dce   :  { %v5044_v0 = vmul.f32 %v5461_v57, %v5038_v60 }
0x1dcf   :  { %v5051_v1 = vadd.f32 %v5462_v61, %v5045_v62 }
0x1dd0   :  { %v5050_v63 = vadd.f32 %v5462_v61, %v5044_v0 }
0x1dd2   :  { %v6360_v5 = vpack.c.bf16 %v5051_v1, %v5050_v63 }
0x1dd4   :  { %6362 = vmatpush3.bf16.msk.msra.mxu0 %vm6792_vm7, %v6360_v5 }
0x1dd5   :  { %6363 = vmatprep.subr.bf16.mxu0 %v6689_v48 }
0x1dd7   :  { %6091 = vmatmul.mubr.msk.f32.vlgmr.msra.gmra.mrb[42].mxu0 %vm26_vm5, %v5052_v9 }
0x1dd8   :  { %6365 = vmatpush3.bf16.msra.mxu0 %v6364_v7  ;;  %6101 = vmatprep.mubr.msk.f32.mxu0 %vm6690_vm13, %v6684_v10 }
0x1dd9   :  { %6366 = vmatprep.subr.bf16.mxu0 %v6689_v48 }
0x1ddc   :  { %6368 = vmatpush3.bf16.msra.mxu0 %v6367_v12 }
0x1eaa   :  { %v5125_v13 = vpop.f32.mrb[42].mxu0 }
0x1eab   :  { %v6092_v14 = vpop.f32.mrb[43].mxu0  ;;  %6102 = vmatmul.mubr.msk.f32.vlgmr.msra.gmra.mrb[44].mxu0 %vm1580_vm8, %v5125_v13 }
0x1f7e   :  { %v5207_v19 = vpop.f32.mrb[44].mxu0 }
0x1f7f   :  { %v5208_v20 = vadd.f32 %v5465_v18, %v5207_v19  ;;  %v6103_v17 = vpop.f32.mrb[45].mxu0 }
0x1f81   :  { %6622 = vtanh.f32 %v5208_v20 }
0x1f8b   :  { %v6623_v21 = vpop.eup %6622 }
0x1f8c   :  { %6109 = vmatmul.mubr.msk.f32.vlgmr.msra.gmra.mrb[32].mxu1 %vm122_vm0, %v6623_v21 }
0x205f   :  { %v5288_v10 = vpop.f32.mrb[32].mxu1 }
0x2060   :  { %v5289_v23 = vadd.f32 %v5467_v22, %v5288_v10  ;;  %v6110_v24 = vpop.f32.mrb[33].mxu1 }
0x2062   :  { %5293 = vst.msk [vmem:[#allocation6] sm:$0x3] %vm5292_vm14, %v5289_v23 }
0x2063   :  { %6657 = shalt.err (!%p6654_p12)
}
0x2064   :  { %s6658_s14 = scalar_lea.hbm %s7157_s2, 32 }
0x2065   :  { %p6659_p13 = scmp.ne.s32.totalorder %s7157_s2, %s6658_s14  ;;  %p6662_p0 = scmp.lt.u32.totalorder %s6658_s14, %s7157_s2 }
0x2067   :  { %p6664_p1 = pnand %p6662_p0, %p6659_p13 }
0x2069   :  { %6667 = shalt.err (!%p6664_p1)
}
0x206a   :  { %5303 = dma.vmem_to_hbm [thread:$0]  %s5301_s10, 32, %s7157_s2, [#allocation5]  }
0x206b   :  { %6670 = dma.done.wait [#allocation5], 32  }
0x206c   :  { %6671 = vsyncadd [#allocation5], 4294967264 }
0x206d   :  { %5307 = vsyncpa [#allocation4], 1 }
0x206e   :  { %5308 = vsyncpa [#allocation5], 1 }

</bundles_post_ra>
